<compile_context>
chip_gen: v7x
topology: tpu7x:2x2x1
jax: 0.10.0
libtpu: 0.0.40
codegen_flags: <defaults>
</compile_context>

<pallas_src>
import functools
import math

import jax
import jax.numpy as jnp
from jax.experimental import pallas as pl
from jax.experimental.pallas import tpu as pltpu


# ----------------------------------------------------------------------------
# In-kernel helpers (operate on loaded VMEM values, one batch element at a time)
# ----------------------------------------------------------------------------

def _layernorm(y, g, b, eps):
    # nn.LayerNorm: biased variance, eps inside sqrt; g/b broadcast from (1, D)
    mean = jnp.mean(y, axis=-1, keepdims=True)
    c = y - mean
    var = jnp.mean(c * c, axis=-1, keepdims=True)
    return c * jax.lax.rsqrt(var + eps) * g + b


def _attention_block(q2, k2, v2, wo, bo, n_head, causal):
    """Multi-head attention + output projection for one batch element.

    q2: [Tq, D] (q already pre-scaled by 1/sqrt(head_dim) via weight folding)
    k2, v2: [Tk, D]; wo: [D, D] in [Din, Dout] layout; bo: [1, D].
    The output projection is fused into the per-head loop:
        concat(heads) @ Wo == sum_h head_h @ Wo[h*hd:(h+1)*hd, :]
    which avoids any in-kernel concatenate / transpose.
    """
    tq, d = q2.shape
    tk = k2.shape[0]
    hd = d // n_head
    mask = None
    if causal:
        row = jax.lax.broadcasted_iota(jnp.int32, (tq, tk), 0)
        col = jax.lax.broadcasted_iota(jnp.int32, (tq, tk), 1)
        mask = col > row                      # computed once, reused per head
    acc = None
    for h in range(n_head):
        lo, hi = h * hd, (h + 1) * hd
        qh = q2[:, lo:hi]
        kh = k2[:, lo:hi]
        vh = v2[:, lo:hi]
        # q @ k^T without materializing a transpose (contract last dims)
        s = jax.lax.dot_general(qh, kh, (((1,), (1,)), ((), ())),
                                preferred_element_type=jnp.float32)   # [Tq, Tk]
        if causal:
            # reference: masked_fill(attn_mask == 0, -1e9) with subsequent mask
            s = jnp.where(mask, -1000000000.0, s)
        s = s - jnp.max(s, axis=-1, keepdims=True)
        e = jnp.exp(s)
        p = e * pl.reciprocal(jnp.sum(e, axis=-1, keepdims=True), approx=True)
        ah = jnp.dot(p, vh, preferred_element_type=jnp.float32)        # [Tq, hd]
        contrib = jnp.dot(ah, wo[lo:hi, :], preferred_element_type=jnp.float32)
        acc = contrib if acc is None else acc + contrib
    return acc + bo


# ----------------------------------------------------------------------------
# Single fused whole-model kernel (encoder stack -> memory -> decoder stack)
# ----------------------------------------------------------------------------

def _transformer_kernel(x_ref, y_ref,
                        # encoder (layer-stacked) weights
                        e_wqkv, e_bqkv, e_wo, e_bo, e_g1, e_b1,
                        e_w1, e_c1, e_w2, e_c2, e_g2, e_b2,
                        # decoder (layer-stacked) weights
                        d_wqkv_s, d_bqkv_s, d_wo_s, d_bo_s,
                        d_wq_c, d_bq_c, d_wkv_c, d_bkv_c, d_wo_c, d_bo_c,
                        d_g1, d_b1, d_g2, d_b2, d_g3, d_b3,
                        d_w1, d_c1, d_w2, d_c2,
                        o_ref, *, n_head, eps, n_enc, n_dec):
    # -------------------- encoder: encode(src_X) --------------------
    x = x_ref[0]                                   # [Ts, D] (one batch element)
    d = x.shape[-1]
    for l in range(n_enc):                         # static unroll over layers
        # fused QKV projection: one [T, D] x [D, 3D] matmul
        qkv = jnp.dot(x, e_wqkv[l], preferred_element_type=jnp.float32) + e_bqkv[l]
        a = _attention_block(qkv[:, :d], qkv[:, d:2 * d], qkv[:, 2 * d:],
                             e_wo[l], e_bo[l], n_head, causal=False)
        h = _layernorm(x + a, e_g1[l], e_b1[l], eps)
        # NOTE: no activation between line1/line2 (faithful to the reference)
        ff = jnp.dot(h, e_w1[l], preferred_element_type=jnp.float32) + e_c1[l]
        ff = jnp.dot(ff, e_w2[l], preferred_element_type=jnp.float32) + e_c2[l]
        x = _layernorm(h + ff, e_g2[l], e_b2[l], eps)
    mem = x                                        # encoder memory, stays in vregs

    # -------------------- decoder: decode(memory, tar_X) --------------------
    t = y_ref[0]                                   # [Tt, D]
    for l in range(n_dec):
        # masked (causal) self-attention
        qkv = jnp.dot(t, d_wqkv_s[l], preferred_element_type=jnp.float32) + d_bqkv_s[l]
        a1 = _attention_block(qkv[:, :d], qkv[:, d:2 * d], qkv[:, 2 * d:],
                              d_wo_s[l], d_bo_s[l], n_head, causal=True)
        h1 = _layernorm(t + a1, d_g1[l], d_b1[l], eps)
        # encoder-decoder cross-attention
        q = jnp.dot(h1, d_wq_c[l], preferred_element_type=jnp.float32) + d_bq_c[l]
        kv = jnp.dot(mem, d_wkv_c[l], preferred_element_type=jnp.float32) + d_bkv_c[l]
        a2 = _attention_block(q, kv[:, :d], kv[:, d:],
                              d_wo_c[l], d_bo_c[l], n_head, causal=False)
        h2 = _layernorm(h1 + a2, d_g2[l], d_b2[l], eps)
        # feed-forward (no activation — faithful to the reference)
        ff = jnp.dot(h2, d_w1[l], preferred_element_type=jnp.float32) + d_c1[l]
        ff = jnp.dot(ff, d_w2[l], preferred_element_type=jnp.float32) + d_c2[l]
        t = _layernorm(h2 + ff, d_g3[l], d_b3[l], eps)
    o_ref[0] = t


# ----------------------------------------------------------------------------
# pallas_call wrapper (grid over batch; weights replicated / VMEM-resident)
# ----------------------------------------------------------------------------

ENC_KEYS = ("wqkv", "bqkv", "wo", "bo", "g1", "b1",
            "w1", "c1", "w2", "c2", "g2", "b2")
DEC_KEYS = ("wqkv_s", "bqkv_s", "wo_s", "bo_s",
            "wq_c", "bq_c", "wkv_c", "bkv_c", "wo_c", "bo_c",
            "g1", "b1", "g2", "b2", "g3", "b3",
            "w1", "c1", "w2", "c2")


def _rep(a):
    """Weight block: same block for every grid step -> stays VMEM-resident."""
    zeros = (0,) * a.ndim
    return pl.BlockSpec(a.shape, lambda *_: zeros)


def transformer_forward(params, src_tokens, tar_tokens, *, n_head):
    """src_tokens/tar_tokens: [T, B] int32 (seq-first, like the reference).
    Internally activations are kept [B, T, D] so the fused kernel needs no
    per-layer layout plumbing; the final result is returned [T, B, D]."""
    P = params["pos_enc"]
    Ts, B = src_tokens.shape
    Tt = tar_tokens.shape[0]
    D = params["enc_emb"].shape[1]

    # embedding gather + positional-encoding add kept as trivial XLA glue
    x = jnp.take(params["enc_emb"], src_tokens.T, axis=0) + P[None, :Ts, :]  # [B,Ts,D]
    y = jnp.take(params["dec_emb"], tar_tokens.T, axis=0) + P[None, :Tt, :]  # [B,Tt,D]

    enc, dec = params["enc"], params["dec"]
    enc_args = [enc[k] for k in ENC_KEYS]
    dec_args = [dec[k] for k in DEC_KEYS]
    n_enc = enc["wqkv"].shape[0]
    n_dec = dec["wqkv_s"].shape[0]

    kern = functools.partial(_transformer_kernel, n_head=n_head, eps=1e-5,
                             n_enc=n_enc, n_dec=n_dec)
    out = pl.pallas_call(
        kern,
        out_shape=jax.ShapeDtypeStruct((B, Tt, D), jnp.float32),
        grid=(B,),
        in_specs=[pl.BlockSpec((1, Ts, D), lambda b: (b, 0, 0)),
                  pl.BlockSpec((1, Tt, D), lambda b: (b, 0, 0))]
                 + [_rep(a) for a in enc_args]
                 + [_rep(a) for a in dec_args],
        out_specs=pl.BlockSpec((1, Tt, D), lambda b: (b, 0, 0)),
        compiler_params=pltpu.CompilerParams(dimension_semantics=("parallel",)),
    )(x, y, *enc_args, *dec_args)
    return jnp.transpose(out, (1, 0, 2))                                      # [T,B,D]


# ----------------------------------------------------------------------------
# Deterministic parameter construction (torch-faithful init), then a ONE-TIME
# preparation step: pre-transpose weights to [Din, Dout], fold the q-scale,
# reshape biases, split cross-attention weights, stack layers along a leading
# axis, precompute the PE table.
# ----------------------------------------------------------------------------

def _xavier_uniform(key, shape):
    fan_out, fan_in = shape
    limit = math.sqrt(6.0 / (fan_in + fan_out))
    return jax.random.uniform(key, shape, jnp.float32, -limit, limit)


def _linear_init(key, d_out, d_in):
    kw, kb = jax.random.split(key)
    limit = 1.0 / math.sqrt(d_in)
    w = jax.random.uniform(kw, (d_out, d_in), jnp.float32, -limit, limit)
    b = jax.random.uniform(kb, (d_out,), jnp.float32, -limit, limit)
    return w, b


def init_mha(key, d):
    k1, k2 = jax.random.split(key)
    out_w, _ = _linear_init(k2, d, d)
    return dict(
        in_proj_weight=_xavier_uniform(k1, (3 * d, d)),
        in_proj_bias=jnp.zeros((3 * d,), jnp.float32),
        out_proj_weight=out_w,
        out_proj_bias=jnp.zeros((d,), jnp.float32),   # constant_(bias, 0.)
    )


def init_encoder_layer(key, d, dff):
    ks = jax.random.split(key, 3)
    l1w, l1b = _linear_init(ks[1], dff, d)
    l2w, l2b = _linear_init(ks[2], d, dff)
    return dict(
        attn=init_mha(ks[0], d),
        norm1_g=jnp.ones((d,), jnp.float32), norm1_b=jnp.zeros((d,), jnp.float32),
        norm2_g=jnp.ones((d,), jnp.float32), norm2_b=jnp.zeros((d,), jnp.float32),
        line1_w=l1w, line1_b=l1b, line2_w=l2w, line2_b=l2b,
    )


def init_decoder_layer(key, d, dff):
    ks = jax.random.split(key, 4)
    l1w, l1b = _linear_init(ks[2], dff, d)
    l2w, l2b = _linear_init(ks[3], d, dff)
    return dict(
        attn_mask=init_mha(ks[0], d),      # masked self-attention
        attn_cross=init_mha(ks[1], d),     # encoder-decoder attention
        norm1_g=jnp.ones((d,), jnp.float32), norm1_b=jnp.zeros((d,), jnp.float32),
        norm2_g=jnp.ones((d,), jnp.float32), norm2_b=jnp.zeros((d,), jnp.float32),
        norm3_g=jnp.ones((d,), jnp.float32), norm3_b=jnp.zeros((d,), jnp.float32),
        line1_w=l1w, line1_b=l1b, line2_w=l2w, line2_b=l2b,
    )


def init_transformer(key, d, vocab, dff, num_layers):
    keys = jax.random.split(key, 2 + 2 * num_layers)
    return dict(
        enc_emb=jax.random.normal(keys[0], (vocab, d), jnp.float32),
        dec_emb=jax.random.normal(keys[1], (vocab, d), jnp.float32),
        enc_layers=[init_encoder_layer(keys[2 + i], d, dff) for i in range(num_layers)],
        dec_layers=[init_decoder_layer(keys[2 + num_layers + i], d, dff)
                    for i in range(num_layers)],
    )


def make_positional_encoding(max_len, d):
    pos = jnp.arange(max_len, dtype=jnp.float32)[:, None]
    div = jnp.power(10000.0, jnp.arange(0, d, 2, dtype=jnp.float32) / d)
    ang = pos / div
    P = jnp.zeros((max_len, d), jnp.float32)
    P = P.at[:, 0::2].set(jnp.sin(ang))
    P = P.at[:, 1::2].set(jnp.cos(ang))
    return P


def _prep_mha(p, d, n_head, split_qkv=False):
    scale = 1.0 / math.sqrt(d // n_head)           # q / sqrt(E) folded into Wq, bq
    w = p["in_proj_weight"]
    b = p["in_proj_bias"]
    w = w.at[:d].multiply(scale)
    b = b.at[:d].multiply(scale)
    wt = jnp.transpose(w)                          # [D, 3D], transposed ONCE here
    bt = b.reshape(1, 3 * d)
    wo = jnp.transpose(p["out_proj_weight"])       # [D, D]
    bo = p["out_proj_bias"].reshape(1, d)
    if not split_qkv:
        return dict(wqkv=wt, bqkv=bt, wo=wo, bo=bo)
    return dict(wq=wt[:, :d], bq=bt[:, :d], wkv=wt[:, d:], bkv=bt[:, d:],
                wo=wo, bo=bo)


def _prep_encoder_layer(p, d, n_head):
    m = _prep_mha(p["attn"], d, n_head)
    return dict(
        wqkv=m["wqkv"], bqkv=m["bqkv"], wo=m["wo"], bo=m["bo"],
        g1=p["norm1_g"].reshape(1, d), b1=p["norm1_b"].reshape(1, d),
        g2=p["norm2_g"].reshape(1, d), b2=p["norm2_b"].reshape(1, d),
        w1=jnp.transpose(p["line1_w"]), c1=p["line1_b"].reshape(1, -1),
        w2=jnp.transpose(p["line2_w"]), c2=p["line2_b"].reshape(1, d),
    )


def _prep_decoder_layer(p, d, n_head):
    ms = _prep_mha(p["attn_mask"], d, n_head)
    mc = _prep_mha(p["attn_cross"], d, n_head, split_qkv=True)
    return dict(
        wqkv_s=ms["wqkv"], bqkv_s=ms["bqkv"], wo_s=ms["wo"], bo_s=ms["bo"],
        wq_c=mc["wq"], bq_c=mc["bq"], wkv_c=mc["wkv"], bkv_c=mc["bkv"],
        wo_c=mc["wo"], bo_c=mc["bo"],
        g1=p["norm1_g"].reshape(1, d), b1=p["norm1_b"].reshape(1, d),
        g2=p["norm2_g"].reshape(1, d), b2=p["norm2_b"].reshape(1, d),
        g3=p["norm3_g"].reshape(1, d), b3=p["norm3_b"].reshape(1, d),
        w1=jnp.transpose(p["line1_w"]), c1=p["line1_b"].reshape(1, -1),
        w2=jnp.transpose(p["line2_w"]), c2=p["line2_b"].reshape(1, d),
    )


def _stack_layers(layer_dicts):
    """Stack per-layer prepped params along a leading layer axis."""
    return {k: jnp.stack([ld[k] for ld in layer_dicts], axis=0)
            for k in layer_dicts[0].keys()}


def prepare_params(raw, d, n_head, max_len):
    enc_layers = [_prep_encoder_layer(lp, d, n_head) for lp in raw["enc_layers"]]
    dec_layers = [_prep_decoder_layer(lp, d, n_head) for lp in raw["dec_layers"]]
    return dict(
        enc_emb=raw["enc_emb"], dec_emb=raw["dec_emb"],
        pos_enc=make_positional_encoding(max_len, d),
        enc=_stack_layers(enc_layers),
        dec=_stack_layers(dec_layers),
    )


# ----------------------------------------------------------------------------
# Main
# ----------------------------------------------------------------------------

if __name__ == "__main__":
    D_MODEL, N_HEAD, DFF = 32, 4, 64
    VOCAB, NUM_LAYERS, MAX_LEN = 50, 2, 64
    SRC_LEN, TAR_LEN, BATCH = 8, 8, 2

    root = jax.random.PRNGKey(0)
    kp, ks, kt = jax.random.split(root, 3)
    raw_params = init_transformer(kp, D_MODEL, VOCAB, DFF, NUM_LAYERS)
    params = prepare_params(raw_params, D_MODEL, N_HEAD, MAX_LEN)   # one-time prep

    src_X = jax.random.randint(ks, (SRC_LEN, BATCH), 0, VOCAB, dtype=jnp.int32)
    tar_X = jax.random.randint(kt, (TAR_LEN, BATCH), 0, VOCAB, dtype=jnp.int32)

    fwd = jax.jit(functools.partial(transformer_forward, n_head=N_HEAD))
    out = jax.block_until_ready(fwd(params, src_X, tar_X))

    assert out.shape == (TAR_LEN, BATCH, D_MODEL), out.shape
    assert out.dtype == jnp.float32
    assert bool(jnp.all(jnp.isfinite(out)))
    print("KERNEL_OK")
</pallas_src>

<mosaic_0001>
module attributes {stable_mosaic.version = 11 : i64} {
  func.func @_transformer_kernel(%arg0: i32, %arg1: memref<1x8x32xf32, #tpu.memory_space<vmem>>, %arg2: memref<1x8x32xf32, #tpu.memory_space<vmem>>, %arg3: memref<2x32x96xf32, #tpu.memory_space<vmem>>, %arg4: memref<2x1x96xf32, #tpu.memory_space<vmem>>, %arg5: memref<2x32x32xf32, #tpu.memory_space<vmem>>, %arg6: memref<2x1x32xf32, #tpu.memory_space<vmem>>, %arg7: memref<2x1x32xf32, #tpu.memory_space<vmem>>, %arg8: memref<2x1x32xf32, #tpu.memory_space<vmem>>, %arg9: memref<2x32x64xf32, #tpu.memory_space<vmem>>, %arg10: memref<2x1x64xf32, #tpu.memory_space<vmem>>, %arg11: memref<2x64x32xf32, #tpu.memory_space<vmem>>, %arg12: memref<2x1x32xf32, #tpu.memory_space<vmem>>, %arg13: memref<2x1x32xf32, #tpu.memory_space<vmem>>, %arg14: memref<2x1x32xf32, #tpu.memory_space<vmem>>, %arg15: memref<2x32x96xf32, #tpu.memory_space<vmem>>, %arg16: memref<2x1x96xf32, #tpu.memory_space<vmem>>, %arg17: memref<2x32x32xf32, #tpu.memory_space<vmem>>, %arg18: memref<2x1x32xf32, #tpu.memory_space<vmem>>, %arg19: memref<2x32x32xf32, #tpu.memory_space<vmem>>, %arg20: memref<2x1x32xf32, #tpu.memory_space<vmem>>, %arg21: memref<2x32x64xf32, #tpu.memory_space<vmem>>, %arg22: memref<2x1x64xf32, #tpu.memory_space<vmem>>, %arg23: memref<2x32x32xf32, #tpu.memory_space<vmem>>, %arg24: memref<2x1x32xf32, #tpu.memory_space<vmem>>, %arg25: memref<2x1x32xf32, #tpu.memory_space<vmem>>, %arg26: memref<2x1x32xf32, #tpu.memory_space<vmem>>, %arg27: memref<2x1x32xf32, #tpu.memory_space<vmem>>, %arg28: memref<2x1x32xf32, #tpu.memory_space<vmem>>, %arg29: memref<2x1x32xf32, #tpu.memory_space<vmem>>, %arg30: memref<2x1x32xf32, #tpu.memory_space<vmem>>, %arg31: memref<2x32x64xf32, #tpu.memory_space<vmem>>, %arg32: memref<2x1x64xf32, #tpu.memory_space<vmem>>, %arg33: memref<2x64x32xf32, #tpu.memory_space<vmem>>, %arg34: memref<2x1x32xf32, #tpu.memory_space<vmem>>, %arg35: memref<1x8x32xf32, #tpu.memory_space<vmem>>) attributes {dimension_semantics = [#tpu.dimension_semantics<parallel>], iteration_bounds = array<i64: 2>, scalar_prefetch = 0 : i64, scratch_operands = 0 : i64, tpu.core_type = #tpu.core_type<tc>, window_params = [{transform_indices = @transform_0, window_bounds = array<i64: 1, 8, 32>}, {transform_indices = @transform_1, window_bounds = array<i64: 1, 8, 32>}, {pipeline_mode = #tpu.pipeline_mode<synchronous>, transform_indices = @transform_2, window_bounds = array<i64: 2, 32, 96>}, {pipeline_mode = #tpu.pipeline_mode<synchronous>, transform_indices = @transform_3, window_bounds = array<i64: 2, 1, 96>}, {pipeline_mode = #tpu.pipeline_mode<synchronous>, transform_indices = @transform_4, window_bounds = array<i64: 2, 32, 32>}, {pipeline_mode = #tpu.pipeline_mode<synchronous>, transform_indices = @transform_5, window_bounds = array<i64: 2, 1, 32>}, {pipeline_mode = #tpu.pipeline_mode<synchronous>, transform_indices = @transform_6, window_bounds = array<i64: 2, 1, 32>}, {pipeline_mode = #tpu.pipeline_mode<synchronous>, transform_indices = @transform_7, window_bounds = array<i64: 2, 1, 32>}, {pipeline_mode = #tpu.pipeline_mode<synchronous>, transform_indices = @transform_8, window_bounds = array<i64: 2, 32, 64>}, {pipeline_mode = #tpu.pipeline_mode<synchronous>, transform_indices = @transform_9, window_bounds = array<i64: 2, 1, 64>}, {pipeline_mode = #tpu.pipeline_mode<synchronous>, transform_indices = @transform_10, window_bounds = array<i64: 2, 64, 32>}, {pipeline_mode = #tpu.pipeline_mode<synchronous>, transform_indices = @transform_11, window_bounds = array<i64: 2, 1, 32>}, {pipeline_mode = #tpu.pipeline_mode<synchronous>, transform_indices = @transform_12, window_bounds = array<i64: 2, 1, 32>}, {pipeline_mode = #tpu.pipeline_mode<synchronous>, transform_indices = @transform_13, window_bounds = array<i64: 2, 1, 32>}, {pipeline_mode = #tpu.pipeline_mode<synchronous>, transform_indices = @transform_14, window_bounds = array<i64: 2, 32, 96>}, {pipeline_mode = #tpu.pipeline_mode<synchronous>, transform_indices = @transform_15, window_bounds = array<i64: 2, 1, 96>}, {pipeline_mode = #tpu.pipeline_mode<synchronous>, transform_indices = @transform_16, window_bounds = array<i64: 2, 32, 32>}, {pipeline_mode = #tpu.pipeline_mode<synchronous>, transform_indices = @transform_17, window_bounds = array<i64: 2, 1, 32>}, {pipeline_mode = #tpu.pipeline_mode<synchronous>, transform_indices = @transform_18, window_bounds = array<i64: 2, 32, 32>}, {pipeline_mode = #tpu.pipeline_mode<synchronous>, transform_indices = @transform_19, window_bounds = array<i64: 2, 1, 32>}, {pipeline_mode = #tpu.pipeline_mode<synchronous>, transform_indices = @transform_20, window_bounds = array<i64: 2, 32, 64>}, {pipeline_mode = #tpu.pipeline_mode<synchronous>, transform_indices = @transform_21, window_bounds = array<i64: 2, 1, 64>}, {pipeline_mode = #tpu.pipeline_mode<synchronous>, transform_indices = @transform_22, window_bounds = array<i64: 2, 32, 32>}, {pipeline_mode = #tpu.pipeline_mode<synchronous>, transform_indices = @transform_23, window_bounds = array<i64: 2, 1, 32>}, {pipeline_mode = #tpu.pipeline_mode<synchronous>, transform_indices = @transform_24, window_bounds = array<i64: 2, 1, 32>}, {pipeline_mode = #tpu.pipeline_mode<synchronous>, transform_indices = @transform_25, window_bounds = array<i64: 2, 1, 32>}, {pipeline_mode = #tpu.pipeline_mode<synchronous>, transform_indices = @transform_26, window_bounds = array<i64: 2, 1, 32>}, {pipeline_mode = #tpu.pipeline_mode<synchronous>, transform_indices = @transform_27, window_bounds = array<i64: 2, 1, 32>}, {pipeline_mode = #tpu.pipeline_mode<synchronous>, transform_indices = @transform_28, window_bounds = array<i64: 2, 1, 32>}, {pipeline_mode = #tpu.pipeline_mode<synchronous>, transform_indices = @transform_29, window_bounds = array<i64: 2, 1, 32>}, {pipeline_mode = #tpu.pipeline_mode<synchronous>, transform_indices = @transform_30, window_bounds = array<i64: 2, 32, 64>}, {pipeline_mode = #tpu.pipeline_mode<synchronous>, transform_indices = @transform_31, window_bounds = array<i64: 2, 1, 64>}, {pipeline_mode = #tpu.pipeline_mode<synchronous>, transform_indices = @transform_32, window_bounds = array<i64: 2, 64, 32>}, {pipeline_mode = #tpu.pipeline_mode<synchronous>, transform_indices = @transform_33, window_bounds = array<i64: 2, 1, 32>}, {transform_indices = @transform_34, window_bounds = array<i64: 1, 8, 32>}]} {
    %c0 = arith.constant 0 : index
    %c0_0 = arith.constant 0 : index
    %c0_1 = arith.constant 0 : index
    %0 = vector.load %arg1[%c0, %c0_0, %c0_1] : memref<1x8x32xf32, #tpu.memory_space<vmem>>, vector<1x8x32xf32>
    %1 = vector.shape_cast %0 : vector<1x8x32xf32> to vector<8x32xf32>
    %c0_2 = arith.constant 0 : index
    %c0_3 = arith.constant 0 : index
    %c0_4 = arith.constant 0 : index
    %2 = vector.load %arg3[%c0_2, %c0_3, %c0_4] : memref<2x32x96xf32, #tpu.memory_space<vmem>>, vector<1x32x96xf32>
    %3 = vector.shape_cast %2 : vector<1x32x96xf32> to vector<32x96xf32>
    %cst = arith.constant dense<0.000000e+00> : vector<8x96xf32>
    %4 = tpu.matmul %1, %3, %cst {dimension_numbers = #tpu.dot_dimension_numbers<[1], [0], [0], [1], [0, 0, 1, 1], [], []>} : vector<8x32xf32>, vector<32x96xf32>, vector<8x96xf32> -> vector<8x96xf32>
    %c0_5 = arith.constant 0 : index
    %c0_6 = arith.constant 0 : index
    %c0_7 = arith.constant 0 : index
    %5 = vector.load %arg4[%c0_5, %c0_6, %c0_7] : memref<2x1x96xf32, #tpu.memory_space<vmem>>, vector<1x1x96xf32>
    %6 = vector.shape_cast %5 : vector<1x1x96xf32> to vector<1x96xf32>
    %7 = vector.broadcast %6 : vector<1x96xf32> to vector<8x96xf32>
    %8 = arith.addf %4, %7 : vector<8x96xf32>
    %9 = vector.extract_strided_slice %8 {offsets = [0, 0], sizes = [8, 32], strides = [1, 1]} : vector<8x96xf32> to vector<8x32xf32>
    %10 = vector.extract_strided_slice %8 {offsets = [0, 32], sizes = [8, 32], strides = [1, 1]} : vector<8x96xf32> to vector<8x32xf32>
    %11 = vector.extract_strided_slice %8 {offsets = [0, 64], sizes = [8, 32], strides = [1, 1]} : vector<8x96xf32> to vector<8x32xf32>
    %c0_8 = arith.constant 0 : index
    %c0_9 = arith.constant 0 : index
    %c0_10 = arith.constant 0 : index
    %12 = vector.load %arg5[%c0_8, %c0_9, %c0_10] : memref<2x32x32xf32, #tpu.memory_space<vmem>>, vector<1x32x32xf32>
    %13 = vector.shape_cast %12 : vector<1x32x32xf32> to vector<32x32xf32>
    %c0_11 = arith.constant 0 : index
    %c0_12 = arith.constant 0 : index
    %c0_13 = arith.constant 0 : index
    %14 = vector.load %arg6[%c0_11, %c0_12, %c0_13] : memref<2x1x32xf32, #tpu.memory_space<vmem>>, vector<1x1x32xf32>
    %15 = vector.shape_cast %14 : vector<1x1x32xf32> to vector<1x32xf32>
    %16 = vector.extract_strided_slice %9 {offsets = [0, 0], sizes = [8, 8], strides = [1, 1]} : vector<8x32xf32> to vector<8x8xf32>
    %17 = vector.extract_strided_slice %10 {offsets = [0, 0], sizes = [8, 8], strides = [1, 1]} : vector<8x32xf32> to vector<8x8xf32>
    %18 = vector.extract_strided_slice %11 {offsets = [0, 0], sizes = [8, 8], strides = [1, 1]} : vector<8x32xf32> to vector<8x8xf32>
    %cst_14 = arith.constant dense<0.000000e+00> : vector<8x8xf32>
    %19 = tpu.matmul %16, %17, %cst_14 {dimension_numbers = #tpu.dot_dimension_numbers<[1], [1], [0], [0], [0, 0, 1, 0], [], []>} : vector<8x8xf32>, vector<8x8xf32>, vector<8x8xf32> -> vector<8x8xf32>
    %cst_15 = arith.constant dense<0xFF800000> : vector<8xf32>
    %20 = vector.multi_reduction <maximumf>, %19, %cst_15 [1] : vector<8x8xf32> to vector<8xf32>
    %21 = vector.shape_cast %20 : vector<8xf32> to vector<8x1xf32>
    %22 = vector.broadcast %21 : vector<8x1xf32> to vector<8x8xf32>
    %23 = arith.subf %19, %22 : vector<8x8xf32>
    %24 = math.exp %23 : vector<8x8xf32>
    %cst_16 = arith.constant dense<0.000000e+00> : vector<8xf32>
    %25 = vector.multi_reduction <add>, %24, %cst_16 [1] : vector<8x8xf32> to vector<8xf32>
    %26 = vector.shape_cast %25 : vector<8xf32> to vector<8x1xf32>
    %27 = tpu.reciprocal %26 {approx = true} : vector<8x1xf32> -> vector<8x1xf32>
    %28 = vector.broadcast %27 : vector<8x1xf32> to vector<8x8xf32>
    %29 = arith.mulf %24, %28 : vector<8x8xf32>
    %cst_17 = arith.constant dense<0.000000e+00> : vector<8x8xf32>
    %30 = tpu.matmul %29, %18, %cst_17 {dimension_numbers = #tpu.dot_dimension_numbers<[1], [0], [0], [1], [0, 0, 1, 1], [], []>} : vector<8x8xf32>, vector<8x8xf32>, vector<8x8xf32> -> vector<8x8xf32>
    %31 = vector.extract_strided_slice %13 {offsets = [0, 0], sizes = [8, 32], strides = [1, 1]} : vector<32x32xf32> to vector<8x32xf32>
    %cst_18 = arith.constant dense<0.000000e+00> : vector<8x32xf32>
    %32 = tpu.matmul %30, %31, %cst_18 {dimension_numbers = #tpu.dot_dimension_numbers<[1], [0], [0], [1], [0, 0, 1, 1], [], []>} : vector<8x8xf32>, vector<8x32xf32>, vector<8x32xf32> -> vector<8x32xf32>
    %33 = vector.extract_strided_slice %9 {offsets = [0, 8], sizes = [8, 8], strides = [1, 1]} : vector<8x32xf32> to vector<8x8xf32>
    %34 = vector.extract_strided_slice %10 {offsets = [0, 8], sizes = [8, 8], strides = [1, 1]} : vector<8x32xf32> to vector<8x8xf32>
    %35 = vector.extract_strided_slice %11 {offsets = [0, 8], sizes = [8, 8], strides = [1, 1]} : vector<8x32xf32> to vector<8x8xf32>
    %cst_19 = arith.constant dense<0.000000e+00> : vector<8x8xf32>
    %36 = tpu.matmul %33, %34, %cst_19 {dimension_numbers = #tpu.dot_dimension_numbers<[1], [1], [0], [0], [0, 0, 1, 0], [], []>} : vector<8x8xf32>, vector<8x8xf32>, vector<8x8xf32> -> vector<8x8xf32>
    %cst_20 = arith.constant dense<0xFF800000> : vector<8xf32>
    %37 = vector.multi_reduction <maximumf>, %36, %cst_20 [1] : vector<8x8xf32> to vector<8xf32>
    %38 = vector.shape_cast %37 : vector<8xf32> to vector<8x1xf32>
    %39 = vector.broadcast %38 : vector<8x1xf32> to vector<8x8xf32>
    %40 = arith.subf %36, %39 : vector<8x8xf32>
    %41 = math.exp %40 : vector<8x8xf32>
    %cst_21 = arith.constant dense<0.000000e+00> : vector<8xf32>
    %42 = vector.multi_reduction <add>, %41, %cst_21 [1] : vector<8x8xf32> to vector<8xf32>
    %43 = vector.shape_cast %42 : vector<8xf32> to vector<8x1xf32>
    %44 = tpu.reciprocal %43 {approx = true} : vector<8x1xf32> -> vector<8x1xf32>
    %45 = vector.broadcast %44 : vector<8x1xf32> to vector<8x8xf32>
    %46 = arith.mulf %41, %45 : vector<8x8xf32>
    %cst_22 = arith.constant dense<0.000000e+00> : vector<8x8xf32>
    %47 = tpu.matmul %46, %35, %cst_22 {dimension_numbers = #tpu.dot_dimension_numbers<[1], [0], [0], [1], [0, 0, 1, 1], [], []>} : vector<8x8xf32>, vector<8x8xf32>, vector<8x8xf32> -> vector<8x8xf32>
    %48 = vector.extract_strided_slice %13 {offsets = [8, 0], sizes = [8, 32], strides = [1, 1]} : vector<32x32xf32> to vector<8x32xf32>
    %cst_23 = arith.constant dense<0.000000e+00> : vector<8x32xf32>
    %49 = tpu.matmul %47, %48, %cst_23 {dimension_numbers = #tpu.dot_dimension_numbers<[1], [0], [0], [1], [0, 0, 1, 1], [], []>} : vector<8x8xf32>, vector<8x32xf32>, vector<8x32xf32> -> vector<8x32xf32>
    %50 = arith.addf %32, %49 : vector<8x32xf32>
    %51 = vector.extract_strided_slice %9 {offsets = [0, 16], sizes = [8, 8], strides = [1, 1]} : vector<8x32xf32> to vector<8x8xf32>
    %52 = vector.extract_strided_slice %10 {offsets = [0, 16], sizes = [8, 8], strides = [1, 1]} : vector<8x32xf32> to vector<8x8xf32>
    %53 = vector.extract_strided_slice %11 {offsets = [0, 16], sizes = [8, 8], strides = [1, 1]} : vector<8x32xf32> to vector<8x8xf32>
    %cst_24 = arith.constant dense<0.000000e+00> : vector<8x8xf32>
    %54 = tpu.matmul %51, %52, %cst_24 {dimension_numbers = #tpu.dot_dimension_numbers<[1], [1], [0], [0], [0, 0, 1, 0], [], []>} : vector<8x8xf32>, vector<8x8xf32>, vector<8x8xf32> -> vector<8x8xf32>
    %cst_25 = arith.constant dense<0xFF800000> : vector<8xf32>
    %55 = vector.multi_reduction <maximumf>, %54, %cst_25 [1] : vector<8x8xf32> to vector<8xf32>
    %56 = vector.shape_cast %55 : vector<8xf32> to vector<8x1xf32>
    %57 = vector.broadcast %56 : vector<8x1xf32> to vector<8x8xf32>
    %58 = arith.subf %54, %57 : vector<8x8xf32>
    %59 = math.exp %58 : vector<8x8xf32>
    %cst_26 = arith.constant dense<0.000000e+00> : vector<8xf32>
    %60 = vector.multi_reduction <add>, %59, %cst_26 [1] : vector<8x8xf32> to vector<8xf32>
    %61 = vector.shape_cast %60 : vector<8xf32> to vector<8x1xf32>
    %62 = tpu.reciprocal %61 {approx = true} : vector<8x1xf32> -> vector<8x1xf32>
    %63 = vector.broadcast %62 : vector<8x1xf32> to vector<8x8xf32>
    %64 = arith.mulf %59, %63 : vector<8x8xf32>
    %cst_27 = arith.constant dense<0.000000e+00> : vector<8x8xf32>
    %65 = tpu.matmul %64, %53, %cst_27 {dimension_numbers = #tpu.dot_dimension_numbers<[1], [0], [0], [1], [0, 0, 1, 1], [], []>} : vector<8x8xf32>, vector<8x8xf32>, vector<8x8xf32> -> vector<8x8xf32>
    %66 = vector.extract_strided_slice %13 {offsets = [16, 0], sizes = [8, 32], strides = [1, 1]} : vector<32x32xf32> to vector<8x32xf32>
    %cst_28 = arith.constant dense<0.000000e+00> : vector<8x32xf32>
    %67 = tpu.matmul %65, %66, %cst_28 {dimension_numbers = #tpu.dot_dimension_numbers<[1], [0], [0], [1], [0, 0, 1, 1], [], []>} : vector<8x8xf32>, vector<8x32xf32>, vector<8x32xf32> -> vector<8x32xf32>
    %68 = arith.addf %50, %67 : vector<8x32xf32>
    %69 = vector.extract_strided_slice %9 {offsets = [0, 24], sizes = [8, 8], strides = [1, 1]} : vector<8x32xf32> to vector<8x8xf32>
    %70 = vector.extract_strided_slice %10 {offsets = [0, 24], sizes = [8, 8], strides = [1, 1]} : vector<8x32xf32> to vector<8x8xf32>
    %71 = vector.extract_strided_slice %11 {offsets = [0, 24], sizes = [8, 8], strides = [1, 1]} : vector<8x32xf32> to vector<8x8xf32>
    %cst_29 = arith.constant dense<0.000000e+00> : vector<8x8xf32>
    %72 = tpu.matmul %69, %70, %cst_29 {dimension_numbers = #tpu.dot_dimension_numbers<[1], [1], [0], [0], [0, 0, 1, 0], [], []>} : vector<8x8xf32>, vector<8x8xf32>, vector<8x8xf32> -> vector<8x8xf32>
    %cst_30 = arith.constant dense<0xFF800000> : vector<8xf32>
    %73 = vector.multi_reduction <maximumf>, %72, %cst_30 [1] : vector<8x8xf32> to vector<8xf32>
    %74 = vector.shape_cast %73 : vector<8xf32> to vector<8x1xf32>
    %75 = vector.broadcast %74 : vector<8x1xf32> to vector<8x8xf32>
    %76 = arith.subf %72, %75 : vector<8x8xf32>
    %77 = math.exp %76 : vector<8x8xf32>
    %cst_31 = arith.constant dense<0.000000e+00> : vector<8xf32>
    %78 = vector.multi_reduction <add>, %77, %cst_31 [1] : vector<8x8xf32> to vector<8xf32>
    %79 = vector.shape_cast %78 : vector<8xf32> to vector<8x1xf32>
    %80 = tpu.reciprocal %79 {approx = true} : vector<8x1xf32> -> vector<8x1xf32>
    %81 = vector.broadcast %80 : vector<8x1xf32> to vector<8x8xf32>
    %82 = arith.mulf %77, %81 : vector<8x8xf32>
    %cst_32 = arith.constant dense<0.000000e+00> : vector<8x8xf32>
    %83 = tpu.matmul %82, %71, %cst_32 {dimension_numbers = #tpu.dot_dimension_numbers<[1], [0], [0], [1], [0, 0, 1, 1], [], []>} : vector<8x8xf32>, vector<8x8xf32>, vector<8x8xf32> -> vector<8x8xf32>
    %84 = vector.extract_strided_slice %13 {offsets = [24, 0], sizes = [8, 32], strides = [1, 1]} : vector<32x32xf32> to vector<8x32xf32>
    %cst_33 = arith.constant dense<0.000000e+00> : vector<8x32xf32>
    %85 = tpu.matmul %83, %84, %cst_33 {dimension_numbers = #tpu.dot_dimension_numbers<[1], [0], [0], [1], [0, 0, 1, 1], [], []>} : vector<8x8xf32>, vector<8x32xf32>, vector<8x32xf32> -> vector<8x32xf32>
    %86 = arith.addf %68, %85 : vector<8x32xf32>
    %87 = vector.broadcast %15 : vector<1x32xf32> to vector<8x32xf32>
    %88 = arith.addf %86, %87 : vector<8x32xf32>
    %89 = arith.addf %1, %88 : vector<8x32xf32>
    %c0_34 = arith.constant 0 : index
    %c0_35 = arith.constant 0 : index
    %c0_36 = arith.constant 0 : index
    %90 = vector.load %arg7[%c0_34, %c0_35, %c0_36] : memref<2x1x32xf32, #tpu.memory_space<vmem>>, vector<1x1x32xf32>
    %91 = vector.shape_cast %90 : vector<1x1x32xf32> to vector<1x32xf32>
    %c0_37 = arith.constant 0 : index
    %c0_38 = arith.constant 0 : index
    %c0_39 = arith.constant 0 : index
    %92 = vector.load %arg8[%c0_37, %c0_38, %c0_39] : memref<2x1x32xf32, #tpu.memory_space<vmem>>, vector<1x1x32xf32>
    %93 = vector.shape_cast %92 : vector<1x1x32xf32> to vector<1x32xf32>
    %cst_40 = arith.constant dense<0.000000e+00> : vector<8xf32>
    %94 = vector.multi_reduction <add>, %89, %cst_40 [1] : vector<8x32xf32> to vector<8xf32>
    %95 = vector.shape_cast %94 : vector<8xf32> to vector<8x1xf32>
    %cst_41 = arith.constant 3.200000e+01 : f32
    %96 = vector.broadcast %cst_41 : f32 to vector<8x1xf32>
    %97 = arith.divf %95, %96 : vector<8x1xf32>
    %98 = vector.broadcast %97 : vector<8x1xf32> to vector<8x32xf32>
    %99 = arith.subf %89, %98 : vector<8x32xf32>
    %100 = arith.mulf %99, %99 : vector<8x32xf32>
    %cst_42 = arith.constant dense<0.000000e+00> : vector<8xf32>
    %101 = vector.multi_reduction <add>, %100, %cst_42 [1] : vector<8x32xf32> to vector<8xf32>
    %102 = vector.shape_cast %101 : vector<8xf32> to vector<8x1xf32>
    %cst_43 = arith.constant 3.200000e+01 : f32
    %103 = vector.broadcast %cst_43 : f32 to vector<8x1xf32>
    %104 = arith.divf %102, %103 : vector<8x1xf32>
    %cst_44 = arith.constant 9.99999974E-6 : f32
    %105 = vector.broadcast %cst_44 : f32 to vector<8x1xf32>
    %106 = arith.addf %104, %105 : vector<8x1xf32>
    %107 = math.rsqrt %106 : vector<8x1xf32>
    %108 = vector.broadcast %107 : vector<8x1xf32> to vector<8x32xf32>
    %109 = arith.mulf %99, %108 : vector<8x32xf32>
    %110 = vector.broadcast %91 : vector<1x32xf32> to vector<8x32xf32>
    %111 = arith.mulf %109, %110 : vector<8x32xf32>
    %112 = vector.broadcast %93 : vector<1x32xf32> to vector<8x32xf32>
    %113 = arith.addf %111, %112 : vector<8x32xf32>
    %c0_45 = arith.constant 0 : index
    %c0_46 = arith.constant 0 : index
    %c0_47 = arith.constant 0 : index
    %114 = vector.load %arg9[%c0_45, %c0_46, %c0_47] : memref<2x32x64xf32, #tpu.memory_space<vmem>>, vector<1x32x64xf32>
    %115 = vector.shape_cast %114 : vector<1x32x64xf32> to vector<32x64xf32>
    %cst_48 = arith.constant dense<0.000000e+00> : vector<8x64xf32>
    %116 = tpu.matmul %113, %115, %cst_48 {dimension_numbers = #tpu.dot_dimension_numbers<[1], [0], [0], [1], [0, 0, 1, 1], [], []>} : vector<8x32xf32>, vector<32x64xf32>, vector<8x64xf32> -> vector<8x64xf32>
    %c0_49 = arith.constant 0 : index
    %c0_50 = arith.constant 0 : index
    %c0_51 = arith.constant 0 : index
    %117 = vector.load %arg10[%c0_49, %c0_50, %c0_51] : memref<2x1x64xf32, #tpu.memory_space<vmem>>, vector<1x1x64xf32>
    %118 = vector.shape_cast %117 : vector<1x1x64xf32> to vector<1x64xf32>
    %119 = vector.broadcast %118 : vector<1x64xf32> to vector<8x64xf32>
    %120 = arith.addf %116, %119 : vector<8x64xf32>
    %c0_52 = arith.constant 0 : index
    %c0_53 = arith.constant 0 : index
    %c0_54 = arith.constant 0 : index
    %121 = vector.load %arg11[%c0_52, %c0_53, %c0_54] : memref<2x64x32xf32, #tpu.memory_space<vmem>>, vector<1x64x32xf32>
    %122 = vector.shape_cast %121 : vector<1x64x32xf32> to vector<64x32xf32>
    %cst_55 = arith.constant dense<0.000000e+00> : vector<8x32xf32>
    %123 = tpu.matmul %120, %122, %cst_55 {dimension_numbers = #tpu.dot_dimension_numbers<[1], [0], [0], [1], [0, 0, 1, 1], [], []>} : vector<8x64xf32>, vector<64x32xf32>, vector<8x32xf32> -> vector<8x32xf32>
    %c0_56 = arith.constant 0 : index
    %c0_57 = arith.constant 0 : index
    %c0_58 = arith.constant 0 : index
    %124 = vector.load %arg12[%c0_56, %c0_57, %c0_58] : memref<2x1x32xf32, #tpu.memory_space<vmem>>, vector<1x1x32xf32>
    %125 = vector.shape_cast %124 : vector<1x1x32xf32> to vector<1x32xf32>
    %126 = vector.broadcast %125 : vector<1x32xf32> to vector<8x32xf32>
    %127 = arith.addf %123, %126 : vector<8x32xf32>
    %128 = arith.addf %113, %127 : vector<8x32xf32>
    %c0_59 = arith.constant 0 : index
    %c0_60 = arith.constant 0 : index
    %c0_61 = arith.constant 0 : index
    %129 = vector.load %arg13[%c0_59, %c0_60, %c0_61] : memref<2x1x32xf32, #tpu.memory_space<vmem>>, vector<1x1x32xf32>
    %130 = vector.shape_cast %129 : vector<1x1x32xf32> to vector<1x32xf32>
    %c0_62 = arith.constant 0 : index
    %c0_63 = arith.constant 0 : index
    %c0_64 = arith.constant 0 : index
    %131 = vector.load %arg14[%c0_62, %c0_63, %c0_64] : memref<2x1x32xf32, #tpu.memory_space<vmem>>, vector<1x1x32xf32>
    %132 = vector.shape_cast %131 : vector<1x1x32xf32> to vector<1x32xf32>
    %cst_65 = arith.constant dense<0.000000e+00> : vector<8xf32>
    %133 = vector.multi_reduction <add>, %128, %cst_65 [1] : vector<8x32xf32> to vector<8xf32>
    %134 = vector.shape_cast %133 : vector<8xf32> to vector<8x1xf32>
    %cst_66 = arith.constant 3.200000e+01 : f32
    %135 = vector.broadcast %cst_66 : f32 to vector<8x1xf32>
    %136 = arith.divf %134, %135 : vector<8x1xf32>
    %137 = vector.broadcast %136 : vector<8x1xf32> to vector<8x32xf32>
    %138 = arith.subf %128, %137 : vector<8x32xf32>
    %139 = arith.mulf %138, %138 : vector<8x32xf32>
    %cst_67 = arith.constant dense<0.000000e+00> : vector<8xf32>
    %140 = vector.multi_reduction <add>, %139, %cst_67 [1] : vector<8x32xf32> to vector<8xf32>
    %141 = vector.shape_cast %140 : vector<8xf32> to vector<8x1xf32>
    %cst_68 = arith.constant 3.200000e+01 : f32
    %142 = vector.broadcast %cst_68 : f32 to vector<8x1xf32>
    %143 = arith.divf %141, %142 : vector<8x1xf32>
    %cst_69 = arith.constant 9.99999974E-6 : f32
    %144 = vector.broadcast %cst_69 : f32 to vector<8x1xf32>
    %145 = arith.addf %143, %144 : vector<8x1xf32>
    %146 = math.rsqrt %145 : vector<8x1xf32>
    %147 = vector.broadcast %146 : vector<8x1xf32> to vector<8x32xf32>
    %148 = arith.mulf %138, %147 : vector<8x32xf32>
    %149 = vector.broadcast %130 : vector<1x32xf32> to vector<8x32xf32>
    %150 = arith.mulf %148, %149 : vector<8x32xf32>
    %151 = vector.broadcast %132 : vector<1x32xf32> to vector<8x32xf32>
    %152 = arith.addf %150, %151 : vector<8x32xf32>
    %c1 = arith.constant 1 : index
    %c0_70 = arith.constant 0 : index
    %c0_71 = arith.constant 0 : index
    %153 = vector.load %arg3[%c1, %c0_70, %c0_71] : memref<2x32x96xf32, #tpu.memory_space<vmem>>, vector<1x32x96xf32>
    %154 = vector.shape_cast %153 : vector<1x32x96xf32> to vector<32x96xf32>
    %cst_72 = arith.constant dense<0.000000e+00> : vector<8x96xf32>
    %155 = tpu.matmul %152, %154, %cst_72 {dimension_numbers = #tpu.dot_dimension_numbers<[1], [0], [0], [1], [0, 0, 1, 1], [], []>} : vector<8x32xf32>, vector<32x96xf32>, vector<8x96xf32> -> vector<8x96xf32>
    %c1_73 = arith.constant 1 : index
    %c0_74 = arith.constant 0 : index
    %c0_75 = arith.constant 0 : index
    %156 = vector.load %arg4[%c1_73, %c0_74, %c0_75] : memref<2x1x96xf32, #tpu.memory_space<vmem>>, vector<1x1x96xf32>
    %157 = vector.shape_cast %156 : vector<1x1x96xf32> to vector<1x96xf32>
    %158 = vector.broadcast %157 : vector<1x96xf32> to vector<8x96xf32>
    %159 = arith.addf %155, %158 : vector<8x96xf32>
    %160 = vector.extract_strided_slice %159 {offsets = [0, 0], sizes = [8, 32], strides = [1, 1]} : vector<8x96xf32> to vector<8x32xf32>
    %161 = vector.extract_strided_slice %159 {offsets = [0, 32], sizes = [8, 32], strides = [1, 1]} : vector<8x96xf32> to vector<8x32xf32>
    %162 = vector.extract_strided_slice %159 {offsets = [0, 64], sizes = [8, 32], strides = [1, 1]} : vector<8x96xf32> to vector<8x32xf32>
    %c1_76 = arith.constant 1 : index
    %c0_77 = arith.constant 0 : index
    %c0_78 = arith.constant 0 : index
    %163 = vector.load %arg5[%c1_76, %c0_77, %c0_78] : memref<2x32x32xf32, #tpu.memory_space<vmem>>, vector<1x32x32xf32>
    %164 = vector.shape_cast %163 : vector<1x32x32xf32> to vector<32x32xf32>
    %c1_79 = arith.constant 1 : index
    %c0_80 = arith.constant 0 : index
    %c0_81 = arith.constant 0 : index
    %165 = vector.load %arg6[%c1_79, %c0_80, %c0_81] : memref<2x1x32xf32, #tpu.memory_space<vmem>>, vector<1x1x32xf32>
    %166 = vector.shape_cast %165 : vector<1x1x32xf32> to vector<1x32xf32>
    %167 = vector.extract_strided_slice %160 {offsets = [0, 0], sizes = [8, 8], strides = [1, 1]} : vector<8x32xf32> to vector<8x8xf32>
    %168 = vector.extract_strided_slice %161 {offsets = [0, 0], sizes = [8, 8], strides = [1, 1]} : vector<8x32xf32> to vector<8x8xf32>
    %169 = vector.extract_strided_slice %162 {offsets = [0, 0], sizes = [8, 8], strides = [1, 1]} : vector<8x32xf32> to vector<8x8xf32>
    %cst_82 = arith.constant dense<0.000000e+00> : vector<8x8xf32>
    %170 = tpu.matmul %167, %168, %cst_82 {dimension_numbers = #tpu.dot_dimension_numbers<[1], [1], [0], [0], [0, 0, 1, 0], [], []>} : vector<8x8xf32>, vector<8x8xf32>, vector<8x8xf32> -> vector<8x8xf32>
    %cst_83 = arith.constant dense<0xFF800000> : vector<8xf32>
    %171 = vector.multi_reduction <maximumf>, %170, %cst_83 [1] : vector<8x8xf32> to vector<8xf32>
    %172 = vector.shape_cast %171 : vector<8xf32> to vector<8x1xf32>
    %173 = vector.broadcast %172 : vector<8x1xf32> to vector<8x8xf32>
    %174 = arith.subf %170, %173 : vector<8x8xf32>
    %175 = math.exp %174 : vector<8x8xf32>
    %cst_84 = arith.constant dense<0.000000e+00> : vector<8xf32>
    %176 = vector.multi_reduction <add>, %175, %cst_84 [1] : vector<8x8xf32> to vector<8xf32>
    %177 = vector.shape_cast %176 : vector<8xf32> to vector<8x1xf32>
    %178 = tpu.reciprocal %177 {approx = true} : vector<8x1xf32> -> vector<8x1xf32>
    %179 = vector.broadcast %178 : vector<8x1xf32> to vector<8x8xf32>
    %180 = arith.mulf %175, %179 : vector<8x8xf32>
    %cst_85 = arith.constant dense<0.000000e+00> : vector<8x8xf32>
    %181 = tpu.matmul %180, %169, %cst_85 {dimension_numbers = #tpu.dot_dimension_numbers<[1], [0], [0], [1], [0, 0, 1, 1], [], []>} : vector<8x8xf32>, vector<8x8xf32>, vector<8x8xf32> -> vector<8x8xf32>
    %182 = vector.extract_strided_slice %164 {offsets = [0, 0], sizes = [8, 32], strides = [1, 1]} : vector<32x32xf32> to vector<8x32xf32>
    %cst_86 = arith.constant dense<0.000000e+00> : vector<8x32xf32>
    %183 = tpu.matmul %181, %182, %cst_86 {dimension_numbers = #tpu.dot_dimension_numbers<[1], [0], [0], [1], [0, 0, 1, 1], [], []>} : vector<8x8xf32>, vector<8x32xf32>, vector<8x32xf32> -> vector<8x32xf32>
    %184 = vector.extract_strided_slice %160 {offsets = [0, 8], sizes = [8, 8], strides = [1, 1]} : vector<8x32xf32> to vector<8x8xf32>
    %185 = vector.extract_strided_slice %161 {offsets = [0, 8], sizes = [8, 8], strides = [1, 1]} : vector<8x32xf32> to vector<8x8xf32>
    %186 = vector.extract_strided_slice %162 {offsets = [0, 8], sizes = [8, 8], strides = [1, 1]} : vector<8x32xf32> to vector<8x8xf32>
    %cst_87 = arith.constant dense<0.000000e+00> : vector<8x8xf32>
    %187 = tpu.matmul %184, %185, %cst_87 {dimension_numbers = #tpu.dot_dimension_numbers<[1], [1], [0], [0], [0, 0, 1, 0], [], []>} : vector<8x8xf32>, vector<8x8xf32>, vector<8x8xf32> -> vector<8x8xf32>
    %cst_88 = arith.constant dense<0xFF800000> : vector<8xf32>
    %188 = vector.multi_reduction <maximumf>, %187, %cst_88 [1] : vector<8x8xf32> to vector<8xf32>
    %189 = vector.shape_cast %188 : vector<8xf32> to vector<8x1xf32>
    %190 = vector.broadcast %189 : vector<8x1xf32> to vector<8x8xf32>
    %191 = arith.subf %187, %190 : vector<8x8xf32>
    %192 = math.exp %191 : vector<8x8xf32>
    %cst_89 = arith.constant dense<0.000000e+00> : vector<8xf32>
    %193 = vector.multi_reduction <add>, %192, %cst_89 [1] : vector<8x8xf32> to vector<8xf32>
    %194 = vector.shape_cast %193 : vector<8xf32> to vector<8x1xf32>
    %195 = tpu.reciprocal %194 {approx = true} : vector<8x1xf32> -> vector<8x1xf32>
    %196 = vector.broadcast %195 : vector<8x1xf32> to vector<8x8xf32>
    %197 = arith.mulf %192, %196 : vector<8x8xf32>
    %cst_90 = arith.constant dense<0.000000e+00> : vector<8x8xf32>
    %198 = tpu.matmul %197, %186, %cst_90 {dimension_numbers = #tpu.dot_dimension_numbers<[1], [0], [0], [1], [0, 0, 1, 1], [], []>} : vector<8x8xf32>, vector<8x8xf32>, vector<8x8xf32> -> vector<8x8xf32>
    %199 = vector.extract_strided_slice %164 {offsets = [8, 0], sizes = [8, 32], strides = [1, 1]} : vector<32x32xf32> to vector<8x32xf32>
    %cst_91 = arith.constant dense<0.000000e+00> : vector<8x32xf32>
    %200 = tpu.matmul %198, %199, %cst_91 {dimension_numbers = #tpu.dot_dimension_numbers<[1], [0], [0], [1], [0, 0, 1, 1], [], []>} : vector<8x8xf32>, vector<8x32xf32>, vector<8x32xf32> -> vector<8x32xf32>
    %201 = arith.addf %183, %200 : vector<8x32xf32>
    %202 = vector.extract_strided_slice %160 {offsets = [0, 16], sizes = [8, 8], strides = [1, 1]} : vector<8x32xf32> to vector<8x8xf32>
    %203 = vector.extract_strided_slice %161 {offsets = [0, 16], sizes = [8, 8], strides = [1, 1]} : vector<8x32xf32> to vector<8x8xf32>
    %204 = vector.extract_strided_slice %162 {offsets = [0, 16], sizes = [8, 8], strides = [1, 1]} : vector<8x32xf32> to vector<8x8xf32>
    %cst_92 = arith.constant dense<0.000000e+00> : vector<8x8xf32>
    %205 = tpu.matmul %202, %203, %cst_92 {dimension_numbers = #tpu.dot_dimension_numbers<[1], [1], [0], [0], [0, 0, 1, 0], [], []>} : vector<8x8xf32>, vector<8x8xf32>, vector<8x8xf32> -> vector<8x8xf32>
    %cst_93 = arith.constant dense<0xFF800000> : vector<8xf32>
    %206 = vector.multi_reduction <maximumf>, %205, %cst_93 [1] : vector<8x8xf32> to vector<8xf32>
    %207 = vector.shape_cast %206 : vector<8xf32> to vector<8x1xf32>
    %208 = vector.broadcast %207 : vector<8x1xf32> to vector<8x8xf32>
    %209 = arith.subf %205, %208 : vector<8x8xf32>
    %210 = math.exp %209 : vector<8x8xf32>
    %cst_94 = arith.constant dense<0.000000e+00> : vector<8xf32>
    %211 = vector.multi_reduction <add>, %210, %cst_94 [1] : vector<8x8xf32> to vector<8xf32>
    %212 = vector.shape_cast %211 : vector<8xf32> to vector<8x1xf32>
    %213 = tpu.reciprocal %212 {approx = true} : vector<8x1xf32> -> vector<8x1xf32>
    %214 = vector.broadcast %213 : vector<8x1xf32> to vector<8x8xf32>
    %215 = arith.mulf %210, %214 : vector<8x8xf32>
    %cst_95 = arith.constant dense<0.000000e+00> : vector<8x8xf32>
    %216 = tpu.matmul %215, %204, %cst_95 {dimension_numbers = #tpu.dot_dimension_numbers<[1], [0], [0], [1], [0, 0, 1, 1], [], []>} : vector<8x8xf32>, vector<8x8xf32>, vector<8x8xf32> -> vector<8x8xf32>
    %217 = vector.extract_strided_slice %164 {offsets = [16, 0], sizes = [8, 32], strides = [1, 1]} : vector<32x32xf32> to vector<8x32xf32>
    %cst_96 = arith.constant dense<0.000000e+00> : vector<8x32xf32>
    %218 = tpu.matmul %216, %217, %cst_96 {dimension_numbers = #tpu.dot_dimension_numbers<[1], [0], [0], [1], [0, 0, 1, 1], [], []>} : vector<8x8xf32>, vector<8x32xf32>, vector<8x32xf32> -> vector<8x32xf32>
    %219 = arith.addf %201, %218 : vector<8x32xf32>
    %220 = vector.extract_strided_slice %160 {offsets = [0, 24], sizes = [8, 8], strides = [1, 1]} : vector<8x32xf32> to vector<8x8xf32>
    %221 = vector.extract_strided_slice %161 {offsets = [0, 24], sizes = [8, 8], strides = [1, 1]} : vector<8x32xf32> to vector<8x8xf32>
    %222 = vector.extract_strided_slice %162 {offsets = [0, 24], sizes = [8, 8], strides = [1, 1]} : vector<8x32xf32> to vector<8x8xf32>
    %cst_97 = arith.constant dense<0.000000e+00> : vector<8x8xf32>
    %223 = tpu.matmul %220, %221, %cst_97 {dimension_numbers = #tpu.dot_dimension_numbers<[1], [1], [0], [0], [0, 0, 1, 0], [], []>} : vector<8x8xf32>, vector<8x8xf32>, vector<8x8xf32> -> vector<8x8xf32>
    %cst_98 = arith.constant dense<0xFF800000> : vector<8xf32>
    %224 = vector.multi_reduction <maximumf>, %223, %cst_98 [1] : vector<8x8xf32> to vector<8xf32>
    %225 = vector.shape_cast %224 : vector<8xf32> to vector<8x1xf32>
    %226 = vector.broadcast %225 : vector<8x1xf32> to vector<8x8xf32>
    %227 = arith.subf %223, %226 : vector<8x8xf32>
    %228 = math.exp %227 : vector<8x8xf32>
    %cst_99 = arith.constant dense<0.000000e+00> : vector<8xf32>
    %229 = vector.multi_reduction <add>, %228, %cst_99 [1] : vector<8x8xf32> to vector<8xf32>
    %230 = vector.shape_cast %229 : vector<8xf32> to vector<8x1xf32>
    %231 = tpu.reciprocal %230 {approx = true} : vector<8x1xf32> -> vector<8x1xf32>
    %232 = vector.broadcast %231 : vector<8x1xf32> to vector<8x8xf32>
    %233 = arith.mulf %228, %232 : vector<8x8xf32>
    %cst_100 = arith.constant dense<0.000000e+00> : vector<8x8xf32>
    %234 = tpu.matmul %233, %222, %cst_100 {dimension_numbers = #tpu.dot_dimension_numbers<[1], [0], [0], [1], [0, 0, 1, 1], [], []>} : vector<8x8xf32>, vector<8x8xf32>, vector<8x8xf32> -> vector<8x8xf32>
    %235 = vector.extract_strided_slice %164 {offsets = [24, 0], sizes = [8, 32], strides = [1, 1]} : vector<32x32xf32> to vector<8x32xf32>
    %cst_101 = arith.constant dense<0.000000e+00> : vector<8x32xf32>
    %236 = tpu.matmul %234, %235, %cst_101 {dimension_numbers = #tpu.dot_dimension_numbers<[1], [0], [0], [1], [0, 0, 1, 1], [], []>} : vector<8x8xf32>, vector<8x32xf32>, vector<8x32xf32> -> vector<8x32xf32>
    %237 = arith.addf %219, %236 : vector<8x32xf32>
    %238 = vector.broadcast %166 : vector<1x32xf32> to vector<8x32xf32>
    %239 = arith.addf %237, %238 : vector<8x32xf32>
    %240 = arith.addf %152, %239 : vector<8x32xf32>
    %c1_102 = arith.constant 1 : index
    %c0_103 = arith.constant 0 : index
    %c0_104 = arith.constant 0 : index
    %241 = vector.load %arg7[%c1_102, %c0_103, %c0_104] : memref<2x1x32xf32, #tpu.memory_space<vmem>>, vector<1x1x32xf32>
    %242 = vector.shape_cast %241 : vector<1x1x32xf32> to vector<1x32xf32>
    %c1_105 = arith.constant 1 : index
    %c0_106 = arith.constant 0 : index
    %c0_107 = arith.constant 0 : index
    %243 = vector.load %arg8[%c1_105, %c0_106, %c0_107] : memref<2x1x32xf32, #tpu.memory_space<vmem>>, vector<1x1x32xf32>
    %244 = vector.shape_cast %243 : vector<1x1x32xf32> to vector<1x32xf32>
    %cst_108 = arith.constant dense<0.000000e+00> : vector<8xf32>
    %245 = vector.multi_reduction <add>, %240, %cst_108 [1] : vector<8x32xf32> to vector<8xf32>
    %246 = vector.shape_cast %245 : vector<8xf32> to vector<8x1xf32>
    %cst_109 = arith.constant 3.200000e+01 : f32
    %247 = vector.broadcast %cst_109 : f32 to vector<8x1xf32>
    %248 = arith.divf %246, %247 : vector<8x1xf32>
    %249 = vector.broadcast %248 : vector<8x1xf32> to vector<8x32xf32>
    %250 = arith.subf %240, %249 : vector<8x32xf32>
    %251 = arith.mulf %250, %250 : vector<8x32xf32>
    %cst_110 = arith.constant dense<0.000000e+00> : vector<8xf32>
    %252 = vector.multi_reduction <add>, %251, %cst_110 [1] : vector<8x32xf32> to vector<8xf32>
    %253 = vector.shape_cast %252 : vector<8xf32> to vector<8x1xf32>
    %cst_111 = arith.constant 3.200000e+01 : f32
    %254 = vector.broadcast %cst_111 : f32 to vector<8x1xf32>
    %255 = arith.divf %253, %254 : vector<8x1xf32>
    %cst_112 = arith.constant 9.99999974E-6 : f32
    %256 = vector.broadcast %cst_112 : f32 to vector<8x1xf32>
    %257 = arith.addf %255, %256 : vector<8x1xf32>
    %258 = math.rsqrt %257 : vector<8x1xf32>
    %259 = vector.broadcast %258 : vector<8x1xf32> to vector<8x32xf32>
    %260 = arith.mulf %250, %259 : vector<8x32xf32>
    %261 = vector.broadcast %242 : vector<1x32xf32> to vector<8x32xf32>
    %262 = arith.mulf %260, %261 : vector<8x32xf32>
    %263 = vector.broadcast %244 : vector<1x32xf32> to vector<8x32xf32>
    %264 = arith.addf %262, %263 : vector<8x32xf32>
    %c1_113 = arith.constant 1 : index
    %c0_114 = arith.constant 0 : index
    %c0_115 = arith.constant 0 : index
    %265 = vector.load %arg9[%c1_113, %c0_114, %c0_115] : memref<2x32x64xf32, #tpu.memory_space<vmem>>, vector<1x32x64xf32>
    %266 = vector.shape_cast %265 : vector<1x32x64xf32> to vector<32x64xf32>
    %cst_116 = arith.constant dense<0.000000e+00> : vector<8x64xf32>
    %267 = tpu.matmul %264, %266, %cst_116 {dimension_numbers = #tpu.dot_dimension_numbers<[1], [0], [0], [1], [0, 0, 1, 1], [], []>} : vector<8x32xf32>, vector<32x64xf32>, vector<8x64xf32> -> vector<8x64xf32>
    %c1_117 = arith.constant 1 : index
    %c0_118 = arith.constant 0 : index
    %c0_119 = arith.constant 0 : index
    %268 = vector.load %arg10[%c1_117, %c0_118, %c0_119] : memref<2x1x64xf32, #tpu.memory_space<vmem>>, vector<1x1x64xf32>
    %269 = vector.shape_cast %268 : vector<1x1x64xf32> to vector<1x64xf32>
    %270 = vector.broadcast %269 : vector<1x64xf32> to vector<8x64xf32>
    %271 = arith.addf %267, %270 : vector<8x64xf32>
    %c1_120 = arith.constant 1 : index
    %c0_121 = arith.constant 0 : index
    %c0_122 = arith.constant 0 : index
    %272 = vector.load %arg11[%c1_120, %c0_121, %c0_122] : memref<2x64x32xf32, #tpu.memory_space<vmem>>, vector<1x64x32xf32>
    %273 = vector.shape_cast %272 : vector<1x64x32xf32> to vector<64x32xf32>
    %cst_123 = arith.constant dense<0.000000e+00> : vector<8x32xf32>
    %274 = tpu.matmul %271, %273, %cst_123 {dimension_numbers = #tpu.dot_dimension_numbers<[1], [0], [0], [1], [0, 0, 1, 1], [], []>} : vector<8x64xf32>, vector<64x32xf32>, vector<8x32xf32> -> vector<8x32xf32>
    %c1_124 = arith.constant 1 : index
    %c0_125 = arith.constant 0 : index
    %c0_126 = arith.constant 0 : index
    %275 = vector.load %arg12[%c1_124, %c0_125, %c0_126] : memref<2x1x32xf32, #tpu.memory_space<vmem>>, vector<1x1x32xf32>
    %276 = vector.shape_cast %275 : vector<1x1x32xf32> to vector<1x32xf32>
    %277 = vector.broadcast %276 : vector<1x32xf32> to vector<8x32xf32>
    %278 = arith.addf %274, %277 : vector<8x32xf32>
    %279 = arith.addf %264, %278 : vector<8x32xf32>
    %c1_127 = arith.constant 1 : index
    %c0_128 = arith.constant 0 : index
    %c0_129 = arith.constant 0 : index
    %280 = vector.load %arg13[%c1_127, %c0_128, %c0_129] : memref<2x1x32xf32, #tpu.memory_space<vmem>>, vector<1x1x32xf32>
    %281 = vector.shape_cast %280 : vector<1x1x32xf32> to vector<1x32xf32>
    %c1_130 = arith.constant 1 : index
    %c0_131 = arith.constant 0 : index
    %c0_132 = arith.constant 0 : index
    %282 = vector.load %arg14[%c1_130, %c0_131, %c0_132] : memref<2x1x32xf32, #tpu.memory_space<vmem>>, vector<1x1x32xf32>
    %283 = vector.shape_cast %282 : vector<1x1x32xf32> to vector<1x32xf32>
    %cst_133 = arith.constant dense<0.000000e+00> : vector<8xf32>
    %284 = vector.multi_reduction <add>, %279, %cst_133 [1] : vector<8x32xf32> to vector<8xf32>
    %285 = vector.shape_cast %284 : vector<8xf32> to vector<8x1xf32>
    %cst_134 = arith.constant 3.200000e+01 : f32
    %286 = vector.broadcast %cst_134 : f32 to vector<8x1xf32>
    %287 = arith.divf %285, %286 : vector<8x1xf32>
    %288 = vector.broadcast %287 : vector<8x1xf32> to vector<8x32xf32>
    %289 = arith.subf %279, %288 : vector<8x32xf32>
    %290 = arith.mulf %289, %289 : vector<8x32xf32>
    %cst_135 = arith.constant dense<0.000000e+00> : vector<8xf32>
    %291 = vector.multi_reduction <add>, %290, %cst_135 [1] : vector<8x32xf32> to vector<8xf32>
    %292 = vector.shape_cast %291 : vector<8xf32> to vector<8x1xf32>
    %cst_136 = arith.constant 3.200000e+01 : f32
    %293 = vector.broadcast %cst_136 : f32 to vector<8x1xf32>
    %294 = arith.divf %292, %293 : vector<8x1xf32>
    %cst_137 = arith.constant 9.99999974E-6 : f32
    %295 = vector.broadcast %cst_137 : f32 to vector<8x1xf32>
    %296 = arith.addf %294, %295 : vector<8x1xf32>
    %297 = math.rsqrt %296 : vector<8x1xf32>
    %298 = vector.broadcast %297 : vector<8x1xf32> to vector<8x32xf32>
    %299 = arith.mulf %289, %298 : vector<8x32xf32>
    %300 = vector.broadcast %281 : vector<1x32xf32> to vector<8x32xf32>
    %301 = arith.mulf %299, %300 : vector<8x32xf32>
    %302 = vector.broadcast %283 : vector<1x32xf32> to vector<8x32xf32>
    %303 = arith.addf %301, %302 : vector<8x32xf32>
    %c0_138 = arith.constant 0 : index
    %c0_139 = arith.constant 0 : index
    %c0_140 = arith.constant 0 : index
    %304 = vector.load %arg2[%c0_138, %c0_139, %c0_140] : memref<1x8x32xf32, #tpu.memory_space<vmem>>, vector<1x8x32xf32>
    %305 = vector.shape_cast %304 : vector<1x8x32xf32> to vector<8x32xf32>
    %c0_141 = arith.constant 0 : index
    %c0_142 = arith.constant 0 : index
    %c0_143 = arith.constant 0 : index
    %306 = vector.load %arg15[%c0_141, %c0_142, %c0_143] : memref<2x32x96xf32, #tpu.memory_space<vmem>>, vector<1x32x96xf32>
    %307 = vector.shape_cast %306 : vector<1x32x96xf32> to vector<32x96xf32>
    %cst_144 = arith.constant dense<0.000000e+00> : vector<8x96xf32>
    %308 = tpu.matmul %305, %307, %cst_144 {dimension_numbers = #tpu.dot_dimension_numbers<[1], [0], [0], [1], [0, 0, 1, 1], [], []>} : vector<8x32xf32>, vector<32x96xf32>, vector<8x96xf32> -> vector<8x96xf32>
    %c0_145 = arith.constant 0 : index
    %c0_146 = arith.constant 0 : index
    %c0_147 = arith.constant 0 : index
    %309 = vector.load %arg16[%c0_145, %c0_146, %c0_147] : memref<2x1x96xf32, #tpu.memory_space<vmem>>, vector<1x1x96xf32>
    %310 = vector.shape_cast %309 : vector<1x1x96xf32> to vector<1x96xf32>
    %311 = vector.broadcast %310 : vector<1x96xf32> to vector<8x96xf32>
    %312 = arith.addf %308, %311 : vector<8x96xf32>
    %313 = vector.extract_strided_slice %312 {offsets = [0, 0], sizes = [8, 32], strides = [1, 1]} : vector<8x96xf32> to vector<8x32xf32>
    %314 = vector.extract_strided_slice %312 {offsets = [0, 32], sizes = [8, 32], strides = [1, 1]} : vector<8x96xf32> to vector<8x32xf32>
    %315 = vector.extract_strided_slice %312 {offsets = [0, 64], sizes = [8, 32], strides = [1, 1]} : vector<8x96xf32> to vector<8x32xf32>
    %c0_148 = arith.constant 0 : index
    %c0_149 = arith.constant 0 : index
    %c0_150 = arith.constant 0 : index
    %316 = vector.load %arg17[%c0_148, %c0_149, %c0_150] : memref<2x32x32xf32, #tpu.memory_space<vmem>>, vector<1x32x32xf32>
    %317 = vector.shape_cast %316 : vector<1x32x32xf32> to vector<32x32xf32>
    %c0_151 = arith.constant 0 : index
    %c0_152 = arith.constant 0 : index
    %c0_153 = arith.constant 0 : index
    %318 = vector.load %arg18[%c0_151, %c0_152, %c0_153] : memref<2x1x32xf32, #tpu.memory_space<vmem>>, vector<1x1x32xf32>
    %319 = vector.shape_cast %318 : vector<1x1x32xf32> to vector<1x32xf32>
    %320 = tpu.iota {dimensions = array<i32: 0>} : vector<8x8xi32>
    %321 = tpu.iota {dimensions = array<i32: 1>} : vector<8x8xi32>
    %322 = arith.cmpi sgt, %321, %320 : vector<8x8xi32>
    %323 = vector.extract_strided_slice %313 {offsets = [0, 0], sizes = [8, 8], strides = [1, 1]} : vector<8x32xf32> to vector<8x8xf32>
    %324 = vector.extract_strided_slice %314 {offsets = [0, 0], sizes = [8, 8], strides = [1, 1]} : vector<8x32xf32> to vector<8x8xf32>
    %325 = vector.extract_strided_slice %315 {offsets = [0, 0], sizes = [8, 8], strides = [1, 1]} : vector<8x32xf32> to vector<8x8xf32>
    %cst_154 = arith.constant dense<0.000000e+00> : vector<8x8xf32>
    %326 = tpu.matmul %323, %324, %cst_154 {dimension_numbers = #tpu.dot_dimension_numbers<[1], [1], [0], [0], [0, 0, 1, 0], [], []>} : vector<8x8xf32>, vector<8x8xf32>, vector<8x8xf32> -> vector<8x8xf32>
    %cst_155 = arith.constant -1.000000e+09 : f32
    %327 = vector.broadcast %cst_155 : f32 to vector<8x8xf32>
    %328 = arith.select %322, %327, %326 : vector<8x8xi1>, vector<8x8xf32>
    %cst_156 = arith.constant dense<0xFF800000> : vector<8xf32>
    %329 = vector.multi_reduction <maximumf>, %328, %cst_156 [1] : vector<8x8xf32> to vector<8xf32>
    %330 = vector.shape_cast %329 : vector<8xf32> to vector<8x1xf32>
    %331 = vector.broadcast %330 : vector<8x1xf32> to vector<8x8xf32>
    %332 = arith.subf %328, %331 : vector<8x8xf32>
    %333 = math.exp %332 : vector<8x8xf32>
    %cst_157 = arith.constant dense<0.000000e+00> : vector<8xf32>
    %334 = vector.multi_reduction <add>, %333, %cst_157 [1] : vector<8x8xf32> to vector<8xf32>
    %335 = vector.shape_cast %334 : vector<8xf32> to vector<8x1xf32>
    %336 = tpu.reciprocal %335 {approx = true} : vector<8x1xf32> -> vector<8x1xf32>
    %337 = vector.broadcast %336 : vector<8x1xf32> to vector<8x8xf32>
    %338 = arith.mulf %333, %337 : vector<8x8xf32>
    %cst_158 = arith.constant dense<0.000000e+00> : vector<8x8xf32>
    %339 = tpu.matmul %338, %325, %cst_158 {dimension_numbers = #tpu.dot_dimension_numbers<[1], [0], [0], [1], [0, 0, 1, 1], [], []>} : vector<8x8xf32>, vector<8x8xf32>, vector<8x8xf32> -> vector<8x8xf32>
    %340 = vector.extract_strided_slice %317 {offsets = [0, 0], sizes = [8, 32], strides = [1, 1]} : vector<32x32xf32> to vector<8x32xf32>
    %cst_159 = arith.constant dense<0.000000e+00> : vector<8x32xf32>
    %341 = tpu.matmul %339, %340, %cst_159 {dimension_numbers = #tpu.dot_dimension_numbers<[1], [0], [0], [1], [0, 0, 1, 1], [], []>} : vector<8x8xf32>, vector<8x32xf32>, vector<8x32xf32> -> vector<8x32xf32>
    %342 = vector.extract_strided_slice %313 {offsets = [0, 8], sizes = [8, 8], strides = [1, 1]} : vector<8x32xf32> to vector<8x8xf32>
    %343 = vector.extract_strided_slice %314 {offsets = [0, 8], sizes = [8, 8], strides = [1, 1]} : vector<8x32xf32> to vector<8x8xf32>
    %344 = vector.extract_strided_slice %315 {offsets = [0, 8], sizes = [8, 8], strides = [1, 1]} : vector<8x32xf32> to vector<8x8xf32>
    %cst_160 = arith.constant dense<0.000000e+00> : vector<8x8xf32>
    %345 = tpu.matmul %342, %343, %cst_160 {dimension_numbers = #tpu.dot_dimension_numbers<[1], [1], [0], [0], [0, 0, 1, 0], [], []>} : vector<8x8xf32>, vector<8x8xf32>, vector<8x8xf32> -> vector<8x8xf32>
    %cst_161 = arith.constant -1.000000e+09 : f32
    %346 = vector.broadcast %cst_161 : f32 to vector<8x8xf32>
    %347 = arith.select %322, %346, %345 : vector<8x8xi1>, vector<8x8xf32>
    %cst_162 = arith.constant dense<0xFF800000> : vector<8xf32>
    %348 = vector.multi_reduction <maximumf>, %347, %cst_162 [1] : vector<8x8xf32> to vector<8xf32>
    %349 = vector.shape_cast %348 : vector<8xf32> to vector<8x1xf32>
    %350 = vector.broadcast %349 : vector<8x1xf32> to vector<8x8xf32>
    %351 = arith.subf %347, %350 : vector<8x8xf32>
    %352 = math.exp %351 : vector<8x8xf32>
    %cst_163 = arith.constant dense<0.000000e+00> : vector<8xf32>
    %353 = vector.multi_reduction <add>, %352, %cst_163 [1] : vector<8x8xf32> to vector<8xf32>
    %354 = vector.shape_cast %353 : vector<8xf32> to vector<8x1xf32>
    %355 = tpu.reciprocal %354 {approx = true} : vector<8x1xf32> -> vector<8x1xf32>
    %356 = vector.broadcast %355 : vector<8x1xf32> to vector<8x8xf32>
    %357 = arith.mulf %352, %356 : vector<8x8xf32>
    %cst_164 = arith.constant dense<0.000000e+00> : vector<8x8xf32>
    %358 = tpu.matmul %357, %344, %cst_164 {dimension_numbers = #tpu.dot_dimension_numbers<[1], [0], [0], [1], [0, 0, 1, 1], [], []>} : vector<8x8xf32>, vector<8x8xf32>, vector<8x8xf32> -> vector<8x8xf32>
    %359 = vector.extract_strided_slice %317 {offsets = [8, 0], sizes = [8, 32], strides = [1, 1]} : vector<32x32xf32> to vector<8x32xf32>
    %cst_165 = arith.constant dense<0.000000e+00> : vector<8x32xf32>
    %360 = tpu.matmul %358, %359, %cst_165 {dimension_numbers = #tpu.dot_dimension_numbers<[1], [0], [0], [1], [0, 0, 1, 1], [], []>} : vector<8x8xf32>, vector<8x32xf32>, vector<8x32xf32> -> vector<8x32xf32>
    %361 = arith.addf %341, %360 : vector<8x32xf32>
    %362 = vector.extract_strided_slice %313 {offsets = [0, 16], sizes = [8, 8], strides = [1, 1]} : vector<8x32xf32> to vector<8x8xf32>
    %363 = vector.extract_strided_slice %314 {offsets = [0, 16], sizes = [8, 8], strides = [1, 1]} : vector<8x32xf32> to vector<8x8xf32>
    %364 = vector.extract_strided_slice %315 {offsets = [0, 16], sizes = [8, 8], strides = [1, 1]} : vector<8x32xf32> to vector<8x8xf32>
    %cst_166 = arith.constant dense<0.000000e+00> : vector<8x8xf32>
    %365 = tpu.matmul %362, %363, %cst_166 {dimension_numbers = #tpu.dot_dimension_numbers<[1], [1], [0], [0], [0, 0, 1, 0], [], []>} : vector<8x8xf32>, vector<8x8xf32>, vector<8x8xf32> -> vector<8x8xf32>
    %cst_167 = arith.constant -1.000000e+09 : f32
    %366 = vector.broadcast %cst_167 : f32 to vector<8x8xf32>
    %367 = arith.select %322, %366, %365 : vector<8x8xi1>, vector<8x8xf32>
    %cst_168 = arith.constant dense<0xFF800000> : vector<8xf32>
    %368 = vector.multi_reduction <maximumf>, %367, %cst_168 [1] : vector<8x8xf32> to vector<8xf32>
    %369 = vector.shape_cast %368 : vector<8xf32> to vector<8x1xf32>
    %370 = vector.broadcast %369 : vector<8x1xf32> to vector<8x8xf32>
    %371 = arith.subf %367, %370 : vector<8x8xf32>
    %372 = math.exp %371 : vector<8x8xf32>
    %cst_169 = arith.constant dense<0.000000e+00> : vector<8xf32>
    %373 = vector.multi_reduction <add>, %372, %cst_169 [1] : vector<8x8xf32> to vector<8xf32>
    %374 = vector.shape_cast %373 : vector<8xf32> to vector<8x1xf32>
    %375 = tpu.reciprocal %374 {approx = true} : vector<8x1xf32> -> vector<8x1xf32>
    %376 = vector.broadcast %375 : vector<8x1xf32> to vector<8x8xf32>
    %377 = arith.mulf %372, %376 : vector<8x8xf32>
    %cst_170 = arith.constant dense<0.000000e+00> : vector<8x8xf32>
    %378 = tpu.matmul %377, %364, %cst_170 {dimension_numbers = #tpu.dot_dimension_numbers<[1], [0], [0], [1], [0, 0, 1, 1], [], []>} : vector<8x8xf32>, vector<8x8xf32>, vector<8x8xf32> -> vector<8x8xf32>
    %379 = vector.extract_strided_slice %317 {offsets = [16, 0], sizes = [8, 32], strides = [1, 1]} : vector<32x32xf32> to vector<8x32xf32>
    %cst_171 = arith.constant dense<0.000000e+00> : vector<8x32xf32>
    %380 = tpu.matmul %378, %379, %cst_171 {dimension_numbers = #tpu.dot_dimension_numbers<[1], [0], [0], [1], [0, 0, 1, 1], [], []>} : vector<8x8xf32>, vector<8x32xf32>, vector<8x32xf32> -> vector<8x32xf32>
    %381 = arith.addf %361, %380 : vector<8x32xf32>
    %382 = vector.extract_strided_slice %313 {offsets = [0, 24], sizes = [8, 8], strides = [1, 1]} : vector<8x32xf32> to vector<8x8xf32>
    %383 = vector.extract_strided_slice %314 {offsets = [0, 24], sizes = [8, 8], strides = [1, 1]} : vector<8x32xf32> to vector<8x8xf32>
    %384 = vector.extract_strided_slice %315 {offsets = [0, 24], sizes = [8, 8], strides = [1, 1]} : vector<8x32xf32> to vector<8x8xf32>
    %cst_172 = arith.constant dense<0.000000e+00> : vector<8x8xf32>
    %385 = tpu.matmul %382, %383, %cst_172 {dimension_numbers = #tpu.dot_dimension_numbers<[1], [1], [0], [0], [0, 0, 1, 0], [], []>} : vector<8x8xf32>, vector<8x8xf32>, vector<8x8xf32> -> vector<8x8xf32>
    %cst_173 = arith.constant -1.000000e+09 : f32
    %386 = vector.broadcast %cst_173 : f32 to vector<8x8xf32>
    %387 = arith.select %322, %386, %385 : vector<8x8xi1>, vector<8x8xf32>
    %cst_174 = arith.constant dense<0xFF800000> : vector<8xf32>
    %388 = vector.multi_reduction <maximumf>, %387, %cst_174 [1] : vector<8x8xf32> to vector<8xf32>
    %389 = vector.shape_cast %388 : vector<8xf32> to vector<8x1xf32>
    %390 = vector.broadcast %389 : vector<8x1xf32> to vector<8x8xf32>
    %391 = arith.subf %387, %390 : vector<8x8xf32>
    %392 = math.exp %391 : vector<8x8xf32>
    %cst_175 = arith.constant dense<0.000000e+00> : vector<8xf32>
    %393 = vector.multi_reduction <add>, %392, %cst_175 [1] : vector<8x8xf32> to vector<8xf32>
    %394 = vector.shape_cast %393 : vector<8xf32> to vector<8x1xf32>
    %395 = tpu.reciprocal %394 {approx = true} : vector<8x1xf32> -> vector<8x1xf32>
    %396 = vector.broadcast %395 : vector<8x1xf32> to vector<8x8xf32>
    %397 = arith.mulf %392, %396 : vector<8x8xf32>
    %cst_176 = arith.constant dense<0.000000e+00> : vector<8x8xf32>
    %398 = tpu.matmul %397, %384, %cst_176 {dimension_numbers = #tpu.dot_dimension_numbers<[1], [0], [0], [1], [0, 0, 1, 1], [], []>} : vector<8x8xf32>, vector<8x8xf32>, vector<8x8xf32> -> vector<8x8xf32>
    %399 = vector.extract_strided_slice %317 {offsets = [24, 0], sizes = [8, 32], strides = [1, 1]} : vector<32x32xf32> to vector<8x32xf32>
    %cst_177 = arith.constant dense<0.000000e+00> : vector<8x32xf32>
    %400 = tpu.matmul %398, %399, %cst_177 {dimension_numbers = #tpu.dot_dimension_numbers<[1], [0], [0], [1], [0, 0, 1, 1], [], []>} : vector<8x8xf32>, vector<8x32xf32>, vector<8x32xf32> -> vector<8x32xf32>
    %401 = arith.addf %381, %400 : vector<8x32xf32>
    %402 = vector.broadcast %319 : vector<1x32xf32> to vector<8x32xf32>
    %403 = arith.addf %401, %402 : vector<8x32xf32>
    %404 = arith.addf %305, %403 : vector<8x32xf32>
    %c0_178 = arith.constant 0 : index
    %c0_179 = arith.constant 0 : index
    %c0_180 = arith.constant 0 : index
    %405 = vector.load %arg25[%c0_178, %c0_179, %c0_180] : memref<2x1x32xf32, #tpu.memory_space<vmem>>, vector<1x1x32xf32>
    %406 = vector.shape_cast %405 : vector<1x1x32xf32> to vector<1x32xf32>
    %c0_181 = arith.constant 0 : index
    %c0_182 = arith.constant 0 : index
    %c0_183 = arith.constant 0 : index
    %407 = vector.load %arg26[%c0_181, %c0_182, %c0_183] : memref<2x1x32xf32, #tpu.memory_space<vmem>>, vector<1x1x32xf32>
    %408 = vector.shape_cast %407 : vector<1x1x32xf32> to vector<1x32xf32>
    %cst_184 = arith.constant dense<0.000000e+00> : vector<8xf32>
    %409 = vector.multi_reduction <add>, %404, %cst_184 [1] : vector<8x32xf32> to vector<8xf32>
    %410 = vector.shape_cast %409 : vector<8xf32> to vector<8x1xf32>
    %cst_185 = arith.constant 3.200000e+01 : f32
    %411 = vector.broadcast %cst_185 : f32 to vector<8x1xf32>
    %412 = arith.divf %410, %411 : vector<8x1xf32>
    %413 = vector.broadcast %412 : vector<8x1xf32> to vector<8x32xf32>
    %414 = arith.subf %404, %413 : vector<8x32xf32>
    %415 = arith.mulf %414, %414 : vector<8x32xf32>
    %cst_186 = arith.constant dense<0.000000e+00> : vector<8xf32>
    %416 = vector.multi_reduction <add>, %415, %cst_186 [1] : vector<8x32xf32> to vector<8xf32>
    %417 = vector.shape_cast %416 : vector<8xf32> to vector<8x1xf32>
    %cst_187 = arith.constant 3.200000e+01 : f32
    %418 = vector.broadcast %cst_187 : f32 to vector<8x1xf32>
    %419 = arith.divf %417, %418 : vector<8x1xf32>
    %cst_188 = arith.constant 9.99999974E-6 : f32
    %420 = vector.broadcast %cst_188 : f32 to vector<8x1xf32>
    %421 = arith.addf %419, %420 : vector<8x1xf32>
    %422 = math.rsqrt %421 : vector<8x1xf32>
    %423 = vector.broadcast %422 : vector<8x1xf32> to vector<8x32xf32>
    %424 = arith.mulf %414, %423 : vector<8x32xf32>
    %425 = vector.broadcast %406 : vector<1x32xf32> to vector<8x32xf32>
    %426 = arith.mulf %424, %425 : vector<8x32xf32>
    %427 = vector.broadcast %408 : vector<1x32xf32> to vector<8x32xf32>
    %428 = arith.addf %426, %427 : vector<8x32xf32>
    %c0_189 = arith.constant 0 : index
    %c0_190 = arith.constant 0 : index
    %c0_191 = arith.constant 0 : index
    %429 = vector.load %arg19[%c0_189, %c0_190, %c0_191] : memref<2x32x32xf32, #tpu.memory_space<vmem>>, vector<1x32x32xf32>
    %430 = vector.shape_cast %429 : vector<1x32x32xf32> to vector<32x32xf32>
    %cst_192 = arith.constant dense<0.000000e+00> : vector<8x32xf32>
    %431 = tpu.matmul %428, %430, %cst_192 {dimension_numbers = #tpu.dot_dimension_numbers<[1], [0], [0], [1], [0, 0, 1, 1], [], []>} : vector<8x32xf32>, vector<32x32xf32>, vector<8x32xf32> -> vector<8x32xf32>
    %c0_193 = arith.constant 0 : index
    %c0_194 = arith.constant 0 : index
    %c0_195 = arith.constant 0 : index
    %432 = vector.load %arg20[%c0_193, %c0_194, %c0_195] : memref<2x1x32xf32, #tpu.memory_space<vmem>>, vector<1x1x32xf32>
    %433 = vector.shape_cast %432 : vector<1x1x32xf32> to vector<1x32xf32>
    %434 = vector.broadcast %433 : vector<1x32xf32> to vector<8x32xf32>
    %435 = arith.addf %431, %434 : vector<8x32xf32>
    %c0_196 = arith.constant 0 : index
    %c0_197 = arith.constant 0 : index
    %c0_198 = arith.constant 0 : index
    %436 = vector.load %arg21[%c0_196, %c0_197, %c0_198] : memref<2x32x64xf32, #tpu.memory_space<vmem>>, vector<1x32x64xf32>
    %437 = vector.shape_cast %436 : vector<1x32x64xf32> to vector<32x64xf32>
    %cst_199 = arith.constant dense<0.000000e+00> : vector<8x64xf32>
    %438 = tpu.matmul %303, %437, %cst_199 {dimension_numbers = #tpu.dot_dimension_numbers<[1], [0], [0], [1], [0, 0, 1, 1], [], []>} : vector<8x32xf32>, vector<32x64xf32>, vector<8x64xf32> -> vector<8x64xf32>
    %c0_200 = arith.constant 0 : index
    %c0_201 = arith.constant 0 : index
    %c0_202 = arith.constant 0 : index
    %439 = vector.load %arg22[%c0_200, %c0_201, %c0_202] : memref<2x1x64xf32, #tpu.memory_space<vmem>>, vector<1x1x64xf32>
    %440 = vector.shape_cast %439 : vector<1x1x64xf32> to vector<1x64xf32>
    %441 = vector.broadcast %440 : vector<1x64xf32> to vector<8x64xf32>
    %442 = arith.addf %438, %441 : vector<8x64xf32>
    %443 = vector.extract_strided_slice %442 {offsets = [0, 0], sizes = [8, 32], strides = [1, 1]} : vector<8x64xf32> to vector<8x32xf32>
    %444 = vector.extract_strided_slice %442 {offsets = [0, 32], sizes = [8, 32], strides = [1, 1]} : vector<8x64xf32> to vector<8x32xf32>
    %c0_203 = arith.constant 0 : index
    %c0_204 = arith.constant 0 : index
    %c0_205 = arith.constant 0 : index
    %445 = vector.load %arg23[%c0_203, %c0_204, %c0_205] : memref<2x32x32xf32, #tpu.memory_space<vmem>>, vector<1x32x32xf32>
    %446 = vector.shape_cast %445 : vector<1x32x32xf32> to vector<32x32xf32>
    %c0_206 = arith.constant 0 : index
    %c0_207 = arith.constant 0 : index
    %c0_208 = arith.constant 0 : index
    %447 = vector.load %arg24[%c0_206, %c0_207, %c0_208] : memref<2x1x32xf32, #tpu.memory_space<vmem>>, vector<1x1x32xf32>
    %448 = vector.shape_cast %447 : vector<1x1x32xf32> to vector<1x32xf32>
    %449 = vector.extract_strided_slice %435 {offsets = [0, 0], sizes = [8, 8], strides = [1, 1]} : vector<8x32xf32> to vector<8x8xf32>
    %450 = vector.extract_strided_slice %443 {offsets = [0, 0], sizes = [8, 8], strides = [1, 1]} : vector<8x32xf32> to vector<8x8xf32>
    %451 = vector.extract_strided_slice %444 {offsets = [0, 0], sizes = [8, 8], strides = [1, 1]} : vector<8x32xf32> to vector<8x8xf32>
    %cst_209 = arith.constant dense<0.000000e+00> : vector<8x8xf32>
    %452 = tpu.matmul %449, %450, %cst_209 {dimension_numbers = #tpu.dot_dimension_numbers<[1], [1], [0], [0], [0, 0, 1, 0], [], []>} : vector<8x8xf32>, vector<8x8xf32>, vector<8x8xf32> -> vector<8x8xf32>
    %cst_210 = arith.constant dense<0xFF800000> : vector<8xf32>
    %453 = vector.multi_reduction <maximumf>, %452, %cst_210 [1] : vector<8x8xf32> to vector<8xf32>
    %454 = vector.shape_cast %453 : vector<8xf32> to vector<8x1xf32>
    %455 = vector.broadcast %454 : vector<8x1xf32> to vector<8x8xf32>
    %456 = arith.subf %452, %455 : vector<8x8xf32>
    %457 = math.exp %456 : vector<8x8xf32>
    %cst_211 = arith.constant dense<0.000000e+00> : vector<8xf32>
    %458 = vector.multi_reduction <add>, %457, %cst_211 [1] : vector<8x8xf32> to vector<8xf32>
    %459 = vector.shape_cast %458 : vector<8xf32> to vector<8x1xf32>
    %460 = tpu.reciprocal %459 {approx = true} : vector<8x1xf32> -> vector<8x1xf32>
    %461 = vector.broadcast %460 : vector<8x1xf32> to vector<8x8xf32>
    %462 = arith.mulf %457, %461 : vector<8x8xf32>
    %cst_212 = arith.constant dense<0.000000e+00> : vector<8x8xf32>
    %463 = tpu.matmul %462, %451, %cst_212 {dimension_numbers = #tpu.dot_dimension_numbers<[1], [0], [0], [1], [0, 0, 1, 1], [], []>} : vector<8x8xf32>, vector<8x8xf32>, vector<8x8xf32> -> vector<8x8xf32>
    %464 = vector.extract_strided_slice %446 {offsets = [0, 0], sizes = [8, 32], strides = [1, 1]} : vector<32x32xf32> to vector<8x32xf32>
    %cst_213 = arith.constant dense<0.000000e+00> : vector<8x32xf32>
    %465 = tpu.matmul %463, %464, %cst_213 {dimension_numbers = #tpu.dot_dimension_numbers<[1], [0], [0], [1], [0, 0, 1, 1], [], []>} : vector<8x8xf32>, vector<8x32xf32>, vector<8x32xf32> -> vector<8x32xf32>
    %466 = vector.extract_strided_slice %435 {offsets = [0, 8], sizes = [8, 8], strides = [1, 1]} : vector<8x32xf32> to vector<8x8xf32>
    %467 = vector.extract_strided_slice %443 {offsets = [0, 8], sizes = [8, 8], strides = [1, 1]} : vector<8x32xf32> to vector<8x8xf32>
    %468 = vector.extract_strided_slice %444 {offsets = [0, 8], sizes = [8, 8], strides = [1, 1]} : vector<8x32xf32> to vector<8x8xf32>
    %cst_214 = arith.constant dense<0.000000e+00> : vector<8x8xf32>
    %469 = tpu.matmul %466, %467, %cst_214 {dimension_numbers = #tpu.dot_dimension_numbers<[1], [1], [0], [0], [0, 0, 1, 0], [], []>} : vector<8x8xf32>, vector<8x8xf32>, vector<8x8xf32> -> vector<8x8xf32>
    %cst_215 = arith.constant dense<0xFF800000> : vector<8xf32>
    %470 = vector.multi_reduction <maximumf>, %469, %cst_215 [1] : vector<8x8xf32> to vector<8xf32>
    %471 = vector.shape_cast %470 : vector<8xf32> to vector<8x1xf32>
    %472 = vector.broadcast %471 : vector<8x1xf32> to vector<8x8xf32>
    %473 = arith.subf %469, %472 : vector<8x8xf32>
    %474 = math.exp %473 : vector<8x8xf32>
    %cst_216 = arith.constant dense<0.000000e+00> : vector<8xf32>
    %475 = vector.multi_reduction <add>, %474, %cst_216 [1] : vector<8x8xf32> to vector<8xf32>
    %476 = vector.shape_cast %475 : vector<8xf32> to vector<8x1xf32>
    %477 = tpu.reciprocal %476 {approx = true} : vector<8x1xf32> -> vector<8x1xf32>
    %478 = vector.broadcast %477 : vector<8x1xf32> to vector<8x8xf32>
    %479 = arith.mulf %474, %478 : vector<8x8xf32>
    %cst_217 = arith.constant dense<0.000000e+00> : vector<8x8xf32>
    %480 = tpu.matmul %479, %468, %cst_217 {dimension_numbers = #tpu.dot_dimension_numbers<[1], [0], [0], [1], [0, 0, 1, 1], [], []>} : vector<8x8xf32>, vector<8x8xf32>, vector<8x8xf32> -> vector<8x8xf32>
    %481 = vector.extract_strided_slice %446 {offsets = [8, 0], sizes = [8, 32], strides = [1, 1]} : vector<32x32xf32> to vector<8x32xf32>
    %cst_218 = arith.constant dense<0.000000e+00> : vector<8x32xf32>
    %482 = tpu.matmul %480, %481, %cst_218 {dimension_numbers = #tpu.dot_dimension_numbers<[1], [0], [0], [1], [0, 0, 1, 1], [], []>} : vector<8x8xf32>, vector<8x32xf32>, vector<8x32xf32> -> vector<8x32xf32>
    %483 = arith.addf %465, %482 : vector<8x32xf32>
    %484 = vector.extract_strided_slice %435 {offsets = [0, 16], sizes = [8, 8], strides = [1, 1]} : vector<8x32xf32> to vector<8x8xf32>
    %485 = vector.extract_strided_slice %443 {offsets = [0, 16], sizes = [8, 8], strides = [1, 1]} : vector<8x32xf32> to vector<8x8xf32>
    %486 = vector.extract_strided_slice %444 {offsets = [0, 16], sizes = [8, 8], strides = [1, 1]} : vector<8x32xf32> to vector<8x8xf32>
    %cst_219 = arith.constant dense<0.000000e+00> : vector<8x8xf32>
    %487 = tpu.matmul %484, %485, %cst_219 {dimension_numbers = #tpu.dot_dimension_numbers<[1], [1], [0], [0], [0, 0, 1, 0], [], []>} : vector<8x8xf32>, vector<8x8xf32>, vector<8x8xf32> -> vector<8x8xf32>
    %cst_220 = arith.constant dense<0xFF800000> : vector<8xf32>
    %488 = vector.multi_reduction <maximumf>, %487, %cst_220 [1] : vector<8x8xf32> to vector<8xf32>
    %489 = vector.shape_cast %488 : vector<8xf32> to vector<8x1xf32>
    %490 = vector.broadcast %489 : vector<8x1xf32> to vector<8x8xf32>
    %491 = arith.subf %487, %490 : vector<8x8xf32>
    %492 = math.exp %491 : vector<8x8xf32>
    %cst_221 = arith.constant dense<0.000000e+00> : vector<8xf32>
    %493 = vector.multi_reduction <add>, %492, %cst_221 [1] : vector<8x8xf32> to vector<8xf32>
    %494 = vector.shape_cast %493 : vector<8xf32> to vector<8x1xf32>
    %495 = tpu.reciprocal %494 {approx = true} : vector<8x1xf32> -> vector<8x1xf32>
    %496 = vector.broadcast %495 : vector<8x1xf32> to vector<8x8xf32>
    %497 = arith.mulf %492, %496 : vector<8x8xf32>
    %cst_222 = arith.constant dense<0.000000e+00> : vector<8x8xf32>
    %498 = tpu.matmul %497, %486, %cst_222 {dimension_numbers = #tpu.dot_dimension_numbers<[1], [0], [0], [1], [0, 0, 1, 1], [], []>} : vector<8x8xf32>, vector<8x8xf32>, vector<8x8xf32> -> vector<8x8xf32>
    %499 = vector.extract_strided_slice %446 {offsets = [16, 0], sizes = [8, 32], strides = [1, 1]} : vector<32x32xf32> to vector<8x32xf32>
    %cst_223 = arith.constant dense<0.000000e+00> : vector<8x32xf32>
    %500 = tpu.matmul %498, %499, %cst_223 {dimension_numbers = #tpu.dot_dimension_numbers<[1], [0], [0], [1], [0, 0, 1, 1], [], []>} : vector<8x8xf32>, vector<8x32xf32>, vector<8x32xf32> -> vector<8x32xf32>
    %501 = arith.addf %483, %500 : vector<8x32xf32>
    %502 = vector.extract_strided_slice %435 {offsets = [0, 24], sizes = [8, 8], strides = [1, 1]} : vector<8x32xf32> to vector<8x8xf32>
    %503 = vector.extract_strided_slice %443 {offsets = [0, 24], sizes = [8, 8], strides = [1, 1]} : vector<8x32xf32> to vector<8x8xf32>
    %504 = vector.extract_strided_slice %444 {offsets = [0, 24], sizes = [8, 8], strides = [1, 1]} : vector<8x32xf32> to vector<8x8xf32>
    %cst_224 = arith.constant dense<0.000000e+00> : vector<8x8xf32>
    %505 = tpu.matmul %502, %503, %cst_224 {dimension_numbers = #tpu.dot_dimension_numbers<[1], [1], [0], [0], [0, 0, 1, 0], [], []>} : vector<8x8xf32>, vector<8x8xf32>, vector<8x8xf32> -> vector<8x8xf32>
    %cst_225 = arith.constant dense<0xFF800000> : vector<8xf32>
    %506 = vector.multi_reduction <maximumf>, %505, %cst_225 [1] : vector<8x8xf32> to vector<8xf32>
    %507 = vector.shape_cast %506 : vector<8xf32> to vector<8x1xf32>
    %508 = vector.broadcast %507 : vector<8x1xf32> to vector<8x8xf32>
    %509 = arith.subf %505, %508 : vector<8x8xf32>
    %510 = math.exp %509 : vector<8x8xf32>
    %cst_226 = arith.constant dense<0.000000e+00> : vector<8xf32>
    %511 = vector.multi_reduction <add>, %510, %cst_226 [1] : vector<8x8xf32> to vector<8xf32>
    %512 = vector.shape_cast %511 : vector<8xf32> to vector<8x1xf32>
    %513 = tpu.reciprocal %512 {approx = true} : vector<8x1xf32> -> vector<8x1xf32>
    %514 = vector.broadcast %513 : vector<8x1xf32> to vector<8x8xf32>
    %515 = arith.mulf %510, %514 : vector<8x8xf32>
    %cst_227 = arith.constant dense<0.000000e+00> : vector<8x8xf32>
    %516 = tpu.matmul %515, %504, %cst_227 {dimension_numbers = #tpu.dot_dimension_numbers<[1], [0], [0], [1], [0, 0, 1, 1], [], []>} : vector<8x8xf32>, vector<8x8xf32>, vector<8x8xf32> -> vector<8x8xf32>
    %517 = vector.extract_strided_slice %446 {offsets = [24, 0], sizes = [8, 32], strides = [1, 1]} : vector<32x32xf32> to vector<8x32xf32>
    %cst_228 = arith.constant dense<0.000000e+00> : vector<8x32xf32>
    %518 = tpu.matmul %516, %517, %cst_228 {dimension_numbers = #tpu.dot_dimension_numbers<[1], [0], [0], [1], [0, 0, 1, 1], [], []>} : vector<8x8xf32>, vector<8x32xf32>, vector<8x32xf32> -> vector<8x32xf32>
    %519 = arith.addf %501, %518 : vector<8x32xf32>
    %520 = vector.broadcast %448 : vector<1x32xf32> to vector<8x32xf32>
    %521 = arith.addf %519, %520 : vector<8x32xf32>
    %522 = arith.addf %428, %521 : vector<8x32xf32>
    %c0_229 = arith.constant 0 : index
    %c0_230 = arith.constant 0 : index
    %c0_231 = arith.constant 0 : index
    %523 = vector.load %arg27[%c0_229, %c0_230, %c0_231] : memref<2x1x32xf32, #tpu.memory_space<vmem>>, vector<1x1x32xf32>
    %524 = vector.shape_cast %523 : vector<1x1x32xf32> to vector<1x32xf32>
    %c0_232 = arith.constant 0 : index
    %c0_233 = arith.constant 0 : index
    %c0_234 = arith.constant 0 : index
    %525 = vector.load %arg28[%c0_232, %c0_233, %c0_234] : memref<2x1x32xf32, #tpu.memory_space<vmem>>, vector<1x1x32xf32>
    %526 = vector.shape_cast %525 : vector<1x1x32xf32> to vector<1x32xf32>
    %cst_235 = arith.constant dense<0.000000e+00> : vector<8xf32>
    %527 = vector.multi_reduction <add>, %522, %cst_235 [1] : vector<8x32xf32> to vector<8xf32>
    %528 = vector.shape_cast %527 : vector<8xf32> to vector<8x1xf32>
    %cst_236 = arith.constant 3.200000e+01 : f32
    %529 = vector.broadcast %cst_236 : f32 to vector<8x1xf32>
    %530 = arith.divf %528, %529 : vector<8x1xf32>
    %531 = vector.broadcast %530 : vector<8x1xf32> to vector<8x32xf32>
    %532 = arith.subf %522, %531 : vector<8x32xf32>
    %533 = arith.mulf %532, %532 : vector<8x32xf32>
    %cst_237 = arith.constant dense<0.000000e+00> : vector<8xf32>
    %534 = vector.multi_reduction <add>, %533, %cst_237 [1] : vector<8x32xf32> to vector<8xf32>
    %535 = vector.shape_cast %534 : vector<8xf32> to vector<8x1xf32>
    %cst_238 = arith.constant 3.200000e+01 : f32
    %536 = vector.broadcast %cst_238 : f32 to vector<8x1xf32>
    %537 = arith.divf %535, %536 : vector<8x1xf32>
    %cst_239 = arith.constant 9.99999974E-6 : f32
    %538 = vector.broadcast %cst_239 : f32 to vector<8x1xf32>
    %539 = arith.addf %537, %538 : vector<8x1xf32>
    %540 = math.rsqrt %539 : vector<8x1xf32>
    %541 = vector.broadcast %540 : vector<8x1xf32> to vector<8x32xf32>
    %542 = arith.mulf %532, %541 : vector<8x32xf32>
    %543 = vector.broadcast %524 : vector<1x32xf32> to vector<8x32xf32>
    %544 = arith.mulf %542, %543 : vector<8x32xf32>
    %545 = vector.broadcast %526 : vector<1x32xf32> to vector<8x32xf32>
    %546 = arith.addf %544, %545 : vector<8x32xf32>
    %c0_240 = arith.constant 0 : index
    %c0_241 = arith.constant 0 : index
    %c0_242 = arith.constant 0 : index
    %547 = vector.load %arg31[%c0_240, %c0_241, %c0_242] : memref<2x32x64xf32, #tpu.memory_space<vmem>>, vector<1x32x64xf32>
    %548 = vector.shape_cast %547 : vector<1x32x64xf32> to vector<32x64xf32>
    %cst_243 = arith.constant dense<0.000000e+00> : vector<8x64xf32>
    %549 = tpu.matmul %546, %548, %cst_243 {dimension_numbers = #tpu.dot_dimension_numbers<[1], [0], [0], [1], [0, 0, 1, 1], [], []>} : vector<8x32xf32>, vector<32x64xf32>, vector<8x64xf32> -> vector<8x64xf32>
    %c0_244 = arith.constant 0 : index
    %c0_245 = arith.constant 0 : index
    %c0_246 = arith.constant 0 : index
    %550 = vector.load %arg32[%c0_244, %c0_245, %c0_246] : memref<2x1x64xf32, #tpu.memory_space<vmem>>, vector<1x1x64xf32>
    %551 = vector.shape_cast %550 : vector<1x1x64xf32> to vector<1x64xf32>
    %552 = vector.broadcast %551 : vector<1x64xf32> to vector<8x64xf32>
    %553 = arith.addf %549, %552 : vector<8x64xf32>
    %c0_247 = arith.constant 0 : index
    %c0_248 = arith.constant 0 : index
    %c0_249 = arith.constant 0 : index
    %554 = vector.load %arg33[%c0_247, %c0_248, %c0_249] : memref<2x64x32xf32, #tpu.memory_space<vmem>>, vector<1x64x32xf32>
    %555 = vector.shape_cast %554 : vector<1x64x32xf32> to vector<64x32xf32>
    %cst_250 = arith.constant dense<0.000000e+00> : vector<8x32xf32>
    %556 = tpu.matmul %553, %555, %cst_250 {dimension_numbers = #tpu.dot_dimension_numbers<[1], [0], [0], [1], [0, 0, 1, 1], [], []>} : vector<8x64xf32>, vector<64x32xf32>, vector<8x32xf32> -> vector<8x32xf32>
    %c0_251 = arith.constant 0 : index
    %c0_252 = arith.constant 0 : index
    %c0_253 = arith.constant 0 : index
    %557 = vector.load %arg34[%c0_251, %c0_252, %c0_253] : memref<2x1x32xf32, #tpu.memory_space<vmem>>, vector<1x1x32xf32>
    %558 = vector.shape_cast %557 : vector<1x1x32xf32> to vector<1x32xf32>
    %559 = vector.broadcast %558 : vector<1x32xf32> to vector<8x32xf32>
    %560 = arith.addf %556, %559 : vector<8x32xf32>
    %561 = arith.addf %546, %560 : vector<8x32xf32>
    %c0_254 = arith.constant 0 : index
    %c0_255 = arith.constant 0 : index
    %c0_256 = arith.constant 0 : index
    %562 = vector.load %arg29[%c0_254, %c0_255, %c0_256] : memref<2x1x32xf32, #tpu.memory_space<vmem>>, vector<1x1x32xf32>
    %563 = vector.shape_cast %562 : vector<1x1x32xf32> to vector<1x32xf32>
    %c0_257 = arith.constant 0 : index
    %c0_258 = arith.constant 0 : index
    %c0_259 = arith.constant 0 : index
    %564 = vector.load %arg30[%c0_257, %c0_258, %c0_259] : memref<2x1x32xf32, #tpu.memory_space<vmem>>, vector<1x1x32xf32>
    %565 = vector.shape_cast %564 : vector<1x1x32xf32> to vector<1x32xf32>
    %cst_260 = arith.constant dense<0.000000e+00> : vector<8xf32>
    %566 = vector.multi_reduction <add>, %561, %cst_260 [1] : vector<8x32xf32> to vector<8xf32>
    %567 = vector.shape_cast %566 : vector<8xf32> to vector<8x1xf32>
    %cst_261 = arith.constant 3.200000e+01 : f32
    %568 = vector.broadcast %cst_261 : f32 to vector<8x1xf32>
    %569 = arith.divf %567, %568 : vector<8x1xf32>
    %570 = vector.broadcast %569 : vector<8x1xf32> to vector<8x32xf32>
    %571 = arith.subf %561, %570 : vector<8x32xf32>
    %572 = arith.mulf %571, %571 : vector<8x32xf32>
    %cst_262 = arith.constant dense<0.000000e+00> : vector<8xf32>
    %573 = vector.multi_reduction <add>, %572, %cst_262 [1] : vector<8x32xf32> to vector<8xf32>
    %574 = vector.shape_cast %573 : vector<8xf32> to vector<8x1xf32>
    %cst_263 = arith.constant 3.200000e+01 : f32
    %575 = vector.broadcast %cst_263 : f32 to vector<8x1xf32>
    %576 = arith.divf %574, %575 : vector<8x1xf32>
    %cst_264 = arith.constant 9.99999974E-6 : f32
    %577 = vector.broadcast %cst_264 : f32 to vector<8x1xf32>
    %578 = arith.addf %576, %577 : vector<8x1xf32>
    %579 = math.rsqrt %578 : vector<8x1xf32>
    %580 = vector.broadcast %579 : vector<8x1xf32> to vector<8x32xf32>
    %581 = arith.mulf %571, %580 : vector<8x32xf32>
    %582 = vector.broadcast %563 : vector<1x32xf32> to vector<8x32xf32>
    %583 = arith.mulf %581, %582 : vector<8x32xf32>
    %584 = vector.broadcast %565 : vector<1x32xf32> to vector<8x32xf32>
    %585 = arith.addf %583, %584 : vector<8x32xf32>
    %c1_265 = arith.constant 1 : index
    %c0_266 = arith.constant 0 : index
    %c0_267 = arith.constant 0 : index
    %586 = vector.load %arg15[%c1_265, %c0_266, %c0_267] : memref<2x32x96xf32, #tpu.memory_space<vmem>>, vector<1x32x96xf32>
    %587 = vector.shape_cast %586 : vector<1x32x96xf32> to vector<32x96xf32>
    %cst_268 = arith.constant dense<0.000000e+00> : vector<8x96xf32>
    %588 = tpu.matmul %585, %587, %cst_268 {dimension_numbers = #tpu.dot_dimension_numbers<[1], [0], [0], [1], [0, 0, 1, 1], [], []>} : vector<8x32xf32>, vector<32x96xf32>, vector<8x96xf32> -> vector<8x96xf32>
    %c1_269 = arith.constant 1 : index
    %c0_270 = arith.constant 0 : index
    %c0_271 = arith.constant 0 : index
    %589 = vector.load %arg16[%c1_269, %c0_270, %c0_271] : memref<2x1x96xf32, #tpu.memory_space<vmem>>, vector<1x1x96xf32>
    %590 = vector.shape_cast %589 : vector<1x1x96xf32> to vector<1x96xf32>
    %591 = vector.broadcast %590 : vector<1x96xf32> to vector<8x96xf32>
    %592 = arith.addf %588, %591 : vector<8x96xf32>
    %593 = vector.extract_strided_slice %592 {offsets = [0, 0], sizes = [8, 32], strides = [1, 1]} : vector<8x96xf32> to vector<8x32xf32>
    %594 = vector.extract_strided_slice %592 {offsets = [0, 32], sizes = [8, 32], strides = [1, 1]} : vector<8x96xf32> to vector<8x32xf32>
    %595 = vector.extract_strided_slice %592 {offsets = [0, 64], sizes = [8, 32], strides = [1, 1]} : vector<8x96xf32> to vector<8x32xf32>
    %c1_272 = arith.constant 1 : index
    %c0_273 = arith.constant 0 : index
    %c0_274 = arith.constant 0 : index
    %596 = vector.load %arg17[%c1_272, %c0_273, %c0_274] : memref<2x32x32xf32, #tpu.memory_space<vmem>>, vector<1x32x32xf32>
    %597 = vector.shape_cast %596 : vector<1x32x32xf32> to vector<32x32xf32>
    %c1_275 = arith.constant 1 : index
    %c0_276 = arith.constant 0 : index
    %c0_277 = arith.constant 0 : index
    %598 = vector.load %arg18[%c1_275, %c0_276, %c0_277] : memref<2x1x32xf32, #tpu.memory_space<vmem>>, vector<1x1x32xf32>
    %599 = vector.shape_cast %598 : vector<1x1x32xf32> to vector<1x32xf32>
    %600 = tpu.iota {dimensions = array<i32: 0>} : vector<8x8xi32>
    %601 = tpu.iota {dimensions = array<i32: 1>} : vector<8x8xi32>
    %602 = arith.cmpi sgt, %601, %600 : vector<8x8xi32>
    %603 = vector.extract_strided_slice %593 {offsets = [0, 0], sizes = [8, 8], strides = [1, 1]} : vector<8x32xf32> to vector<8x8xf32>
    %604 = vector.extract_strided_slice %594 {offsets = [0, 0], sizes = [8, 8], strides = [1, 1]} : vector<8x32xf32> to vector<8x8xf32>
    %605 = vector.extract_strided_slice %595 {offsets = [0, 0], sizes = [8, 8], strides = [1, 1]} : vector<8x32xf32> to vector<8x8xf32>
    %cst_278 = arith.constant dense<0.000000e+00> : vector<8x8xf32>
    %606 = tpu.matmul %603, %604, %cst_278 {dimension_numbers = #tpu.dot_dimension_numbers<[1], [1], [0], [0], [0, 0, 1, 0], [], []>} : vector<8x8xf32>, vector<8x8xf32>, vector<8x8xf32> -> vector<8x8xf32>
    %cst_279 = arith.constant -1.000000e+09 : f32
    %607 = vector.broadcast %cst_279 : f32 to vector<8x8xf32>
    %608 = arith.select %602, %607, %606 : vector<8x8xi1>, vector<8x8xf32>
    %cst_280 = arith.constant dense<0xFF800000> : vector<8xf32>
    %609 = vector.multi_reduction <maximumf>, %608, %cst_280 [1] : vector<8x8xf32> to vector<8xf32>
    %610 = vector.shape_cast %609 : vector<8xf32> to vector<8x1xf32>
    %611 = vector.broadcast %610 : vector<8x1xf32> to vector<8x8xf32>
    %612 = arith.subf %608, %611 : vector<8x8xf32>
    %613 = math.exp %612 : vector<8x8xf32>
    %cst_281 = arith.constant dense<0.000000e+00> : vector<8xf32>
    %614 = vector.multi_reduction <add>, %613, %cst_281 [1] : vector<8x8xf32> to vector<8xf32>
    %615 = vector.shape_cast %614 : vector<8xf32> to vector<8x1xf32>
    %616 = tpu.reciprocal %615 {approx = true} : vector<8x1xf32> -> vector<8x1xf32>
    %617 = vector.broadcast %616 : vector<8x1xf32> to vector<8x8xf32>
    %618 = arith.mulf %613, %617 : vector<8x8xf32>
    %cst_282 = arith.constant dense<0.000000e+00> : vector<8x8xf32>
    %619 = tpu.matmul %618, %605, %cst_282 {dimension_numbers = #tpu.dot_dimension_numbers<[1], [0], [0], [1], [0, 0, 1, 1], [], []>} : vector<8x8xf32>, vector<8x8xf32>, vector<8x8xf32> -> vector<8x8xf32>
    %620 = vector.extract_strided_slice %597 {offsets = [0, 0], sizes = [8, 32], strides = [1, 1]} : vector<32x32xf32> to vector<8x32xf32>
    %cst_283 = arith.constant dense<0.000000e+00> : vector<8x32xf32>
    %621 = tpu.matmul %619, %620, %cst_283 {dimension_numbers = #tpu.dot_dimension_numbers<[1], [0], [0], [1], [0, 0, 1, 1], [], []>} : vector<8x8xf32>, vector<8x32xf32>, vector<8x32xf32> -> vector<8x32xf32>
    %622 = vector.extract_strided_slice %593 {offsets = [0, 8], sizes = [8, 8], strides = [1, 1]} : vector<8x32xf32> to vector<8x8xf32>
    %623 = vector.extract_strided_slice %594 {offsets = [0, 8], sizes = [8, 8], strides = [1, 1]} : vector<8x32xf32> to vector<8x8xf32>
    %624 = vector.extract_strided_slice %595 {offsets = [0, 8], sizes = [8, 8], strides = [1, 1]} : vector<8x32xf32> to vector<8x8xf32>
    %cst_284 = arith.constant dense<0.000000e+00> : vector<8x8xf32>
    %625 = tpu.matmul %622, %623, %cst_284 {dimension_numbers = #tpu.dot_dimension_numbers<[1], [1], [0], [0], [0, 0, 1, 0], [], []>} : vector<8x8xf32>, vector<8x8xf32>, vector<8x8xf32> -> vector<8x8xf32>
    %cst_285 = arith.constant -1.000000e+09 : f32
    %626 = vector.broadcast %cst_285 : f32 to vector<8x8xf32>
    %627 = arith.select %602, %626, %625 : vector<8x8xi1>, vector<8x8xf32>
    %cst_286 = arith.constant dense<0xFF800000> : vector<8xf32>
    %628 = vector.multi_reduction <maximumf>, %627, %cst_286 [1] : vector<8x8xf32> to vector<8xf32>
    %629 = vector.shape_cast %628 : vector<8xf32> to vector<8x1xf32>
    %630 = vector.broadcast %629 : vector<8x1xf32> to vector<8x8xf32>
    %631 = arith.subf %627, %630 : vector<8x8xf32>
    %632 = math.exp %631 : vector<8x8xf32>
    %cst_287 = arith.constant dense<0.000000e+00> : vector<8xf32>
    %633 = vector.multi_reduction <add>, %632, %cst_287 [1] : vector<8x8xf32> to vector<8xf32>
    %634 = vector.shape_cast %633 : vector<8xf32> to vector<8x1xf32>
    %635 = tpu.reciprocal %634 {approx = true} : vector<8x1xf32> -> vector<8x1xf32>
    %636 = vector.broadcast %635 : vector<8x1xf32> to vector<8x8xf32>
    %637 = arith.mulf %632, %636 : vector<8x8xf32>
    %cst_288 = arith.constant dense<0.000000e+00> : vector<8x8xf32>
    %638 = tpu.matmul %637, %624, %cst_288 {dimension_numbers = #tpu.dot_dimension_numbers<[1], [0], [0], [1], [0, 0, 1, 1], [], []>} : vector<8x8xf32>, vector<8x8xf32>, vector<8x8xf32> -> vector<8x8xf32>
    %639 = vector.extract_strided_slice %597 {offsets = [8, 0], sizes = [8, 32], strides = [1, 1]} : vector<32x32xf32> to vector<8x32xf32>
    %cst_289 = arith.constant dense<0.000000e+00> : vector<8x32xf32>
    %640 = tpu.matmul %638, %639, %cst_289 {dimension_numbers = #tpu.dot_dimension_numbers<[1], [0], [0], [1], [0, 0, 1, 1], [], []>} : vector<8x8xf32>, vector<8x32xf32>, vector<8x32xf32> -> vector<8x32xf32>
    %641 = arith.addf %621, %640 : vector<8x32xf32>
    %642 = vector.extract_strided_slice %593 {offsets = [0, 16], sizes = [8, 8], strides = [1, 1]} : vector<8x32xf32> to vector<8x8xf32>
    %643 = vector.extract_strided_slice %594 {offsets = [0, 16], sizes = [8, 8], strides = [1, 1]} : vector<8x32xf32> to vector<8x8xf32>
    %644 = vector.extract_strided_slice %595 {offsets = [0, 16], sizes = [8, 8], strides = [1, 1]} : vector<8x32xf32> to vector<8x8xf32>
    %cst_290 = arith.constant dense<0.000000e+00> : vector<8x8xf32>
    %645 = tpu.matmul %642, %643, %cst_290 {dimension_numbers = #tpu.dot_dimension_numbers<[1], [1], [0], [0], [0, 0, 1, 0], [], []>} : vector<8x8xf32>, vector<8x8xf32>, vector<8x8xf32> -> vector<8x8xf32>
    %cst_291 = arith.constant -1.000000e+09 : f32
    %646 = vector.broadcast %cst_291 : f32 to vector<8x8xf32>
    %647 = arith.select %602, %646, %645 : vector<8x8xi1>, vector<8x8xf32>
    %cst_292 = arith.constant dense<0xFF800000> : vector<8xf32>
    %648 = vector.multi_reduction <maximumf>, %647, %cst_292 [1] : vector<8x8xf32> to vector<8xf32>
    %649 = vector.shape_cast %648 : vector<8xf32> to vector<8x1xf32>
    %650 = vector.broadcast %649 : vector<8x1xf32> to vector<8x8xf32>
    %651 = arith.subf %647, %650 : vector<8x8xf32>
    %652 = math.exp %651 : vector<8x8xf32>
    %cst_293 = arith.constant dense<0.000000e+00> : vector<8xf32>
    %653 = vector.multi_reduction <add>, %652, %cst_293 [1] : vector<8x8xf32> to vector<8xf32>
    %654 = vector.shape_cast %653 : vector<8xf32> to vector<8x1xf32>
    %655 = tpu.reciprocal %654 {approx = true} : vector<8x1xf32> -> vector<8x1xf32>
    %656 = vector.broadcast %655 : vector<8x1xf32> to vector<8x8xf32>
    %657 = arith.mulf %652, %656 : vector<8x8xf32>
    %cst_294 = arith.constant dense<0.000000e+00> : vector<8x8xf32>
    %658 = tpu.matmul %657, %644, %cst_294 {dimension_numbers = #tpu.dot_dimension_numbers<[1], [0], [0], [1], [0, 0, 1, 1], [], []>} : vector<8x8xf32>, vector<8x8xf32>, vector<8x8xf32> -> vector<8x8xf32>
    %659 = vector.extract_strided_slice %597 {offsets = [16, 0], sizes = [8, 32], strides = [1, 1]} : vector<32x32xf32> to vector<8x32xf32>
    %cst_295 = arith.constant dense<0.000000e+00> : vector<8x32xf32>
    %660 = tpu.matmul %658, %659, %cst_295 {dimension_numbers = #tpu.dot_dimension_numbers<[1], [0], [0], [1], [0, 0, 1, 1], [], []>} : vector<8x8xf32>, vector<8x32xf32>, vector<8x32xf32> -> vector<8x32xf32>
    %661 = arith.addf %641, %660 : vector<8x32xf32>
    %662 = vector.extract_strided_slice %593 {offsets = [0, 24], sizes = [8, 8], strides = [1, 1]} : vector<8x32xf32> to vector<8x8xf32>
    %663 = vector.extract_strided_slice %594 {offsets = [0, 24], sizes = [8, 8], strides = [1, 1]} : vector<8x32xf32> to vector<8x8xf32>
    %664 = vector.extract_strided_slice %595 {offsets = [0, 24], sizes = [8, 8], strides = [1, 1]} : vector<8x32xf32> to vector<8x8xf32>
    %cst_296 = arith.constant dense<0.000000e+00> : vector<8x8xf32>
    %665 = tpu.matmul %662, %663, %cst_296 {dimension_numbers = #tpu.dot_dimension_numbers<[1], [1], [0], [0], [0, 0, 1, 0], [], []>} : vector<8x8xf32>, vector<8x8xf32>, vector<8x8xf32> -> vector<8x8xf32>
    %cst_297 = arith.constant -1.000000e+09 : f32
    %666 = vector.broadcast %cst_297 : f32 to vector<8x8xf32>
    %667 = arith.select %602, %666, %665 : vector<8x8xi1>, vector<8x8xf32>
    %cst_298 = arith.constant dense<0xFF800000> : vector<8xf32>
    %668 = vector.multi_reduction <maximumf>, %667, %cst_298 [1] : vector<8x8xf32> to vector<8xf32>
    %669 = vector.shape_cast %668 : vector<8xf32> to vector<8x1xf32>
    %670 = vector.broadcast %669 : vector<8x1xf32> to vector<8x8xf32>
    %671 = arith.subf %667, %670 : vector<8x8xf32>
    %672 = math.exp %671 : vector<8x8xf32>
    %cst_299 = arith.constant dense<0.000000e+00> : vector<8xf32>
    %673 = vector.multi_reduction <add>, %672, %cst_299 [1] : vector<8x8xf32> to vector<8xf32>
    %674 = vector.shape_cast %673 : vector<8xf32> to vector<8x1xf32>
    %675 = tpu.reciprocal %674 {approx = true} : vector<8x1xf32> -> vector<8x1xf32>
    %676 = vector.broadcast %675 : vector<8x1xf32> to vector<8x8xf32>
    %677 = arith.mulf %672, %676 : vector<8x8xf32>
    %cst_300 = arith.constant dense<0.000000e+00> : vector<8x8xf32>
    %678 = tpu.matmul %677, %664, %cst_300 {dimension_numbers = #tpu.dot_dimension_numbers<[1], [0], [0], [1], [0, 0, 1, 1], [], []>} : vector<8x8xf32>, vector<8x8xf32>, vector<8x8xf32> -> vector<8x8xf32>
    %679 = vector.extract_strided_slice %597 {offsets = [24, 0], sizes = [8, 32], strides = [1, 1]} : vector<32x32xf32> to vector<8x32xf32>
    %cst_301 = arith.constant dense<0.000000e+00> : vector<8x32xf32>
    %680 = tpu.matmul %678, %679, %cst_301 {dimension_numbers = #tpu.dot_dimension_numbers<[1], [0], [0], [1], [0, 0, 1, 1], [], []>} : vector<8x8xf32>, vector<8x32xf32>, vector<8x32xf32> -> vector<8x32xf32>
    %681 = arith.addf %661, %680 : vector<8x32xf32>
    %682 = vector.broadcast %599 : vector<1x32xf32> to vector<8x32xf32>
    %683 = arith.addf %681, %682 : vector<8x32xf32>
    %684 = arith.addf %585, %683 : vector<8x32xf32>
    %c1_302 = arith.constant 1 : index
    %c0_303 = arith.constant 0 : index
    %c0_304 = arith.constant 0 : index
    %685 = vector.load %arg25[%c1_302, %c0_303, %c0_304] : memref<2x1x32xf32, #tpu.memory_space<vmem>>, vector<1x1x32xf32>
    %686 = vector.shape_cast %685 : vector<1x1x32xf32> to vector<1x32xf32>
    %c1_305 = arith.constant 1 : index
    %c0_306 = arith.constant 0 : index
    %c0_307 = arith.constant 0 : index
    %687 = vector.load %arg26[%c1_305, %c0_306, %c0_307] : memref<2x1x32xf32, #tpu.memory_space<vmem>>, vector<1x1x32xf32>
    %688 = vector.shape_cast %687 : vector<1x1x32xf32> to vector<1x32xf32>
    %cst_308 = arith.constant dense<0.000000e+00> : vector<8xf32>
    %689 = vector.multi_reduction <add>, %684, %cst_308 [1] : vector<8x32xf32> to vector<8xf32>
    %690 = vector.shape_cast %689 : vector<8xf32> to vector<8x1xf32>
    %cst_309 = arith.constant 3.200000e+01 : f32
    %691 = vector.broadcast %cst_309 : f32 to vector<8x1xf32>
    %692 = arith.divf %690, %691 : vector<8x1xf32>
    %693 = vector.broadcast %692 : vector<8x1xf32> to vector<8x32xf32>
    %694 = arith.subf %684, %693 : vector<8x32xf32>
    %695 = arith.mulf %694, %694 : vector<8x32xf32>
    %cst_310 = arith.constant dense<0.000000e+00> : vector<8xf32>
    %696 = vector.multi_reduction <add>, %695, %cst_310 [1] : vector<8x32xf32> to vector<8xf32>
    %697 = vector.shape_cast %696 : vector<8xf32> to vector<8x1xf32>
    %cst_311 = arith.constant 3.200000e+01 : f32
    %698 = vector.broadcast %cst_311 : f32 to vector<8x1xf32>
    %699 = arith.divf %697, %698 : vector<8x1xf32>
    %cst_312 = arith.constant 9.99999974E-6 : f32
    %700 = vector.broadcast %cst_312 : f32 to vector<8x1xf32>
    %701 = arith.addf %699, %700 : vector<8x1xf32>
    %702 = math.rsqrt %701 : vector<8x1xf32>
    %703 = vector.broadcast %702 : vector<8x1xf32> to vector<8x32xf32>
    %704 = arith.mulf %694, %703 : vector<8x32xf32>
    %705 = vector.broadcast %686 : vector<1x32xf32> to vector<8x32xf32>
    %706 = arith.mulf %704, %705 : vector<8x32xf32>
    %707 = vector.broadcast %688 : vector<1x32xf32> to vector<8x32xf32>
    %708 = arith.addf %706, %707 : vector<8x32xf32>
    %c1_313 = arith.constant 1 : index
    %c0_314 = arith.constant 0 : index
    %c0_315 = arith.constant 0 : index
    %709 = vector.load %arg19[%c1_313, %c0_314, %c0_315] : memref<2x32x32xf32, #tpu.memory_space<vmem>>, vector<1x32x32xf32>
    %710 = vector.shape_cast %709 : vector<1x32x32xf32> to vector<32x32xf32>
    %cst_316 = arith.constant dense<0.000000e+00> : vector<8x32xf32>
    %711 = tpu.matmul %708, %710, %cst_316 {dimension_numbers = #tpu.dot_dimension_numbers<[1], [0], [0], [1], [0, 0, 1, 1], [], []>} : vector<8x32xf32>, vector<32x32xf32>, vector<8x32xf32> -> vector<8x32xf32>
    %c1_317 = arith.constant 1 : index
    %c0_318 = arith.constant 0 : index
    %c0_319 = arith.constant 0 : index
    %712 = vector.load %arg20[%c1_317, %c0_318, %c0_319] : memref<2x1x32xf32, #tpu.memory_space<vmem>>, vector<1x1x32xf32>
    %713 = vector.shape_cast %712 : vector<1x1x32xf32> to vector<1x32xf32>
    %714 = vector.broadcast %713 : vector<1x32xf32> to vector<8x32xf32>
    %715 = arith.addf %711, %714 : vector<8x32xf32>
    %c1_320 = arith.constant 1 : index
    %c0_321 = arith.constant 0 : index
    %c0_322 = arith.constant 0 : index
    %716 = vector.load %arg21[%c1_320, %c0_321, %c0_322] : memref<2x32x64xf32, #tpu.memory_space<vmem>>, vector<1x32x64xf32>
    %717 = vector.shape_cast %716 : vector<1x32x64xf32> to vector<32x64xf32>
    %cst_323 = arith.constant dense<0.000000e+00> : vector<8x64xf32>
    %718 = tpu.matmul %303, %717, %cst_323 {dimension_numbers = #tpu.dot_dimension_numbers<[1], [0], [0], [1], [0, 0, 1, 1], [], []>} : vector<8x32xf32>, vector<32x64xf32>, vector<8x64xf32> -> vector<8x64xf32>
    %c1_324 = arith.constant 1 : index
    %c0_325 = arith.constant 0 : index
    %c0_326 = arith.constant 0 : index
    %719 = vector.load %arg22[%c1_324, %c0_325, %c0_326] : memref<2x1x64xf32, #tpu.memory_space<vmem>>, vector<1x1x64xf32>
    %720 = vector.shape_cast %719 : vector<1x1x64xf32> to vector<1x64xf32>
    %721 = vector.broadcast %720 : vector<1x64xf32> to vector<8x64xf32>
    %722 = arith.addf %718, %721 : vector<8x64xf32>
    %723 = vector.extract_strided_slice %722 {offsets = [0, 0], sizes = [8, 32], strides = [1, 1]} : vector<8x64xf32> to vector<8x32xf32>
    %724 = vector.extract_strided_slice %722 {offsets = [0, 32], sizes = [8, 32], strides = [1, 1]} : vector<8x64xf32> to vector<8x32xf32>
    %c1_327 = arith.constant 1 : index
    %c0_328 = arith.constant 0 : index
    %c0_329 = arith.constant 0 : index
    %725 = vector.load %arg23[%c1_327, %c0_328, %c0_329] : memref<2x32x32xf32, #tpu.memory_space<vmem>>, vector<1x32x32xf32>
    %726 = vector.shape_cast %725 : vector<1x32x32xf32> to vector<32x32xf32>
    %c1_330 = arith.constant 1 : index
    %c0_331 = arith.constant 0 : index
    %c0_332 = arith.constant 0 : index
    %727 = vector.load %arg24[%c1_330, %c0_331, %c0_332] : memref<2x1x32xf32, #tpu.memory_space<vmem>>, vector<1x1x32xf32>
    %728 = vector.shape_cast %727 : vector<1x1x32xf32> to vector<1x32xf32>
    %729 = vector.extract_strided_slice %715 {offsets = [0, 0], sizes = [8, 8], strides = [1, 1]} : vector<8x32xf32> to vector<8x8xf32>
    %730 = vector.extract_strided_slice %723 {offsets = [0, 0], sizes = [8, 8], strides = [1, 1]} : vector<8x32xf32> to vector<8x8xf32>
    %731 = vector.extract_strided_slice %724 {offsets = [0, 0], sizes = [8, 8], strides = [1, 1]} : vector<8x32xf32> to vector<8x8xf32>
    %cst_333 = arith.constant dense<0.000000e+00> : vector<8x8xf32>
    %732 = tpu.matmul %729, %730, %cst_333 {dimension_numbers = #tpu.dot_dimension_numbers<[1], [1], [0], [0], [0, 0, 1, 0], [], []>} : vector<8x8xf32>, vector<8x8xf32>, vector<8x8xf32> -> vector<8x8xf32>
    %cst_334 = arith.constant dense<0xFF800000> : vector<8xf32>
    %733 = vector.multi_reduction <maximumf>, %732, %cst_334 [1] : vector<8x8xf32> to vector<8xf32>
    %734 = vector.shape_cast %733 : vector<8xf32> to vector<8x1xf32>
    %735 = vector.broadcast %734 : vector<8x1xf32> to vector<8x8xf32>
    %736 = arith.subf %732, %735 : vector<8x8xf32>
    %737 = math.exp %736 : vector<8x8xf32>
    %cst_335 = arith.constant dense<0.000000e+00> : vector<8xf32>
    %738 = vector.multi_reduction <add>, %737, %cst_335 [1] : vector<8x8xf32> to vector<8xf32>
    %739 = vector.shape_cast %738 : vector<8xf32> to vector<8x1xf32>
    %740 = tpu.reciprocal %739 {approx = true} : vector<8x1xf32> -> vector<8x1xf32>
    %741 = vector.broadcast %740 : vector<8x1xf32> to vector<8x8xf32>
    %742 = arith.mulf %737, %741 : vector<8x8xf32>
    %cst_336 = arith.constant dense<0.000000e+00> : vector<8x8xf32>
    %743 = tpu.matmul %742, %731, %cst_336 {dimension_numbers = #tpu.dot_dimension_numbers<[1], [0], [0], [1], [0, 0, 1, 1], [], []>} : vector<8x8xf32>, vector<8x8xf32>, vector<8x8xf32> -> vector<8x8xf32>
    %744 = vector.extract_strided_slice %726 {offsets = [0, 0], sizes = [8, 32], strides = [1, 1]} : vector<32x32xf32> to vector<8x32xf32>
    %cst_337 = arith.constant dense<0.000000e+00> : vector<8x32xf32>
    %745 = tpu.matmul %743, %744, %cst_337 {dimension_numbers = #tpu.dot_dimension_numbers<[1], [0], [0], [1], [0, 0, 1, 1], [], []>} : vector<8x8xf32>, vector<8x32xf32>, vector<8x32xf32> -> vector<8x32xf32>
    %746 = vector.extract_strided_slice %715 {offsets = [0, 8], sizes = [8, 8], strides = [1, 1]} : vector<8x32xf32> to vector<8x8xf32>
    %747 = vector.extract_strided_slice %723 {offsets = [0, 8], sizes = [8, 8], strides = [1, 1]} : vector<8x32xf32> to vector<8x8xf32>
    %748 = vector.extract_strided_slice %724 {offsets = [0, 8], sizes = [8, 8], strides = [1, 1]} : vector<8x32xf32> to vector<8x8xf32>
    %cst_338 = arith.constant dense<0.000000e+00> : vector<8x8xf32>
    %749 = tpu.matmul %746, %747, %cst_338 {dimension_numbers = #tpu.dot_dimension_numbers<[1], [1], [0], [0], [0, 0, 1, 0], [], []>} : vector<8x8xf32>, vector<8x8xf32>, vector<8x8xf32> -> vector<8x8xf32>
    %cst_339 = arith.constant dense<0xFF800000> : vector<8xf32>
    %750 = vector.multi_reduction <maximumf>, %749, %cst_339 [1] : vector<8x8xf32> to vector<8xf32>
    %751 = vector.shape_cast %750 : vector<8xf32> to vector<8x1xf32>
    %752 = vector.broadcast %751 : vector<8x1xf32> to vector<8x8xf32>
    %753 = arith.subf %749, %752 : vector<8x8xf32>
    %754 = math.exp %753 : vector<8x8xf32>
    %cst_340 = arith.constant dense<0.000000e+00> : vector<8xf32>
    %755 = vector.multi_reduction <add>, %754, %cst_340 [1] : vector<8x8xf32> to vector<8xf32>
    %756 = vector.shape_cast %755 : vector<8xf32> to vector<8x1xf32>
    %757 = tpu.reciprocal %756 {approx = true} : vector<8x1xf32> -> vector<8x1xf32>
    %758 = vector.broadcast %757 : vector<8x1xf32> to vector<8x8xf32>
    %759 = arith.mulf %754, %758 : vector<8x8xf32>
    %cst_341 = arith.constant dense<0.000000e+00> : vector<8x8xf32>
    %760 = tpu.matmul %759, %748, %cst_341 {dimension_numbers = #tpu.dot_dimension_numbers<[1], [0], [0], [1], [0, 0, 1, 1], [], []>} : vector<8x8xf32>, vector<8x8xf32>, vector<8x8xf32> -> vector<8x8xf32>
    %761 = vector.extract_strided_slice %726 {offsets = [8, 0], sizes = [8, 32], strides = [1, 1]} : vector<32x32xf32> to vector<8x32xf32>
    %cst_342 = arith.constant dense<0.000000e+00> : vector<8x32xf32>
    %762 = tpu.matmul %760, %761, %cst_342 {dimension_numbers = #tpu.dot_dimension_numbers<[1], [0], [0], [1], [0, 0, 1, 1], [], []>} : vector<8x8xf32>, vector<8x32xf32>, vector<8x32xf32> -> vector<8x32xf32>
    %763 = arith.addf %745, %762 : vector<8x32xf32>
    %764 = vector.extract_strided_slice %715 {offsets = [0, 16], sizes = [8, 8], strides = [1, 1]} : vector<8x32xf32> to vector<8x8xf32>
    %765 = vector.extract_strided_slice %723 {offsets = [0, 16], sizes = [8, 8], strides = [1, 1]} : vector<8x32xf32> to vector<8x8xf32>
    %766 = vector.extract_strided_slice %724 {offsets = [0, 16], sizes = [8, 8], strides = [1, 1]} : vector<8x32xf32> to vector<8x8xf32>
    %cst_343 = arith.constant dense<0.000000e+00> : vector<8x8xf32>
    %767 = tpu.matmul %764, %765, %cst_343 {dimension_numbers = #tpu.dot_dimension_numbers<[1], [1], [0], [0], [0, 0, 1, 0], [], []>} : vector<8x8xf32>, vector<8x8xf32>, vector<8x8xf32> -> vector<8x8xf32>
    %cst_344 = arith.constant dense<0xFF800000> : vector<8xf32>
    %768 = vector.multi_reduction <maximumf>, %767, %cst_344 [1] : vector<8x8xf32> to vector<8xf32>
    %769 = vector.shape_cast %768 : vector<8xf32> to vector<8x1xf32>
    %770 = vector.broadcast %769 : vector<8x1xf32> to vector<8x8xf32>
    %771 = arith.subf %767, %770 : vector<8x8xf32>
    %772 = math.exp %771 : vector<8x8xf32>
    %cst_345 = arith.constant dense<0.000000e+00> : vector<8xf32>
    %773 = vector.multi_reduction <add>, %772, %cst_345 [1] : vector<8x8xf32> to vector<8xf32>
    %774 = vector.shape_cast %773 : vector<8xf32> to vector<8x1xf32>
    %775 = tpu.reciprocal %774 {approx = true} : vector<8x1xf32> -> vector<8x1xf32>
    %776 = vector.broadcast %775 : vector<8x1xf32> to vector<8x8xf32>
    %777 = arith.mulf %772, %776 : vector<8x8xf32>
    %cst_346 = arith.constant dense<0.000000e+00> : vector<8x8xf32>
    %778 = tpu.matmul %777, %766, %cst_346 {dimension_numbers = #tpu.dot_dimension_numbers<[1], [0], [0], [1], [0, 0, 1, 1], [], []>} : vector<8x8xf32>, vector<8x8xf32>, vector<8x8xf32> -> vector<8x8xf32>
    %779 = vector.extract_strided_slice %726 {offsets = [16, 0], sizes = [8, 32], strides = [1, 1]} : vector<32x32xf32> to vector<8x32xf32>
    %cst_347 = arith.constant dense<0.000000e+00> : vector<8x32xf32>
    %780 = tpu.matmul %778, %779, %cst_347 {dimension_numbers = #tpu.dot_dimension_numbers<[1], [0], [0], [1], [0, 0, 1, 1], [], []>} : vector<8x8xf32>, vector<8x32xf32>, vector<8x32xf32> -> vector<8x32xf32>
    %781 = arith.addf %763, %780 : vector<8x32xf32>
    %782 = vector.extract_strided_slice %715 {offsets = [0, 24], sizes = [8, 8], strides = [1, 1]} : vector<8x32xf32> to vector<8x8xf32>
    %783 = vector.extract_strided_slice %723 {offsets = [0, 24], sizes = [8, 8], strides = [1, 1]} : vector<8x32xf32> to vector<8x8xf32>
    %784 = vector.extract_strided_slice %724 {offsets = [0, 24], sizes = [8, 8], strides = [1, 1]} : vector<8x32xf32> to vector<8x8xf32>
    %cst_348 = arith.constant dense<0.000000e+00> : vector<8x8xf32>
    %785 = tpu.matmul %782, %783, %cst_348 {dimension_numbers = #tpu.dot_dimension_numbers<[1], [1], [0], [0], [0, 0, 1, 0], [], []>} : vector<8x8xf32>, vector<8x8xf32>, vector<8x8xf32> -> vector<8x8xf32>
    %cst_349 = arith.constant dense<0xFF800000> : vector<8xf32>
    %786 = vector.multi_reduction <maximumf>, %785, %cst_349 [1] : vector<8x8xf32> to vector<8xf32>
    %787 = vector.shape_cast %786 : vector<8xf32> to vector<8x1xf32>
    %788 = vector.broadcast %787 : vector<8x1xf32> to vector<8x8xf32>
    %789 = arith.subf %785, %788 : vector<8x8xf32>
    %790 = math.exp %789 : vector<8x8xf32>
    %cst_350 = arith.constant dense<0.000000e+00> : vector<8xf32>
    %791 = vector.multi_reduction <add>, %790, %cst_350 [1] : vector<8x8xf32> to vector<8xf32>
    %792 = vector.shape_cast %791 : vector<8xf32> to vector<8x1xf32>
    %793 = tpu.reciprocal %792 {approx = true} : vector<8x1xf32> -> vector<8x1xf32>
    %794 = vector.broadcast %793 : vector<8x1xf32> to vector<8x8xf32>
    %795 = arith.mulf %790, %794 : vector<8x8xf32>
    %cst_351 = arith.constant dense<0.000000e+00> : vector<8x8xf32>
    %796 = tpu.matmul %795, %784, %cst_351 {dimension_numbers = #tpu.dot_dimension_numbers<[1], [0], [0], [1], [0, 0, 1, 1], [], []>} : vector<8x8xf32>, vector<8x8xf32>, vector<8x8xf32> -> vector<8x8xf32>
    %797 = vector.extract_strided_slice %726 {offsets = [24, 0], sizes = [8, 32], strides = [1, 1]} : vector<32x32xf32> to vector<8x32xf32>
    %cst_352 = arith.constant dense<0.000000e+00> : vector<8x32xf32>
    %798 = tpu.matmul %796, %797, %cst_352 {dimension_numbers = #tpu.dot_dimension_numbers<[1], [0], [0], [1], [0, 0, 1, 1], [], []>} : vector<8x8xf32>, vector<8x32xf32>, vector<8x32xf32> -> vector<8x32xf32>
    %799 = arith.addf %781, %798 : vector<8x32xf32>
    %800 = vector.broadcast %728 : vector<1x32xf32> to vector<8x32xf32>
    %801 = arith.addf %799, %800 : vector<8x32xf32>
    %802 = arith.addf %708, %801 : vector<8x32xf32>
    %c1_353 = arith.constant 1 : index
    %c0_354 = arith.constant 0 : index
    %c0_355 = arith.constant 0 : index
    %803 = vector.load %arg27[%c1_353, %c0_354, %c0_355] : memref<2x1x32xf32, #tpu.memory_space<vmem>>, vector<1x1x32xf32>
    %804 = vector.shape_cast %803 : vector<1x1x32xf32> to vector<1x32xf32>
    %c1_356 = arith.constant 1 : index
    %c0_357 = arith.constant 0 : index
    %c0_358 = arith.constant 0 : index
    %805 = vector.load %arg28[%c1_356, %c0_357, %c0_358] : memref<2x1x32xf32, #tpu.memory_space<vmem>>, vector<1x1x32xf32>
    %806 = vector.shape_cast %805 : vector<1x1x32xf32> to vector<1x32xf32>
    %cst_359 = arith.constant dense<0.000000e+00> : vector<8xf32>
    %807 = vector.multi_reduction <add>, %802, %cst_359 [1] : vector<8x32xf32> to vector<8xf32>
    %808 = vector.shape_cast %807 : vector<8xf32> to vector<8x1xf32>
    %cst_360 = arith.constant 3.200000e+01 : f32
    %809 = vector.broadcast %cst_360 : f32 to vector<8x1xf32>
    %810 = arith.divf %808, %809 : vector<8x1xf32>
    %811 = vector.broadcast %810 : vector<8x1xf32> to vector<8x32xf32>
    %812 = arith.subf %802, %811 : vector<8x32xf32>
    %813 = arith.mulf %812, %812 : vector<8x32xf32>
    %cst_361 = arith.constant dense<0.000000e+00> : vector<8xf32>
    %814 = vector.multi_reduction <add>, %813, %cst_361 [1] : vector<8x32xf32> to vector<8xf32>
    %815 = vector.shape_cast %814 : vector<8xf32> to vector<8x1xf32>
    %cst_362 = arith.constant 3.200000e+01 : f32
    %816 = vector.broadcast %cst_362 : f32 to vector<8x1xf32>
    %817 = arith.divf %815, %816 : vector<8x1xf32>
    %cst_363 = arith.constant 9.99999974E-6 : f32
    %818 = vector.broadcast %cst_363 : f32 to vector<8x1xf32>
    %819 = arith.addf %817, %818 : vector<8x1xf32>
    %820 = math.rsqrt %819 : vector<8x1xf32>
    %821 = vector.broadcast %820 : vector<8x1xf32> to vector<8x32xf32>
    %822 = arith.mulf %812, %821 : vector<8x32xf32>
    %823 = vector.broadcast %804 : vector<1x32xf32> to vector<8x32xf32>
    %824 = arith.mulf %822, %823 : vector<8x32xf32>
    %825 = vector.broadcast %806 : vector<1x32xf32> to vector<8x32xf32>
    %826 = arith.addf %824, %825 : vector<8x32xf32>
    %c1_364 = arith.constant 1 : index
    %c0_365 = arith.constant 0 : index
    %c0_366 = arith.constant 0 : index
    %827 = vector.load %arg31[%c1_364, %c0_365, %c0_366] : memref<2x32x64xf32, #tpu.memory_space<vmem>>, vector<1x32x64xf32>
    %828 = vector.shape_cast %827 : vector<1x32x64xf32> to vector<32x64xf32>
    %cst_367 = arith.constant dense<0.000000e+00> : vector<8x64xf32>
    %829 = tpu.matmul %826, %828, %cst_367 {dimension_numbers = #tpu.dot_dimension_numbers<[1], [0], [0], [1], [0, 0, 1, 1], [], []>} : vector<8x32xf32>, vector<32x64xf32>, vector<8x64xf32> -> vector<8x64xf32>
    %c1_368 = arith.constant 1 : index
    %c0_369 = arith.constant 0 : index
    %c0_370 = arith.constant 0 : index
    %830 = vector.load %arg32[%c1_368, %c0_369, %c0_370] : memref<2x1x64xf32, #tpu.memory_space<vmem>>, vector<1x1x64xf32>
    %831 = vector.shape_cast %830 : vector<1x1x64xf32> to vector<1x64xf32>
    %832 = vector.broadcast %831 : vector<1x64xf32> to vector<8x64xf32>
    %833 = arith.addf %829, %832 : vector<8x64xf32>
    %c1_371 = arith.constant 1 : index
    %c0_372 = arith.constant 0 : index
    %c0_373 = arith.constant 0 : index
    %834 = vector.load %arg33[%c1_371, %c0_372, %c0_373] : memref<2x64x32xf32, #tpu.memory_space<vmem>>, vector<1x64x32xf32>
    %835 = vector.shape_cast %834 : vector<1x64x32xf32> to vector<64x32xf32>
    %cst_374 = arith.constant dense<0.000000e+00> : vector<8x32xf32>
    %836 = tpu.matmul %833, %835, %cst_374 {dimension_numbers = #tpu.dot_dimension_numbers<[1], [0], [0], [1], [0, 0, 1, 1], [], []>} : vector<8x64xf32>, vector<64x32xf32>, vector<8x32xf32> -> vector<8x32xf32>
    %c1_375 = arith.constant 1 : index
    %c0_376 = arith.constant 0 : index
    %c0_377 = arith.constant 0 : index
    %837 = vector.load %arg34[%c1_375, %c0_376, %c0_377] : memref<2x1x32xf32, #tpu.memory_space<vmem>>, vector<1x1x32xf32>
    %838 = vector.shape_cast %837 : vector<1x1x32xf32> to vector<1x32xf32>
    %839 = vector.broadcast %838 : vector<1x32xf32> to vector<8x32xf32>
    %840 = arith.addf %836, %839 : vector<8x32xf32>
    %841 = arith.addf %826, %840 : vector<8x32xf32>
    %c1_378 = arith.constant 1 : index
    %c0_379 = arith.constant 0 : index
    %c0_380 = arith.constant 0 : index
    %842 = vector.load %arg29[%c1_378, %c0_379, %c0_380] : memref<2x1x32xf32, #tpu.memory_space<vmem>>, vector<1x1x32xf32>
    %843 = vector.shape_cast %842 : vector<1x1x32xf32> to vector<1x32xf32>
    %c1_381 = arith.constant 1 : index
    %c0_382 = arith.constant 0 : index
    %c0_383 = arith.constant 0 : index
    %844 = vector.load %arg30[%c1_381, %c0_382, %c0_383] : memref<2x1x32xf32, #tpu.memory_space<vmem>>, vector<1x1x32xf32>
    %845 = vector.shape_cast %844 : vector<1x1x32xf32> to vector<1x32xf32>
    %cst_384 = arith.constant dense<0.000000e+00> : vector<8xf32>
    %846 = vector.multi_reduction <add>, %841, %cst_384 [1] : vector<8x32xf32> to vector<8xf32>
    %847 = vector.shape_cast %846 : vector<8xf32> to vector<8x1xf32>
    %cst_385 = arith.constant 3.200000e+01 : f32
    %848 = vector.broadcast %cst_385 : f32 to vector<8x1xf32>
    %849 = arith.divf %847, %848 : vector<8x1xf32>
    %850 = vector.broadcast %849 : vector<8x1xf32> to vector<8x32xf32>
    %851 = arith.subf %841, %850 : vector<8x32xf32>
    %852 = arith.mulf %851, %851 : vector<8x32xf32>
    %cst_386 = arith.constant dense<0.000000e+00> : vector<8xf32>
    %853 = vector.multi_reduction <add>, %852, %cst_386 [1] : vector<8x32xf32> to vector<8xf32>
    %854 = vector.shape_cast %853 : vector<8xf32> to vector<8x1xf32>
    %cst_387 = arith.constant 3.200000e+01 : f32
    %855 = vector.broadcast %cst_387 : f32 to vector<8x1xf32>
    %856 = arith.divf %854, %855 : vector<8x1xf32>
    %cst_388 = arith.constant 9.99999974E-6 : f32
    %857 = vector.broadcast %cst_388 : f32 to vector<8x1xf32>
    %858 = arith.addf %856, %857 : vector<8x1xf32>
    %859 = math.rsqrt %858 : vector<8x1xf32>
    %860 = vector.broadcast %859 : vector<8x1xf32> to vector<8x32xf32>
    %861 = arith.mulf %851, %860 : vector<8x32xf32>
    %862 = vector.broadcast %843 : vector<1x32xf32> to vector<8x32xf32>
    %863 = arith.mulf %861, %862 : vector<8x32xf32>
    %864 = vector.broadcast %845 : vector<1x32xf32> to vector<8x32xf32>
    %865 = arith.addf %863, %864 : vector<8x32xf32>
    %c0_389 = arith.constant 0 : index
    %c0_390 = arith.constant 0 : index
    %c0_391 = arith.constant 0 : index
    %866 = vector.load %arg35[%c0_389, %c0_390, %c0_391] : memref<1x8x32xf32, #tpu.memory_space<vmem>>, vector<1x8x32xf32>
    %867 = vector.shape_cast %866 : vector<1x8x32xf32> to vector<8x32xf32>
    %868 = vector.shape_cast %865 : vector<8x32xf32> to vector<1x8x32xf32>
    tpu.vector_store %arg35[%c0_389, %c0_390, %c0_391], %868 {strides = array<i32>} : memref<1x8x32xf32, #tpu.memory_space<vmem>>, vector<1x8x32xf32>,
    return
  }
  func.func @transform_0(%arg0: i32) -> (i32, i32, i32) {
    %c0_i32 = arith.constant 0 : i32
    %c0_i32_0 = arith.constant 0 : i32
    %c0_i32_1 = arith.constant 0 : i32
    return %arg0, %c0_i32, %c0_i32_0 : i32, i32, i32
  }
  func.func @transform_1(%arg0: i32) -> (i32, i32, i32) {
    %c0_i32 = arith.constant 0 : i32
    %c0_i32_0 = arith.constant 0 : i32
    %c0_i32_1 = arith.constant 0 : i32
    return %arg0, %c0_i32, %c0_i32_0 : i32, i32, i32
  }
  func.func @transform_2(%arg0: i32) -> (i32, i32, i32) {
    %c0_i32 = arith.constant 0 : i32
    %c0_i32_0 = arith.constant 0 : i32
    %c0_i32_1 = arith.constant 0 : i32
    %c0_i32_2 = arith.constant 0 : i32
    return %c0_i32, %c0_i32_0, %c0_i32_1 : i32, i32, i32
  }
  func.func @transform_3(%arg0: i32) -> (i32, i32, i32) {
    %c0_i32 = arith.constant 0 : i32
    %c0_i32_0 = arith.constant 0 : i32
    %c0_i32_1 = arith.constant 0 : i32
    %c0_i32_2 = arith.constant 0 : i32
    return %c0_i32, %c0_i32_0, %c0_i32_1 : i32, i32, i32
  }
  func.func @transform_4(%arg0: i32) -> (i32, i32, i32) {
    %c0_i32 = arith.constant 0 : i32
    %c0_i32_0 = arith.constant 0 : i32
    %c0_i32_1 = arith.constant 0 : i32
    %c0_i32_2 = arith.constant 0 : i32
    return %c0_i32, %c0_i32_0, %c0_i32_1 : i32, i32, i32
  }
  func.func @transform_5(%arg0: i32) -> (i32, i32, i32) {
    %c0_i32 = arith.constant 0 : i32
    %c0_i32_0 = arith.constant 0 : i32
    %c0_i32_1 = arith.constant 0 : i32
    %c0_i32_2 = arith.constant 0 : i32
    return %c0_i32, %c0_i32_0, %c0_i32_1 : i32, i32, i32
  }
  func.func @transform_6(%arg0: i32) -> (i32, i32, i32) {
    %c0_i32 = arith.constant 0 : i32
    %c0_i32_0 = arith.constant 0 : i32
    %c0_i32_1 = arith.constant 0 : i32
    %c0_i32_2 = arith.constant 0 : i32
    return %c0_i32, %c0_i32_0, %c0_i32_1 : i32, i32, i32
  }
  func.func @transform_7(%arg0: i32) -> (i32, i32, i32) {
    %c0_i32 = arith.constant 0 : i32
    %c0_i32_0 = arith.constant 0 : i32
    %c0_i32_1 = arith.constant 0 : i32
    %c0_i32_2 = arith.constant 0 : i32
    return %c0_i32, %c0_i32_0, %c0_i32_1 : i32, i32, i32
  }
  func.func @transform_8(%arg0: i32) -> (i32, i32, i32) {
    %c0_i32 = arith.constant 0 : i32
    %c0_i32_0 = arith.constant 0 : i32
    %c0_i32_1 = arith.constant 0 : i32
    %c0_i32_2 = arith.constant 0 : i32
    return %c0_i32, %c0_i32_0, %c0_i32_1 : i32, i32, i32
  }
  func.func @transform_9(%arg0: i32) -> (i32, i32, i32) {
    %c0_i32 = arith.constant 0 : i32
    %c0_i32_0 = arith.constant 0 : i32
    %c0_i32_1 = arith.constant 0 : i32
    %c0_i32_2 = arith.constant 0 : i32
    return %c0_i32, %c0_i32_0, %c0_i32_1 : i32, i32, i32
  }
  func.func @transform_10(%arg0: i32) -> (i32, i32, i32) {
    %c0_i32 = arith.constant 0 : i32
    %c0_i32_0 = arith.constant 0 : i32
    %c0_i32_1 = arith.constant 0 : i32
    %c0_i32_2 = arith.constant 0 : i32
    return %c0_i32, %c0_i32_0, %c0_i32_1 : i32, i32, i32
  }
  func.func @transform_11(%arg0: i32) -> (i32, i32, i32) {
    %c0_i32 = arith.constant 0 : i32
    %c0_i32_0 = arith.constant 0 : i32
    %c0_i32_1 = arith.constant 0 : i32
    %c0_i32_2 = arith.constant 0 : i32
    return %c0_i32, %c0_i32_0, %c0_i32_1 : i32, i32, i32
  }
  func.func @transform_12(%arg0: i32) -> (i32, i32, i32) {
    %c0_i32 = arith.constant 0 : i32
    %c0_i32_0 = arith.constant 0 : i32
    %c0_i32_1 = arith.constant 0 : i32
    %c0_i32_2 = arith.constant 0 : i32
    return %c0_i32, %c0_i32_0, %c0_i32_1 : i32, i32, i32
  }
  func.func @transform_13(%arg0: i32) -> (i32, i32, i32) {
    %c0_i32 = arith.constant 0 : i32
    %c0_i32_0 = arith.constant 0 : i32
    %c0_i32_1 = arith.constant 0 : i32
    %c0_i32_2 = arith.constant 0 : i32
    return %c0_i32, %c0_i32_0, %c0_i32_1 : i32, i32, i32
  }
  func.func @transform_14(%arg0: i32) -> (i32, i32, i32) {
    %c0_i32 = arith.constant 0 : i32
    %c0_i32_0 = arith.constant 0 : i32
    %c0_i32_1 = arith.constant 0 : i32
    %c0_i32_2 = arith.constant 0 : i32
    return %c0_i32, %c0_i32_0, %c0_i32_1 : i32, i32, i32
  }
  func.func @transform_15(%arg0: i32) -> (i32, i32, i32) {
    %c0_i32 = arith.constant 0 : i32
    %c0_i32_0 = arith.constant 0 : i32
    %c0_i32_1 = arith.constant 0 : i32
    %c0_i32_2 = arith.constant 0 : i32
    return %c0_i32, %c0_i32_0, %c0_i32_1 : i32, i32, i32
  }
  func.func @transform_16(%arg0: i32) -> (i32, i32, i32) {
    %c0_i32 = arith.constant 0 : i32
    %c0_i32_0 = arith.constant 0 : i32
    %c0_i32_1 = arith.constant 0 : i32
    %c0_i32_2 = arith.constant 0 : i32
    return %c0_i32, %c0_i32_0, %c0_i32_1 : i32, i32, i32
  }
  func.func @transform_17(%arg0: i32) -> (i32, i32, i32) {
    %c0_i32 = arith.constant 0 : i32
    %c0_i32_0 = arith.constant 0 : i32
    %c0_i32_1 = arith.constant 0 : i32
    %c0_i32_2 = arith.constant 0 : i32
    return %c0_i32, %c0_i32_0, %c0_i32_1 : i32, i32, i32
  }
  func.func @transform_18(%arg0: i32) -> (i32, i32, i32) {
    %c0_i32 = arith.constant 0 : i32
    %c0_i32_0 = arith.constant 0 : i32
    %c0_i32_1 = arith.constant 0 : i32
    %c0_i32_2 = arith.constant 0 : i32
    return %c0_i32, %c0_i32_0, %c0_i32_1 : i32, i32, i32
  }
  func.func @transform_19(%arg0: i32) -> (i32, i32, i32) {
    %c0_i32 = arith.constant 0 : i32
    %c0_i32_0 = arith.constant 0 : i32
    %c0_i32_1 = arith.constant 0 : i32
    %c0_i32_2 = arith.constant 0 : i32
    return %c0_i32, %c0_i32_0, %c0_i32_1 : i32, i32, i32
  }
  func.func @transform_20(%arg0: i32) -> (i32, i32, i32) {
    %c0_i32 = arith.constant 0 : i32
    %c0_i32_0 = arith.constant 0 : i32
    %c0_i32_1 = arith.constant 0 : i32
    %c0_i32_2 = arith.constant 0 : i32
    return %c0_i32, %c0_i32_0, %c0_i32_1 : i32, i32, i32
  }
  func.func @transform_21(%arg0: i32) -> (i32, i32, i32) {
    %c0_i32 = arith.constant 0 : i32
    %c0_i32_0 = arith.constant 0 : i32
    %c0_i32_1 = arith.constant 0 : i32
    %c0_i32_2 = arith.constant 0 : i32
    return %c0_i32, %c0_i32_0, %c0_i32_1 : i32, i32, i32
  }
  func.func @transform_22(%arg0: i32) -> (i32, i32, i32) {
    %c0_i32 = arith.constant 0 : i32
    %c0_i32_0 = arith.constant 0 : i32
    %c0_i32_1 = arith.constant 0 : i32
    %c0_i32_2 = arith.constant 0 : i32
    return %c0_i32, %c0_i32_0, %c0_i32_1 : i32, i32, i32
  }
  func.func @transform_23(%arg0: i32) -> (i32, i32, i32) {
    %c0_i32 = arith.constant 0 : i32
    %c0_i32_0 = arith.constant 0 : i32
    %c0_i32_1 = arith.constant 0 : i32
    %c0_i32_2 = arith.constant 0 : i32
    return %c0_i32, %c0_i32_0, %c0_i32_1 : i32, i32, i32
  }
  func.func @transform_24(%arg0: i32) -> (i32, i32, i32) {
    %c0_i32 = arith.constant 0 : i32
    %c0_i32_0 = arith.constant 0 : i32
    %c0_i32_1 = arith.constant 0 : i32
    %c0_i32_2 = arith.constant 0 : i32
    return %c0_i32, %c0_i32_0, %c0_i32_1 : i32, i32, i32
  }
  func.func @transform_25(%arg0: i32) -> (i32, i32, i32) {
    %c0_i32 = arith.constant 0 : i32
    %c0_i32_0 = arith.constant 0 : i32
    %c0_i32_1 = arith.constant 0 : i32
    %c0_i32_2 = arith.constant 0 : i32
    return %c0_i32, %c0_i32_0, %c0_i32_1 : i32, i32, i32
  }
  func.func @transform_26(%arg0: i32) -> (i32, i32, i32) {
    %c0_i32 = arith.constant 0 : i32
    %c0_i32_0 = arith.constant 0 : i32
    %c0_i32_1 = arith.constant 0 : i32
    %c0_i32_2 = arith.constant 0 : i32
    return %c0_i32, %c0_i32_0, %c0_i32_1 : i32, i32, i32
  }
  func.func @transform_27(%arg0: i32) -> (i32, i32, i32) {
    %c0_i32 = arith.constant 0 : i32
    %c0_i32_0 = arith.constant 0 : i32
    %c0_i32_1 = arith.constant 0 : i32
    %c0_i32_2 = arith.constant 0 : i32
    return %c0_i32, %c0_i32_0, %c0_i32_1 : i32, i32, i32
  }
  func.func @transform_28(%arg0: i32) -> (i32, i32, i32) {
    %c0_i32 = arith.constant 0 : i32
    %c0_i32_0 = arith.constant 0 : i32
    %c0_i32_1 = arith.constant 0 : i32
    %c0_i32_2 = arith.constant 0 : i32
    return %c0_i32, %c0_i32_0, %c0_i32_1 : i32, i32, i32
  }
  func.func @transform_29(%arg0: i32) -> (i32, i32, i32) {
    %c0_i32 = arith.constant 0 : i32
    %c0_i32_0 = arith.constant 0 : i32
    %c0_i32_1 = arith.constant 0 : i32
    %c0_i32_2 = arith.constant 0 : i32
    return %c0_i32, %c0_i32_0, %c0_i32_1 : i32, i32, i32
  }
  func.func @transform_30(%arg0: i32) -> (i32, i32, i32) {
    %c0_i32 = arith.constant 0 : i32
    %c0_i32_0 = arith.constant 0 : i32
    %c0_i32_1 = arith.constant 0 : i32
    %c0_i32_2 = arith.constant 0 : i32
    return %c0_i32, %c0_i32_0, %c0_i32_1 : i32, i32, i32
  }
  func.func @transform_31(%arg0: i32) -> (i32, i32, i32) {
    %c0_i32 = arith.constant 0 : i32
    %c0_i32_0 = arith.constant 0 : i32
    %c0_i32_1 = arith.constant 0 : i32
    %c0_i32_2 = arith.constant 0 : i32
    return %c0_i32, %c0_i32_0, %c0_i32_1 : i32, i32, i32
  }
  func.func @transform_32(%arg0: i32) -> (i32, i32, i32) {
    %c0_i32 = arith.constant 0 : i32
    %c0_i32_0 = arith.constant 0 : i32
    %c0_i32_1 = arith.constant 0 : i32
    %c0_i32_2 = arith.constant 0 : i32
    return %c0_i32, %c0_i32_0, %c0_i32_1 : i32, i32, i32
  }
  func.func @transform_33(%arg0: i32) -> (i32, i32, i32) {
    %c0_i32 = arith.constant 0 : i32
    %c0_i32_0 = arith.constant 0 : i32
    %c0_i32_1 = arith.constant 0 : i32
    %c0_i32_2 = arith.constant 0 : i32
    return %c0_i32, %c0_i32_0, %c0_i32_1 : i32, i32, i32
  }
  func.func @transform_34(%arg0: i32) -> (i32, i32, i32) {
    %c0_i32 = arith.constant 0 : i32
    %c0_i32_0 = arith.constant 0 : i32
    %c0_i32_1 = arith.constant 0 : i32
    return %arg0, %c0_i32, %c0_i32_0 : i32, i32, i32
  }
}

</mosaic_0001>

<bundles_post_ra>
// kernel: transformer_forward.1
= control target key start
LH: loop header
LB: loop body
LE: loop exit
PB: predicated region body
PF: predicated region fallthrough
CT: control target
= control target key end

     0   :  { %s9996_s6 = smov 1   ;;  %s9997_s10 = smov 2   ;;  %s11068_s0 = inlined_call_operand.smem [shape: u32[35], index: -1, kind: input, shape index: {}] }
   0x1   :  { %s10052_s5 = sld [smem:[%s11068_s0]]   ;;  %s9998_s14 = smov 3  }
   0x2   :  { %s10057_s9 = sld [smem:[%s11068_s0 + %s9996_s6]]   ;;  %s9999_s18 = smov 4  }
   0x3   :  { %s10062_s13 = sld [smem:[%s11068_s0 + %s9997_s10]]   ;;  %s10000_s22 = smov 5  }
   0x4   :  { %s10067_s17 = sld [smem:[%s11068_s0 + %s9998_s14]]   ;;  %s10001_s26 = smov 6  }
   0x5   :  { %s10072_s21 = sld [smem:[%s11068_s0 + %s9999_s18]]   ;;  %s10002_s30 = smov 7  }
   0x6   :  { %s10077_s25 = sld [smem:[%s11068_s0 + %s10000_s22]]   ;;  %s10003_s4 = smov 8  }
   0x7   :  { %11118 = sst [smem:[#allocation2_spill]] %s10052_s5  ;;  %s10004_s10 = smov 9  }
   0x8   :  { %11119 = sst [smem:[#allocation3_spill]] %s10057_s9  ;;  %s10005_s15 = smov 10  }
   0x9   :  { %11120 = sst [smem:[#allocation4_spill]] %s10062_s13  ;;  %s10006_s20 = smov 11  }
   0xa   :  { %11121 = sst [smem:[#allocation5_spill]] %s10067_s17  ;;  %s10008_s1 = smov 13  }
   0xb   :  { %11122 = sst [smem:[#allocation6_spill]] %s10072_s21  ;;  %s10009_s7 = smov 14  }
   0xc   :  { %11123 = sst [smem:[#allocation7_spill]] %s10077_s25  ;;  %s10011_s22 = smov 16  }
   0xd   :  { %s10082_s29 = sld [smem:[%s11068_s0 + %s10001_s26]]   ;;  %s10007_s26 = smov 12  }
   0xe   :  { %s10087_s3 = sld [smem:[%s11068_s0 + %s10002_s30]]   ;;  %s10012_s28 = smov 17  }
   0xf   :  { %s10092_s8 = sld [smem:[%s11068_s0 + %s10003_s4]]  }
  0x10   :  { %s10097_s14 = sld [smem:[%s11068_s0 + %s10004_s10]]  }
  0x11   :  { %s10102_s19 = sld [smem:[%s11068_s0 + %s10005_s15]]   ;;  %s10010_s15 = smov 15  }
  0x12   :  { %s10107_s24 = sld [smem:[%s11068_s0 + %s10006_s20]]  }
  0x13   :  { %11124 = sst [smem:[#allocation8_spill]] %s10082_s29 }
  0x14   :  { %11125 = sst [smem:[#allocation9_spill]] %s10087_s3 }
  0x15   :  { %11126 = sst [smem:[#allocation10_spill]] %s10092_s8 }
  0x16   :  { %11127 = sst [smem:[#allocation11_spill]] %s10097_s14 }
  0x17   :  { %11128 = sst [smem:[#allocation12_spill]] %s10102_s19 }
  0x18   :  { %11129 = sst [smem:[#allocation13_spill]] %s10107_s24 }
  0x19   :  { %s10112_s30 = sld [smem:[%s11068_s0 + %s10007_s26]]  }
  0x1a   :  { %s10117_s6 = sld [smem:[%s11068_s0 + %s10008_s1]]  }
  0x1b   :  { %s10122_s12 = sld [smem:[%s11068_s0 + %s10009_s7]]   ;;  %s10013_s7 = smov 18  }
  0x1c   :  { %s10127_s20 = sld [smem:[%s11068_s0 + %s10010_s15]]   ;;  %s10014_s15 = smov 19  }
  0x1d   :  { %s10132_s27 = sld [smem:[%s11068_s0 + %s10011_s22]]   ;;  %s10015_s22 = smov 20  }
  0x1e   :  { %s10137_s4 = sld [smem:[%s11068_s0 + %s10012_s28]]   ;;  %s10016_s28 = smov 21  }
  0x1f   :  { %11130 = sst [smem:[#allocation14_spill]] %s10112_s30 }
  0x20   :  { %11131 = sst [smem:[#allocation15_spill]] %s10117_s6 }
  0x21   :  { %s10142_s9 = sld [smem:[%s11068_s0 + %s10013_s7]]   ;;  %s10017_s7 = smov 22  }
  0x22   :  { %11132 = sst [smem:[#allocation16_spill]] %s10127_s20 }
  0x23   :  { %11133 = sst [smem:[#allocation17_spill]] %s10132_s27 }
  0x24   :  { %11134 = sst [smem:[#allocation18_spill]] %s10137_s4 }
  0x25   :  { %s10147_s20 = sld [smem:[%s11068_s0 + %s10014_s15]]   ;;  %s10018_s15 = smov 23  }
  0x26   :  { %s10152_s27 = sld [smem:[%s11068_s0 + %s10015_s22]]   ;;  %s10019_s22 = smov 24  }
  0x27   :  { %11135 = sst [smem:[#allocation19_spill]] %s10142_s9 }
  0x28   :  { %s10157_s4 = sld [smem:[%s11068_s0 + %s10016_s28]]   ;;  %s10020_s28 = smov 25  }
  0x29   :  { %s10162_s9 = sld [smem:[%s11068_s0 + %s10017_s7]]   ;;  %s10021_s7 = smov 26  }
  0x2b   :  { %11136 = sst [smem:[#allocation20_spill]] %s10147_s20 }
  0x2c   :  { %11137 = sst [smem:[#allocation21_spill]] %s10152_s27 }
  0x2d   :  { %s10167_s20 = sld [smem:[%s11068_s0 + %s10018_s15]]   ;;  %s10022_s15 = smov 27  }
  0x2e   :  { %11138 = sst [smem:[#allocation22_spill]] %s10157_s4 }
  0x2f   :  { %11139 = sst [smem:[#allocation23_spill]] %s10162_s9 }
  0x30   :  { %s10172_s27 = sld [smem:[%s11068_s0 + %s10019_s22]]   ;;  %s10023_s22 = smov 28  }
  0x31   :  { %s10177_s4 = sld [smem:[%s11068_s0 + %s10020_s28]]   ;;  %s10024_s28 = smov 29  }
  0x32   :  { %s10182_s9 = sld [smem:[%s11068_s0 + %s10021_s7]]   ;;  %s10025_s7 = smov 30  }
  0x33   :  { %11140 = sst [smem:[#allocation24_spill]] %s10167_s20 }
  0x34   :  { %s10187_s20 = sld [smem:[%s11068_s0 + %s10022_s15]]   ;;  %s10026_s15 = smov 31  }
  0x36   :  { %11141 = sst [smem:[#allocation25_spill]] %s10172_s27 }
  0x37   :  { %11142 = sst [smem:[#allocation26_spill]] %s10177_s4 }
  0x38   :  { %11143 = sst [smem:[#allocation27_spill]] %s10182_s9 }
  0x39   :  { %s10192_s27 = sld [smem:[%s11068_s0 + %s10023_s22]]   ;;  %s10027_s22 = smov 32  }
  0x3a   :  { %11144 = sst [smem:[#allocation28_spill]] %s10187_s20 }
  0x3b   :  { %s10197_s4 = sld [smem:[%s11068_s0 + %s10024_s28]]   ;;  %s10028_s28 = smov 33  }
  0x3c   :  { %s10202_s9 = sld [smem:[%s11068_s0 + %s10025_s7]]   ;;  %s10029_s7 = smov 34  }
  0x3d   :  { %s10207_s20 = sld [smem:[%s11068_s0 + %s10026_s15]]   ;;  %s10224_s15 = smov 0  }
  0x3f   :  { %11145 = sst [smem:[#allocation29_spill]] %s10192_s27 }
  0x40   :  { %s10212_s27 = sld [smem:[%s11068_s0 + %s10027_s22]]  }
  0x41   :  { %11146 = sst [smem:[#allocation30_spill]] %s10197_s4 }
  0x42   :  { %11147 = sst [smem:[#allocation31_spill]] %s10202_s9 }
  0x43   :  { %s10217_s4 = sld [smem:[%s11068_s0 + %s10028_s28]]  }
  0x44   :  { %s10222_s9 = sld [smem:[%s11068_s0 + %s10029_s7]]  }
  0x4a   :  { %11148 = sst [smem:[#allocation32_spill]] %s10222_s9 }
  0x4b LB: > { %s11149_s30 = sld [smem:[#allocation14_spill]]  ;;  %s11150_s29 = sld [smem:[#allocation8_spill]]  ;;  %s9994_s15 = sphi %s10224_s15, %s79_s15  }
  0x4c   : > { %s11151_s25 = sld [smem:[#allocation7_spill]]  ;;  %s11152_s24 = sld [smem:[#allocation13_spill]] }
  0x4d   : > { %s11153_s21 = sld [smem:[#allocation6_spill]]  ;;  %s11154_s19 = sld [smem:[#allocation12_spill]] }
  0x4e   : > { %s11155_s17 = sld [smem:[#allocation5_spill]]  ;;  %s11156_s14 = sld [smem:[#allocation11_spill]] }
  0x4f   : > { %s11157_s13 = sld [smem:[#allocation4_spill]]  ;;  %s11158_s8 = sld [smem:[#allocation10_spill]] }
  0x50   : > { %s11159_s6 = sld [smem:[#allocation15_spill]]  ;;  %s11160_s3 = sld [smem:[#allocation9_spill]] }
  0x51   : > { %11161 = sst [smem:[#allocation33_spill]] %s9994_s15  ;;  %s8651_s16 = sadd.s32 4294967295, %s9994_s15  }
  0x52   : > { %p8655_p0 = scmp.ge.s32.totalorder %s9994_s15, 1  ;;  %p955_p1 = scmp.lt.s32.totalorder %s9994_s15, 3 }
  0x54   : > { %p956_p2 = pnand %p8655_p0, %p955_p1 }
  0x55   : > { %v1056_v0 = vld [vmem:[%s11157_s13] sm:$0xff] (!%p956_p2)  ;;  %v1057_v1 = vld [vmem:[%s11157_s13 + $0x8] sm:$0xff] (!%p956_p2)  ;;  %v1058_v2 = vld [vmem:[%s11157_s13 + $0x10] sm:$0xff] (!%p956_p2)  ;;  %s11162_s5 = sld [smem:[#allocation2_spill]] (!%p956_p2)  ;;  %v10030_v3 = vmov (!%p956_p2), 0.0|0.0   ;;  %vm10031_vm0 = vmmov (!%p956_p2), 0  }
  0x56   : > { %959 = sbr.rel (%p956_p2) target bundleno = 19589 (0x4c85), region = 156  ;;  %9696 = vmatprep.subr.bf16.mxu0 (!%p956_p2), %v10030_v3  ;;  %v9697_v4 = vpack.c.bf16 (!%p956_p2), %v1057_v1, %v1056_v0  ;;  %v1059_v5 = vld [vmem:[%s11157_s13 + $0x18] sm:$0xff] (!%p956_p2)  ;;  %v10032_v6 = vmov (!%p956_p2), 0.0   ;;  %p1043_p3 = scmp.lt.s32.totalorder (!%p956_p2), %s8651_s16, 1  ;;  %vm1067_vm1 = vcmask (!%p956_p2), 261120   ;;  %vm1149_vm2 = vcmask (!%p956_p2), 64512  }
  0x57   : > { %9136 = vmatprep.mubr.msk.f32.mxu0 (!%p956_p2), %vm10031_vm0, %v10032_v6  ;;  %9144 = vmatprep.subr.mxu1 (!%p956_p2), %v10032_v6  ;;  %v9700_v7 = vpack.c.bf16 (!%p956_p2), %v1059_v5, %v1058_v2  ;;  %v8659_v9 = vld [vmem:[%s11155_s17] ss:$0 sm:$0xff] (!%p956_p2)  ;;  %s11103_s22 = smov (!%p956_p2), 120   ;;  %s11099_s23 = smov (!%p956_p2), 96   ;;  %v1142_v32 = vld [vmem:[%s11153_s21 + $0x8] sm:$0xff] (!%p956_p2)  ;;  %vm2237_vm3 = vcmask (!%p956_p2), 523264  }
  0x58   : > { %9146 = vmatprep.mubr.msk.f32.mxu1 (!%p956_p2), %vm10031_vm0, %v10032_v6  ;;  %9698 = vmatpush3.bf16.msra.mxu0 (!%p956_p2), %v9697_v4  ;;  %s11101_s26 = smov (!%p956_p2), 88   ;;  %s11092_s28 = smov (!%p956_p2), 56   ;;  %v1141_v41 = vld [vmem:[%s11153_s21] sm:$0xff] (!%p956_p2)  ;;  %v1143_v4 = vld [vmem:[%s11153_s21 + $0x10] sm:$0xff] (!%p956_p2) }
  0x59   : > { %9699 = vmatprep.subr.bf16.mxu0 (!%p956_p2), %v10030_v3  ;;  %s11091_s1 = smov (!%p956_p2), 64   ;;  %s11095_s2 = smov (!%p956_p2), 80  }
  0x5a   : > { %s11097_s7 = smov (!%p956_p2), 112   ;;  %s11093_s10 = smov (!%p956_p2), 72  }
  0x5b   : > { %s11089_s11 = smov (!%p956_p2), 104   ;;  %s11190_s15 = sld [smem:[#allocation30_spill]] (!%p956_p2) }
  0x5c   : > { %9701 = vmatpush3.bf16.msra.mxu0 (!%p956_p2), %v9700_v7 }
  0x5d   : > { %s11197_s16 = smov (!%p1043_p3, %s8651_s16), 1  ;;  %9139 = vmatprep.subr.mxu0 %v10032_v6 }
  0x5e   : > { %s10243_s0 = sshll.u32 %s11197_s16, 3  ;;  %s11087_s16 = smov 48  }
  0x5f   : > { %s1046_s18 = scalar_lea.vmem %s11162_s5, %s10243_s0  ;;  %s11178_s5 = smov 120  }
  0x60   : > { %v10247_v8 = vld [vmem:[%s1046_s18] sm:$0xff]  ;;  %s11085_s18 = smov 40  }
  0x61   : > { %9137 = vmatmul.mubr.msk.f32.vlgmr.msra.gmra.mrb[0].mxu0 %vm1067_vm1, %v10247_v8  ;;  %s11191_s9 = smov %s11190_s15 }
  0x62   : > { %9141 = vmatprep.mubr.msk.f32.mxu0 %vm10031_vm0, %v10032_v6 }
 0x134   : > { %v1137_v10 = vpop.f32.mrb[0].mxu0 }
 0x135   : > { %v10255_v11 = vadd.f32 %v8659_v9, %v1137_v10  ;;  %v9138_v12 = vpop.f32.mrb[1].mxu0 }
 0x137   : > { %1311 = vrot.lane.b32.xlu1 %v10255_v11, %s11103_s22  ;;  %1147 = vrot.lane.b32.xlu0 %v10255_v11, %s11099_s23 }
 0x13b   : > { %1313 = vrot.lane.b32.xlu0 %v10255_v11, %s11101_s26 }
 0x1a9   : > { %v1148_v13 = vpop.permute.xlu0 %1147  ;;  %v1312_v15 = vpop.permute.xlu1 %1311 }
 0x1aa   : > { %9140 = vmatpush3.xpose.msk.msra.mxu0 %vm1149_vm2, %v1148_v13 }
 0x1ab   : > { %9149 = vmatprep.subr.mxu0 %v10032_v6 }
 0x1ad   : > { %9142 = vmatmul.mubr.msk.f32.vlgmr.msra.gmra.mrb[2].mxu0 %vm1149_vm2, %v10255_v11  ;;  %v1314_v14 = vpop.permute.xlu0 %1313 }
 0x1ae   : > { %9150 = vmatpush3.xpose.msk.msra.mxu0 %vm1149_vm2, %v1314_v14  ;;  %9151 = vmatprep.mubr.msk.f32.mxu0 %vm10031_vm0, %v10032_v6 }
 0x1af   : > { %9159 = vmatprep.subr.mxu0 %v10032_v6 }
 0x1b1   : > { %9152 = vmatmul.mubr.msk.f32.vlgmr.msra.gmra.mrb[4].mxu0 %vm1149_vm2, %v1312_v15 }
 0x1b2   : > { %9161 = vmatprep.mubr.msk.f32.mxu0 %vm10031_vm0, %v10032_v6  ;;  %9160 = vmatpush3.msra.mxu0 %v1142_v32 }
 0x1b3   : > { %9169 = vmatprep.subr.mxu0 %v10032_v6 }
 0x280   : > { %v1220_v16 = vpop.f32.mrb[2].mxu0 }
 0x281   : > { %v9143_v17 = vpop.f32.mrb[3].mxu0  ;;  %v1224_v18 = vsel %vm1149_vm2, %v1220_v16, -inf }
 0x282   : > { %1225 = vmax.xlane.f32.xlu1 %v1224_v18 }
 0x284   : > { %v1385_v19 = vpop.f32.mrb[4].mxu0 }
 0x285   : > { %v9153_v20 = vpop.f32.mrb[5].mxu0  ;;  %v1389_v21 = vsel %vm1149_vm2, %v1385_v19, -inf }
 0x286   : > { %1390 = vmax.xlane.f32.xlu0 %v1389_v21 }
 0x30f   : > { %v1226_v22 = vpop.xlane.xlu1 %1225 }
 0x310   : > { %v1227_v23 = vsub.f32 %v1220_v16, %v1226_v22 }
 0x312   : > { %v1228_v24 = vmul.f32 1.442695, %v1227_v23 }
 0x313   : > { %v1391_v25 = vpop.xlane.xlu0 %1390 }
 0x314   : > { %9872 = vpow2.f32 %v1228_v24  ;;  %v1392_v26 = vsub.f32 %v1385_v19, %v1391_v25  ;;  %v1144_v19 = vld [vmem:[%s11153_s21 + $0x18] sm:$0xff] }
 0x316   : > { %v1393_v27 = vmul.f32 1.442695, %v1392_v26 }
 0x318   : > { %9874 = vpow2.f32 %v1393_v27  ;;  %v8677_v27 = vld [vmem:[%s11151_s25] ss:$0 sm:$0xff] }
 0x31e   : > { %v9873_v28 = vpop.eup %9872 }
 0x31f   : > { %v1230_v29 = vsel %vm1149_vm2, %v9873_v28, 0.0 }
 0x320   : > { %1231 = vadd.xlane.f32.xlu0 %v1230_v29 }
 0x322   : > { %v9875_v30 = vpop.eup %9874 }
 0x323   : > { %v1395_v31 = vsel %vm1149_vm2, %v9875_v30, 0.0 }
 0x324   : > { %1396 = vadd.xlane.f32.xlu1 %v1395_v31 }
 0x335   : > { %1400 = vrot.lane.b32.xlu1 %v10255_v11, %s11092_s28 }
 0x336   : > { %1235 = vrot.lane.b32.xlu0 %v10255_v11, %s11091_s1 }
 0x339   : > { %1624 = vrot.lane.b32.xlu1 %v10255_v11, %s11095_s2 }
 0x33a   : > { %1622 = vrot.lane.b32.xlu0 %v10255_v11, %s11097_s7 }
 0x3ad   : > { %v1232_v33 = vpop.xlane.xlu0 %1231 }
 0x3ae   : > { %9876 = vrcp.f32 %v1232_v33 }
 0x3b1   : > { %v1397_v34 = vpop.xlane.xlu1 %1396  ;;  %v1236_v35 = vpop.permute.xlu0 %1235 }
 0x3b2   : > { %9878 = vrcp.f32 %v1397_v34  ;;  %9145 = vmatpush3.msra.mxu1 %v1236_v35 }
 0x3b3   : > { %9154 = vmatprep.subr.mxu1 %v10032_v6 }
 0x3b5   : > { %v1401_v38 = vpop.permute.xlu1 %1400  ;;  %v1623_v47 = vpop.permute.xlu0 %1622 }
 0x3b8   : > { %v9877_v36 = vpop.eup %9876 }
 0x3b9   : > { %v1234_v37 = vmul.f32 %v9877_v36, %v9873_v28  ;;  %v1625_v45 = vpop.permute.xlu1 %1624 }
 0x3bb   : > { %9147 = vmatmul.mubr.msk.f32.vlgmr.msra.gmra.mrb[0].mxu1 %vm1149_vm2, %v1234_v37 }
 0x3bc   : > { %v9879_v39 = vpop.eup %9878  ;;  %9155 = vmatpush3.msra.mxu1 %v1401_v38  ;;  %9156 = vmatprep.mubr.msk.f32.mxu1 %vm10031_vm0, %v10032_v6 }
 0x3bd   : > { %v1399_v40 = vmul.f32 %v9879_v39, %v9875_v30  ;;  %9164 = vmatprep.subr.mxu1 %v10032_v6  ;;  %v2138_v39 = vld [vmem:[%s11158_s8] sm:$0xff] }
 0x3bf   : > { %9157 = vmatmul.mubr.msk.f32.vlgmr.msra.gmra.mrb[2].mxu1 %vm1149_vm2, %v1399_v40  ;;  %v2139_v40 = vld [vmem:[%s11158_s8 + $0x8] sm:$0xff] }
 0x3c0   : > { %9166 = vmatprep.mubr.msk.f32.mxu1 %vm10031_vm0, %v10032_v6  ;;  %9165 = vmatpush3.msra.mxu1 %v1141_v41  ;;  %v9703_v41 = vpack.c.bf16 %v2139_v40, %v2138_v39 }
 0x3c1   : > { %9174 = vmatprep.subr.mxu1 %v10032_v6 }
 0x48e   : > { %v1307_v42 = vpop.f32.mrb[0].mxu1 }
 0x48f   : > { %v9148_v43 = vpop.f32.mrb[1].mxu1  ;;  %9167 = vmatmul.mubr.msk.f32.vlgmr.msra.gmra.mrb[4].mxu1 %vm1149_vm2, %v1307_v42  ;;  %v2141_v42 = vld [vmem:[%s11158_s8 + $0x18] sm:$0xff] }
 0x490   : > { %9176 = vmatprep.mubr.msk.f32.mxu1 %vm10031_vm0, %v10032_v6 }
 0x492   : > { %v1472_v44 = vpop.f32.mrb[2].mxu1 }
 0x493   : > { %v9158_v46 = vpop.f32.mrb[3].mxu1  ;;  %9162 = vmatmul.mubr.msk.f32.vlgmr.msra.gmra.mrb[6].mxu0 %vm1149_vm2, %v1472_v44  ;;  %v2222_v44 = vld [vmem:[%s11154_s19] sm:$0xff] }
 0x494   : > { %9170 = vmatpush3.xpose.msk.msra.mxu0 %vm1149_vm2, %v1625_v45  ;;  %9171 = vmatprep.mubr.msk.f32.mxu0 %vm10031_vm0, %v10032_v6  ;;  %v2223_v45 = vld [vmem:[%s11154_s19 + $0x8] sm:$0xff]  ;;  %v2224_v46 = vld [vmem:[%s11154_s19 + $0x10] sm:$0xff] }
 0x495   : > { %9179 = vmatprep.subr.mxu0 %v10032_v6 }
 0x497   : > { %9172 = vmatmul.mubr.msk.f32.vlgmr.msra.gmra.mrb[8].mxu0 %vm1149_vm2, %v1623_v47  ;;  %v9709_v47 = vpack.c.bf16 %v2223_v45, %v2222_v44 }
 0x498   : > { %9181 = vmatprep.mubr.msk.f32.mxu0 %vm10031_vm0, %v10032_v6  ;;  %9180 = vmatpush3.msra.mxu0 %v1143_v4 }
 0x499   : > { %9189 = vmatprep.subr.mxu0 %v10032_v6 }
 0x562   : > { %v1618_v48 = vpop.f32.mrb[4].mxu1 }
 0x563   : > { %v9168_v49 = vpop.f32.mrb[5].mxu1 }
 0x566   : > { %v1545_v50 = vpop.f32.mrb[6].mxu0 }
 0x567   : > { %v1619_v51 = vadd.f32 %v1618_v48, %v1545_v50  ;;  %v9163_v52 = vpop.f32.mrb[7].mxu0  ;;  %v2225_v48 = vld [vmem:[%s11154_s19 + $0x18] sm:$0xff]  ;;  %v2226_v50 = vld [vmem:[%s11154_s19 + $0x20] sm:$0xff] }
 0x568   : > { %v9712_v49 = vpack.c.bf16 %v2225_v48, %v2224_v46 }
 0x56a   : > { %v1696_v53 = vpop.f32.mrb[8].mxu0 }
 0x56b   : > { %v9173_v54 = vpop.f32.mrb[9].mxu0  ;;  %v1700_v55 = vsel %vm1149_vm2, %v1696_v53, -inf }
 0x56c   : > { %1701 = vmax.xlane.f32.xlu1 %v1700_v55 }
 0x57d   : > { %1863 = vrot.lane.b32.xlu1 %v10255_v11, %s11093_s10 }
 0x581   : > { %1861 = vrot.lane.b32.xlu1 %v10255_v11, %s11089_s11 }
 0x5f9   : > { %v1702_v56 = vpop.xlane.xlu1 %1701 }
 0x5fa   : > { %v1703_v57 = vsub.f32 %v1696_v53, %v1702_v56 }
 0x5fc   : > { %v1704_v58 = vmul.f32 1.442695, %v1703_v57  ;;  %v8678_v57 = vld [vmem:[%s11150_s29] ss:$0 sm:$0xff] }
 0x5fd   : > { %v1864_v0 = vpop.permute.xlu1 %1863 }
 0x5fe   : > { %9880 = vpow2.f32 %v1704_v58 }
 0x601   : > { %v1862_v2 = vpop.permute.xlu1 %1861 }
 0x608   : > { %v9881_v59 = vpop.eup %9880 }
 0x609   : > { %v1706_v60 = vsel %vm1149_vm2, %v9881_v59, 0.0 }
 0x60a   : > { %1707 = vadd.xlane.f32.xlu0 %v1706_v60 }
 0x620   : > { %1711 = vrot.lane.b32.xlu0 %v10255_v11, %s11087_s16 }
 0x697   : > { %v1708_v61 = vpop.xlane.xlu0 %1707 }
 0x698   : > { %9882 = vrcp.f32 %v1708_v61 }
 0x69b   : > { %v1712_v62 = vpop.permute.xlu0 %1711 }
 0x69c   : > { %9175 = vmatpush3.msra.mxu1 %v1712_v62  ;;  %v2228_v62 = vld [vmem:[%s11154_s19 + $0x30] sm:$0xff] }
 0x69d   : > { %9184 = vmatprep.subr.mxu1 %v10032_v6 }
 0x6a2   : > { %v9883_v63 = vpop.eup %9882 }
 0x6a3   : > { %v1710_v1 = vmul.f32 %v9883_v63, %v9881_v59  ;;  %v8679_v59 = vld [vmem:[%s11160_s3] ss:$0 sm:$0xff]  ;;  %v2229_v63 = vld [vmem:[%s11154_s19 + $0x38] sm:$0xff] }
 0x6a5   : > { %9177 = vmatmul.mubr.msk.f32.vlgmr.msra.gmra.mrb[6].mxu1 %vm1149_vm2, %v1710_v1  ;;  %v8680_v1 = vld [vmem:[%s11156_s14] ss:$0 sm:$0xff] }
 0x6a6   : > { %9185 = vmatpush3.xpose.msk.msra.mxu1 %vm1149_vm2, %v1864_v0  ;;  %9186 = vmatprep.mubr.msk.f32.mxu1 %vm10031_vm0, %v10032_v6  ;;  %v9718_v0 = vpack.c.bf16 %v2229_v63, %v2228_v62 }
 0x6a7   : > { %9194 = vmatprep.subr.mxu1 %v10032_v6 }
 0x6a9   : > { %9187 = vmatmul.mubr.msk.f32.vlgmr.msra.gmra.mrb[8].mxu1 %vm1149_vm2, %v1862_v2 }
 0x6aa   : > { %9196 = vmatprep.mubr.msk.f32.mxu1 %vm10031_vm0, %v10032_v6  ;;  %9195 = vmatpush3.msra.mxu1 %v1144_v19 }
 0x6ab   : > { %9708 = vmatprep.subr.bf16.mxu1 %v10030_v3 }
 0x778   : > { %v1783_v5 = vpop.f32.mrb[6].mxu1 }
 0x779   : > { %v9178_v7 = vpop.f32.mrb[7].mxu1  ;;  %9182 = vmatmul.mubr.msk.f32.vlgmr.msra.gmra.mrb[10].mxu0 %vm1149_vm2, %v1783_v5 }
 0x77a   : > { %9191 = vmatprep.mubr.msk.f32.mxu0 %vm10031_vm0, %v10032_v6  ;;  %v8682_v7 = vld [vmem:[%s11152_s24] ss:$0 sm:$0xff] }
 0x77c   : > { %v1935_v9 = vpop.f32.mrb[8].mxu1 }
 0x77d   : > { %v9188_v10 = vpop.f32.mrb[9].mxu1  ;;  %v1939_v12 = vsel %vm1149_vm2, %v1935_v9, -inf }
 0x77e   : > { %1940 = vmax.xlane.f32.xlu0 %v1939_v12 }
 0x794   : > { %1950 = vrot.lane.b32.xlu0 %v10255_v11, %s11085_s18 }
 0x80b   : > { %v1941_v13 = vpop.xlane.xlu0 %1940 }
 0x80c   : > { %v1942_v14 = vsub.f32 %v1935_v9, %v1941_v13 }
 0x80e   : > { %v1943_v15 = vmul.f32 1.442695, %v1942_v14 }
 0x80f   : > { %v1951_v16 = vpop.permute.xlu0 %1950 }
 0x810   : > { %9884 = vpow2.f32 %v1943_v15  ;;  %9190 = vmatpush3.msra.mxu0 %v1951_v16 }
 0x811   : > { %9702 = vmatprep.subr.bf16.mxu0 %v10030_v3 }
 0x81a   : > { %v9885_v17 = vpop.eup %9884 }
 0x81b   : > { %v1945_v18 = vsel %vm1149_vm2, %v9885_v17, 0.0 }
 0x81c   : > { %1946 = vadd.xlane.f32.xlu1 %v1945_v18 }
 0x84c   : > { %v1856_v20 = vpop.f32.mrb[10].mxu0 }
 0x84d   : > { %v1860_v21 = vadd.f32 %v1856_v20, %v1619_v51  ;;  %v9183_v11 = vpop.f32.mrb[11].mxu0  ;;  %v2227_v51 = vld [vmem:[%s11154_s19 + $0x28] sm:$0xff]  ;;  %v8686_v20 = vld [vmem:[%s11157_s13 + $0x20] sm:$0xff] }
 0x84e   : > { %v9715_v52 = vpack.c.bf16 %v2227_v51, %v2226_v50 }
 0x8a9   : > { %v1947_v22 = vpop.xlane.xlu1 %1946 }
 0x8aa   : > { %9886 = vrcp.f32 %v1947_v22  ;;  %v8688_v22 = vld [vmem:[%s11157_s13 + $0x30] sm:$0xff] }
 0x8b4   : > { %v9887_v23 = vpop.eup %9886 }
 0x8b5   : > { %v1949_v24 = vmul.f32 %v9887_v23, %v9885_v17  ;;  %v8689_v23 = vld [vmem:[%s11157_s13 + $0x38] sm:$0xff] }
 0x8b7   : > { %9192 = vmatmul.mubr.msk.f32.vlgmr.msra.gmra.mrb[12].mxu0 %vm1149_vm2, %v1949_v24  ;;  %v9724_v24 = vpack.c.bf16 %v8689_v23, %v8688_v22 }
 0x8b8   : > { %9207 = vmatprep.mubr.msk.f32.mxu0 %vm10031_vm0, %v10032_v6  ;;  %9704 = vmatpush3.bf16.msra.mxu0 %v9703_v41 }
 0x8b9   : > { %9705 = vmatprep.subr.bf16.mxu0 %v10030_v3 }
 0x98a   : > { %v2022_v25 = vpop.f32.mrb[12].mxu0 }
 0x98b   : > { %v9193_v26 = vpop.f32.mrb[13].mxu0  ;;  %9197 = vmatmul.mubr.msk.f32.vlgmr.msra.gmra.mrb[10].mxu1 %vm1149_vm2, %v2022_v25 }
 0x98c   : > { %9226 = vmatprep.mubr.msk.f32.mxu1 %vm10031_vm0, %v10032_v6  ;;  %9710 = vmatpush3.bf16.msra.mxu1 %v9709_v47 }
 0x98d   : > { %9711 = vmatprep.subr.bf16.mxu1 %v10030_v3 }
 0x990   : > { %9713 = vmatpush3.bf16.msra.mxu1 %v9712_v49 }
 0x991   : > { %9714 = vmatprep.subr.bf16.mxu1 %v10030_v3 }
 0x994   : > { %9716 = vmatpush3.bf16.msra.mxu1 %v9715_v52 }
 0x995   : > { %9717 = vmatprep.subr.bf16.mxu1 %v10030_v3 }
 0x998   : > { %9719 = vmatpush3.bf16.msra.mxu1 %v9718_v0 }
 0x999   : > { %9245 = vmatprep.subr.mxu1 %v10032_v6 }
 0xa5e   : > { %v2095_v28 = vpop.f32.mrb[10].mxu1 }
 0xa5f   : > { %v2099_v29 = vadd.f32 %v2095_v28, %v1860_v21  ;;  %v9198_v30 = vpop.f32.mrb[11].mxu1  ;;  %v8687_v21 = vld [vmem:[%s11157_s13 + $0x28] sm:$0xff]  ;;  %s11181_s13 = smov 112  }
 0xa60   : > { %v9721_v11 = vpack.c.bf16 %v8687_v21, %v8686_v20 }
 0xa61   : > { %v2106_v31 = vadd.f32 %v8677_v27, %v2099_v29  ;;  %v8684_v29 = vld [vmem:[%s11149_s30] ss:$0 sm:$0xff] }
 0xa63   : > { %v2107_v32 = vadd.f32 %v2106_v31, %v10247_v8  ;;  %v2140_v8 = vld [vmem:[%s11158_s8 + $0x10] sm:$0xff]  ;;  %v8685_v31 = vld [vmem:[%s11159_s6] ss:$0 sm:$0xff] }
 0xa64   : > { %v9706_v43 = vpack.c.bf16 %v2141_v42, %v2140_v8 }
 0xa65   : > { %v2110_v33 = vsel %vm1067_vm1, %v2107_v32, 0.0 }
 0xa66   : > { %2111 = vadd.xlane.f32.xlu1 %v2110_v33  ;;  %9707 = vmatpush3.bf16.msra.mxu0 %v9706_v43 }
 0xa67   : > { %9720 = vmatprep.subr.bf16.mxu0 %v10030_v3 }
 0xaf3   : > { %v2112_v34 = vpop.xlane.xlu1 %2111 }
 0xaf4   : > { %v2114_v35 = vmul.f32 0.03125, %v2112_v34  ;;  %v8691_v34 = vld [vmem:[%s11155_s17 + $0x1] ss:$0 sm:$0xff]  ;;  %s11183_s17 = smov 80  }
 0xaf6   : > { %v2115_v36 = vsub.f32 %v2107_v32, %v2114_v35 }
 0xaf8   : > { %v2116_v37 = vmul.f32 %v2115_v36, %v2115_v36 }
 0xafa   : > { %v2117_v38 = vsel %vm1067_vm1, %v2116_v37, 0.0 }
 0xafb   : > { %2118 = vadd.xlane.f32.xlu1 %v2117_v38 }
 0xb88   : > { %v2119_v53 = vpop.xlane.xlu1 %2118 }
 0xb89   : > { %v2120_v54 = vmul.f32 0.03125, %v2119_v53 }
 0xb8b   : > { %v2121_v55 = vadd.f32 1e-05, %v2120_v54 }
 0xb8d   : > { %9888 = vrsqrt.f32 %v2121_v55 }
 0xb97   : > { %v9889_v56 = vpop.eup %9888 }
 0xb98   : > { %v2123_v58 = vmul.f32 %v9889_v56, %v2115_v36  ;;  %v8694_v56 = vld [vmem:[%s11153_s21 + $0x28] sm:$0xff] }
 0xb9a   : > { %v2130_v60 = vmul.f32 %v8678_v57, %v2123_v58 }
 0xb9c   : > { %v2137_v61 = vadd.f32 %v8679_v59, %v2130_v60 }
 0xb9e   : > { %9208 = vmatmul.mubr.msk.f32.vlgmr.msra.gmra.mrb[14].mxu0 %vm1067_vm1, %v2137_v61 }
 0xb9f   : > { %9237 = vmatprep.mubr.msk.f32.mxu0 %vm10031_vm0, %v10032_v6  ;;  %9722 = vmatpush3.bf16.msra.mxu0 %v9721_v11 }
 0xba0   : > { %9723 = vmatprep.subr.bf16.mxu0 %v10030_v3 }
 0xba3   : > { %9725 = vmatpush3.bf16.msra.mxu0 %v9724_v24 }
 0xba4   : > { %9240 = vmatprep.subr.mxu0 %v10032_v6 }
 0xc71   : > { %v2218_v2 = vpop.f32.mrb[14].mxu0 }
 0xc72   : > { %v2219_v4 = vadd.f32 %v8680_v1, %v2218_v2  ;;  %v9209_v5 = vpop.f32.mrb[15].mxu0  ;;  %v8693_v1 = vld [vmem:[%s11153_s21 + $0x20] sm:$0xff] }
 0xc74   : > { %9227 = vmatmul.mubr.msk.f32.vlgmr.msra.gmra.mrb[12].mxu1 %vm2237_vm3, %v2219_v4 }
 0xc75   : > { %9247 = vmatprep.mubr.msk.f32.mxu1 %vm10031_vm0, %v10032_v6 }
 0xd47   : > { %v2307_v9 = vpop.f32.mrb[12].mxu1 }
 0xd48   : > { %v2308_v10 = vadd.f32 %v8682_v7, %v2307_v9  ;;  %v9228_v12 = vpop.f32.mrb[13].mxu1 }
 0xd4a   : > { %v2311_v13 = vadd.f32 %v2308_v10, %v2137_v61 }
 0xd4c   : > { %v2314_v14 = vsel %vm1067_vm1, %v2311_v13, 0.0 }
 0xd4d   : > { %2315 = vadd.xlane.f32.xlu1 %v2314_v14 }
 0xdda   : > { %v2316_v15 = vpop.xlane.xlu1 %2315 }
 0xddb   : > { %v2317_v16 = vmul.f32 0.03125, %v2316_v15 }
 0xddd   : > { %v2318_v17 = vsub.f32 %v2311_v13, %v2317_v16 }
 0xddf   : > { %v2319_v18 = vmul.f32 %v2318_v17, %v2318_v17 }
 0xde1   : > { %v2320_v19 = vsel %vm1067_vm1, %v2319_v18, 0.0 }
 0xde2   : > { %2321 = vadd.xlane.f32.xlu1 %v2320_v19 }
 0xe6f   : > { %v2322_v25 = vpop.xlane.xlu1 %2321 }
 0xe70   : > { %v2323_v26 = vmul.f32 0.03125, %v2322_v25 }
 0xe72   : > { %v2324_v27 = vadd.f32 1e-05, %v2323_v26 }
 0xe74   : > { %9890 = vrsqrt.f32 %v2324_v27 }
 0xe7e   : > { %v9891_v28 = vpop.eup %9890 }
 0xe7f   : > { %v2326_v30 = vmul.f32 %v9891_v28, %v2318_v17 }
 0xe81   : > { %v2333_v32 = vmul.f32 %v8684_v29, %v2326_v30  ;;  %v8695_v30 = vld [vmem:[%s11153_s21 + $0x30] sm:$0xff] }
 0xe83   : > { %v10386_v33 = vadd.f32 %v8685_v31, %v2333_v32 }
 0xe85   : > { %9238 = vmatmul.mubr.msk.f32.vlgmr.msra.gmra.mrb[16].mxu0 %vm1067_vm1, %v10386_v33 }
 0xe86   : > { %9242 = vmatprep.mubr.msk.f32.mxu0 %vm10031_vm0, %v10032_v6 }
 0xf58   : > { %v2423_v35 = vpop.f32.mrb[16].mxu0 }
 0xf59   : > { %v10393_v36 = vadd.f32 %v8691_v34, %v2423_v35  ;;  %v9239_v37 = vpop.f32.mrb[17].mxu0 }
 0xf5b   : > { %2600 = vrot.lane.b32.xlu0 %v10393_v36, %s11101_s26  ;;  %2435 = vrot.lane.b32.xlu1 %v10393_v36, %s11099_s23 }
 0xf5f   : > { %2598 = vrot.lane.b32.xlu0 %v10393_v36, %s11103_s22 }
 0xfcd   : > { %v2436_v38 = vpop.permute.xlu1 %2435  ;;  %v2601_v39 = vpop.permute.xlu0 %2600 }
 0xfce   : > { %9241 = vmatpush3.xpose.msk.msra.mxu0 %vm1149_vm2, %v2436_v38 }
 0xfcf   : > { %9250 = vmatprep.subr.mxu0 %v10032_v6 }
 0xfd1   : > { %9243 = vmatmul.mubr.msk.f32.vlgmr.msra.gmra.mrb[18].mxu0 %vm1149_vm2, %v10393_v36  ;;  %v2599_v40 = vpop.permute.xlu0 %2598 }
 0xfd2   : > { %9251 = vmatpush3.xpose.msk.msra.mxu0 %vm1149_vm2, %v2601_v39  ;;  %9252 = vmatprep.mubr.msk.f32.mxu0 %vm10031_vm0, %v10032_v6 }
 0xfd3   : > { %9260 = vmatprep.subr.mxu0 %v10032_v6 }
 0xfd5   : > { %9253 = vmatmul.mubr.msk.f32.vlgmr.msra.gmra.mrb[20].mxu0 %vm1149_vm2, %v2599_v40 }
 0xfd6   : > { %9262 = vmatprep.mubr.msk.f32.mxu0 %vm10031_vm0, %v10032_v6  ;;  %9261 = vmatpush3.msra.mxu0 %v8694_v56 }
 0xfd7   : > { %9270 = vmatprep.subr.mxu0 %v10032_v6 }
0x10a4   : > { %v2507_v41 = vpop.f32.mrb[18].mxu0 }
0x10a5   : > { %v9244_v8 = vpop.f32.mrb[19].mxu0  ;;  %v2511_v42 = vsel %vm1149_vm2, %v2507_v41, -inf }
0x10a6   : > { %2512 = vmax.xlane.f32.xlu0 %v2511_v42  ;;  %v8696_v42 = vld [vmem:[%s11153_s21 + $0x38] sm:$0xff]  ;;  %s11185_s21 = sld [smem:[#allocation24_spill]] }
0x10a8   : > { %v2672_v43 = vpop.f32.mrb[20].mxu0 }
0x10a9   : > { %v9254_v44 = vpop.f32.mrb[21].mxu0  ;;  %v2676_v45 = vsel %vm1149_vm2, %v2672_v43, -inf }
0x10aa   : > { %2677 = vmax.xlane.f32.xlu1 %v2676_v45 }
0x10bb   : > { %2687 = vrot.lane.b32.xlu1 %v10393_v36, %s11092_s28 }
0x10bf   : > { %2909 = vrot.lane.b32.xlu1 %v10393_v36, %s11097_s7 }
0x1133   : > { %v2513_v46 = vpop.xlane.xlu0 %2512 }
0x1134   : > { %v2514_v47 = vsub.f32 %v2507_v41, %v2513_v46 }
0x1136   : > { %v2515_v48 = vmul.f32 1.442695, %v2514_v47 }
0x1137   : > { %v2678_v49 = vpop.xlane.xlu1 %2677 }
0x1138   : > { %9892 = vpow2.f32 %v2515_v48  ;;  %v2679_v50 = vsub.f32 %v2672_v43, %v2678_v49 }
0x113a   : > { %v2680_v51 = vmul.f32 1.442695, %v2679_v50 }
0x113b   : > { %v2688_v62 = vpop.permute.xlu1 %2687 }
0x113c   : > { %9894 = vpow2.f32 %v2680_v51  ;;  %v8714_v51 = vld [vmem:[%s11151_s25 + $0x1] ss:$0 sm:$0xff]  ;;  %s11187_s25 = sld [smem:[#allocation27_spill]] }
0x113f   : > { %v2910_v10 = vpop.permute.xlu1 %2909 }
0x1142   : > { %v9893_v52 = vpop.eup %9892 }
0x1143   : > { %v2517_v53 = vsel %vm1149_vm2, %v9893_v52, 0.0 }
0x1144   : > { %2518 = vadd.xlane.f32.xlu0 %v2517_v53 }
0x1146   : > { %v9895_v54 = vpop.eup %9894 }
0x1147   : > { %v2682_v55 = vsel %vm1149_vm2, %v9895_v54, 0.0 }
0x1148   : > { %2683 = vadd.xlane.f32.xlu0 %v2682_v55 }
0x115e   : > { %2522 = vrot.lane.b32.xlu0 %v10393_v36, %s11091_s1 }
0x1162   : > { %2911 = vrot.lane.b32.xlu0 %v10393_v36, %s11095_s2 }
0x11d1   : > { %v2519_v57 = vpop.xlane.xlu0 %2518 }
0x11d2   : > { %9896 = vrcp.f32 %v2519_v57 }
0x11d5   : > { %v2684_v58 = vpop.xlane.xlu0 %2683 }
0x11d6   : > { %9898 = vrcp.f32 %v2684_v58 }
0x11d9   : > { %v2523_v59 = vpop.permute.xlu0 %2522 }
0x11da   : > { %9246 = vmatpush3.msra.mxu1 %v2523_v59 }
0x11db   : > { %9255 = vmatprep.subr.mxu1 %v10032_v6 }
0x11dc   : > { %v9897_v60 = vpop.eup %9896 }
0x11dd   : > { %v2521_v61 = vmul.f32 %v9897_v60, %v9893_v52  ;;  %v2912_v7 = vpop.permute.xlu0 %2911 }
0x11df   : > { %9248 = vmatmul.mubr.msk.f32.vlgmr.msra.gmra.mrb[14].mxu1 %vm1149_vm2, %v2521_v61 }
0x11e0   : > { %v9899_v63 = vpop.eup %9898  ;;  %9256 = vmatpush3.msra.mxu1 %v2688_v62  ;;  %9257 = vmatprep.mubr.msk.f32.mxu1 %vm10031_vm0, %v10032_v6 }
0x11e1   : > { %v2686_v0 = vmul.f32 %v9899_v63, %v9895_v54  ;;  %9265 = vmatprep.subr.mxu1 %v10032_v6  ;;  %v8719_v63 = vld [vmem:[%s11158_s8 + $0x20] sm:$0xff] }
0x11e3   : > { %9258 = vmatmul.mubr.msk.f32.vlgmr.msra.gmra.mrb[16].mxu1 %vm1149_vm2, %v2686_v0  ;;  %v8720_v0 = vld [vmem:[%s11158_s8 + $0x28] sm:$0xff] }
0x11e4   : > { %9267 = vmatprep.mubr.msk.f32.mxu1 %vm10031_vm0, %v10032_v6  ;;  %9266 = vmatpush3.msra.mxu1 %v8693_v1  ;;  %v9727_v1 = vpack.c.bf16 %v8720_v0, %v8719_v63 }
0x11e5   : > { %9275 = vmatprep.subr.mxu1 %v10032_v6 }
0x12b2   : > { %v2594_v2 = vpop.f32.mrb[14].mxu1 }
0x12b3   : > { %v9249_v4 = vpop.f32.mrb[15].mxu1  ;;  %9268 = vmatmul.mubr.msk.f32.vlgmr.msra.gmra.mrb[18].mxu1 %vm1149_vm2, %v2594_v2  ;;  %v8722_v2 = vld [vmem:[%s11158_s8 + $0x38] sm:$0xff] }
0x12b4   : > { %9277 = vmatprep.mubr.msk.f32.mxu1 %vm10031_vm0, %v10032_v6 }
0x12b6   : > { %v2759_v5 = vpop.f32.mrb[16].mxu1 }
0x12b7   : > { %v9259_v9 = vpop.f32.mrb[17].mxu1  ;;  %9263 = vmatmul.mubr.msk.f32.vlgmr.msra.gmra.mrb[22].mxu0 %vm1149_vm2, %v2759_v5  ;;  %v8726_v5 = vld [vmem:[%s11154_s19 + $0x40] sm:$0xff] }
0x12b8   : > { %9271 = vmatpush3.xpose.msk.msra.mxu0 %vm1149_vm2, %v2912_v7  ;;  %9272 = vmatprep.mubr.msk.f32.mxu0 %vm10031_vm0, %v10032_v6  ;;  %v8727_v7 = vld [vmem:[%s11154_s19 + $0x48] sm:$0xff]  ;;  %v8728_v9 = vld [vmem:[%s11154_s19 + $0x50] sm:$0xff] }
0x12b9   : > { %9280 = vmatprep.subr.mxu0 %v10032_v6 }
0x12bb   : > { %9273 = vmatmul.mubr.msk.f32.vlgmr.msra.gmra.mrb[24].mxu0 %vm1149_vm2, %v2910_v10  ;;  %v9733_v10 = vpack.c.bf16 %v8727_v7, %v8726_v5 }
0x12bc   : > { %9282 = vmatprep.mubr.msk.f32.mxu0 %vm10031_vm0, %v10032_v6  ;;  %9281 = vmatpush3.msra.mxu0 %v8695_v30 }
0x12bd   : > { %9290 = vmatprep.subr.mxu0 %v10032_v6 }
0x1386   : > { %v2905_v12 = vpop.f32.mrb[18].mxu1 }
0x1387   : > { %v9269_v13 = vpop.f32.mrb[19].mxu1 }
0x138a   : > { %v2832_v14 = vpop.f32.mrb[22].mxu0 }
0x138b   : > { %v2906_v15 = vadd.f32 %v2905_v12, %v2832_v14  ;;  %v9264_v16 = vpop.f32.mrb[23].mxu0  ;;  %v8729_v12 = vld [vmem:[%s11154_s19 + $0x58] sm:$0xff]  ;;  %v8730_v14 = vld [vmem:[%s11154_s19 + $0x60] sm:$0xff] }
0x138c   : > { %v9736_v13 = vpack.c.bf16 %v8729_v12, %v8728_v9 }
0x138e   : > { %v2983_v17 = vpop.f32.mrb[24].mxu0 }
0x138f   : > { %v9274_v18 = vpop.f32.mrb[25].mxu0  ;;  %v2987_v19 = vsel %vm1149_vm2, %v2983_v17, -inf }
0x1390   : > { %2988 = vmax.xlane.f32.xlu0 %v2987_v19 }
0x13a6   : > { %2998 = vrot.lane.b32.xlu0 %v10393_v36, %s11087_s16 }
0x13aa   : > { %3148 = vrot.lane.b32.xlu0 %v10393_v36, %s11089_s11  ;;  %s11164_s11 = sld [smem:[#allocation16_spill]] }
0x141d   : > { %v2989_v20 = vpop.xlane.xlu0 %2988 }
0x141e   : > { %v2990_v21 = vsub.f32 %v2983_v17, %v2989_v20 }
0x1420   : > { %v2991_v11 = vmul.f32 1.442695, %v2990_v21  ;;  %v8717_v21 = vld [vmem:[%s11150_s29 + $0x1] ss:$0 sm:$0xff]  ;;  %s11188_s29 = sld [smem:[#allocation28_spill]] }
0x1421   : > { %v2999_v22 = vpop.permute.xlu0 %2998 }
0x1422   : > { %9900 = vpow2.f32 %v2991_v11  ;;  %9276 = vmatpush3.msra.mxu1 %v2999_v22  ;;  %v3635_v22 = vld [vmem:[%s10122_s12] sm:$0xff] }
0x1423   : > { %9285 = vmatprep.subr.mxu1 %v10032_v6 }
0x1425   : > { %v3149_v29 = vpop.permute.xlu0 %3148 }
0x142c   : > { %v9901_v23 = vpop.eup %9900 }
0x142d   : > { %v2993_v24 = vsel %vm1149_vm2, %v9901_v23, 0.0 }
0x142e   : > { %2994 = vadd.xlane.f32.xlu1 %v2993_v24  ;;  %v8718_v24 = vld [vmem:[%s11160_s3 + $0x1] ss:$0 sm:$0xff]  ;;  %s11177_s3 = sld [smem:[#allocation20_spill]] }
0x143f   : > { %3150 = vrot.lane.b32.xlu1 %v10393_v36, %s11093_s10 }
0x14bb   : > { %v2995_v25 = vpop.xlane.xlu1 %2994 }
0x14bc   : > { %9902 = vrcp.f32 %v2995_v25 }
0x14bf   : > { %v3151_v28 = vpop.permute.xlu1 %3150 }
0x14c6   : > { %v9903_v26 = vpop.eup %9902 }
0x14c7   : > { %v2997_v27 = vmul.f32 %v9903_v26, %v9901_v23  ;;  %v3636_v23 = vld [vmem:[%s10122_s12 + $0x8] sm:$0xff] }
0x14c8   : > { %v9745_v26 = vpack.c.bf16 %v3636_v23, %v3635_v22 }
0x14c9   : > { %9278 = vmatmul.mubr.msk.f32.vlgmr.msra.gmra.mrb[20].mxu1 %vm1149_vm2, %v2997_v27 }
0x14ca   : > { %9286 = vmatpush3.xpose.msk.msra.mxu1 %vm1149_vm2, %v3151_v28  ;;  %9287 = vmatprep.mubr.msk.f32.mxu1 %vm10031_vm0, %v10032_v6  ;;  %v3637_v28 = vld [vmem:[%s10122_s12 + $0x10] sm:$0xff] }
0x14cb   : > { %9295 = vmatprep.subr.mxu1 %v10032_v6 }
0x14cd   : > { %9288 = vmatmul.mubr.msk.f32.vlgmr.msra.gmra.mrb[22].mxu1 %vm1149_vm2, %v3149_v29  ;;  %v3638_v29 = vld [vmem:[%s10122_s12 + $0x18] sm:$0xff] }
0x14ce   : > { %9297 = vmatprep.mubr.msk.f32.mxu1 %vm10031_vm0, %v10032_v6  ;;  %9296 = vmatpush3.msra.mxu1 %v8696_v42  ;;  %v9748_v30 = vpack.c.bf16 %v3638_v29, %v3637_v28 }
0x14cf   : > { %9732 = vmatprep.subr.bf16.mxu1 %v10030_v3 }
0x159c   : > { %v3070_v31 = vpop.f32.mrb[20].mxu1 }
0x159d   : > { %v9279_v32 = vpop.f32.mrb[21].mxu1  ;;  %9283 = vmatmul.mubr.msk.f32.vlgmr.msra.gmra.mrb[26].mxu0 %vm1149_vm2, %v3070_v31 }
0x159e   : > { %9292 = vmatprep.mubr.msk.f32.mxu0 %vm10031_vm0, %v10032_v6  ;;  %v8732_v32 = vld [vmem:[%s11154_s19 + $0x70] sm:$0xff] }
0x15a0   : > { %v3222_v34 = vpop.f32.mrb[22].mxu1 }
0x15a1   : > { %v9289_v35 = vpop.f32.mrb[23].mxu1  ;;  %v3226_v37 = vsel %vm1149_vm2, %v3222_v34, -inf }
0x15a2   : > { %3227 = vmax.xlane.f32.xlu1 %v3226_v37  ;;  %v8724_v37 = vld [vmem:[%s11156_s14 + $0x1] ss:$0 sm:$0xff]  ;;  %s11182_s14 = sld [smem:[#allocation23_spill]] }
0x162f   : > { %v3228_v38 = vpop.xlane.xlu1 %3227 }
0x1630   : > { %v3229_v39 = vsub.f32 %v3222_v34, %v3228_v38  ;;  %v8733_v34 = vld [vmem:[%s11154_s19 + $0x78] sm:$0xff] }
0x1631   : > { %v9742_v35 = vpack.c.bf16 %v8733_v34, %v8732_v32 }
0x1632   : > { %v3230_v40 = vmul.f32 1.442695, %v3229_v39 }
0x1634   : > { %9904 = vpow2.f32 %v3230_v40 }
0x163e   : > { %v9905_v41 = vpop.eup %9904 }
0x163f   : > { %v3232_v8 = vsel %vm1149_vm2, %v9905_v41, 0.0 }
0x1640   : > { %3233 = vadd.xlane.f32.xlu0 %v3232_v8 }
0x1656   : > { %3237 = vrot.lane.b32.xlu0 %v10393_v36, %s11085_s18  ;;  %s11163_s18 = sld [smem:[#allocation3_spill]] }
0x165c   : > { %s1050_s16 = scalar_lea.vmem %s11163_s18, %s10243_s0  ;;  %s11168_s18 = smov 104  }
0x165d   : > { %v10516_v31 = vld [vmem:[%s1050_s16] sm:$0xff]  ;;  %s11167_s16 = sld [smem:[#allocation17_spill]] }
0x1663   : > { %v3720_v7 = vld [vmem:[%s11167_s16 + $0x8] sm:$0xff] }
0x1670   : > { %v3143_v43 = vpop.f32.mrb[26].mxu0 }
0x1671   : > { %v3147_v44 = vadd.f32 %v3143_v43, %v2906_v15  ;;  %v9284_v45 = vpop.f32.mrb[27].mxu0  ;;  %v8731_v15 = vld [vmem:[%s11154_s19 + $0x68] sm:$0xff]  ;;  %s11184_s19 = smov 72  }
0x1672   : > { %v9739_v16 = vpack.c.bf16 %v8731_v15, %v8730_v14 }
0x16cd   : > { %v3234_v46 = vpop.xlane.xlu0 %3233 }
0x16ce   : > { %9906 = vrcp.f32 %v3234_v46 }
0x16d1   : > { %v3238_v47 = vpop.permute.xlu0 %3237 }
0x16d2   : > { %9291 = vmatpush3.msra.mxu0 %v3238_v47 }
0x16d3   : > { %9726 = vmatprep.subr.bf16.mxu0 %v10030_v3 }
0x16d8   : > { %v9907_v48 = vpop.eup %9906 }
0x16d9   : > { %v3236_v49 = vmul.f32 %v9907_v48, %v9905_v41  ;;  %v8741_v41 = vld [vmem:[%s11164_s11] ss:$0 sm:$0xff] }
0x16db   : > { %9293 = vmatmul.mubr.msk.f32.vlgmr.msra.gmra.mrb[28].mxu0 %vm1149_vm2, %v3236_v49  ;;  %v3724_v49 = vlaneseq }
0x16dc   : > { %9308 = vmatprep.mubr.msk.f32.mxu0 %vm10031_vm0, %v10032_v6  ;;  %9728 = vmatpush3.bf16.msra.mxu0 %v9727_v1 }
0x16dd   : > { %9729 = vmatprep.subr.bf16.mxu0 %v10030_v3 }
0x17ae   : > { %v3309_v36 = vpop.f32.mrb[28].mxu0 }
0x17af   : > { %v9294_v50 = vpop.f32.mrb[29].mxu0  ;;  %9298 = vmatmul.mubr.msk.f32.vlgmr.msra.gmra.mrb[24].mxu1 %vm1149_vm2, %v3309_v36  ;;  %v3725_v36 = vshrl.u32 %v3724_v49, 7 }
0x17b0   : > { %9327 = vmatprep.mubr.msk.f32.mxu1 %vm10031_vm0, %v10032_v6  ;;  %9734 = vmatpush3.bf16.msra.mxu1 %v9733_v10  ;;  %v3727_v50 = vand.u32 127, %v3724_v49  ;;  %v3721_v49 = vld [vmem:[%s11167_s16 + $0x10] sm:$0xff] }
0x17b1   : > { %9735 = vmatprep.subr.bf16.mxu1 %v10030_v3 }
0x17b2   : > { %vm10552_vm4 = vcmp.gt.s32.totalorder %v3727_v50, %v3725_v36 }
0x17b4   : > { %9737 = vmatpush3.bf16.msra.mxu1 %v9736_v13 }
0x17b5   : > { %9738 = vmatprep.subr.bf16.mxu1 %v10030_v3 }
0x17b8   : > { %9740 = vmatpush3.bf16.msra.mxu1 %v9739_v16 }
0x17b9   : > { %9741 = vmatprep.subr.bf16.mxu1 %v10030_v3 }
0x17bc   : > { %9743 = vmatpush3.bf16.msra.mxu1 %v9742_v35 }
0x17bd   : > { %9346 = vmatprep.subr.mxu1 %v10032_v6 }
0x1882   : > { %v3382_v52 = vpop.f32.mrb[24].mxu1 }
0x1883   : > { %v3386_v53 = vadd.f32 %v3382_v52, %v3147_v44  ;;  %v9299_v54 = vpop.f32.mrb[25].mxu1 }
0x1885   : > { %v3393_v55 = vadd.f32 %v8714_v51, %v3386_v53 }
0x1887   : > { %v3394_v56 = vadd.f32 %v3393_v55, %v10386_v33  ;;  %v8721_v33 = vld [vmem:[%s11158_s8 + $0x30] sm:$0xff]  ;;  %s11180_s8 = smov 96  }
0x1888   : > { %v9730_v4 = vpack.c.bf16 %v8722_v2, %v8721_v33 }
0x1889   : > { %v3399_v57 = vsel %vm1067_vm1, %v3394_v56, 0.0 }
0x188a   : > { %3400 = vadd.xlane.f32.xlu1 %v3399_v57  ;;  %9731 = vmatpush3.bf16.msra.mxu0 %v9730_v4 }
0x188b   : > { %9744 = vmatprep.subr.bf16.mxu0 %v10030_v3 }
0x1917   : > { %v3401_v58 = vpop.xlane.xlu1 %3400 }
0x1918   : > { %v3402_v59 = vmul.f32 0.03125, %v3401_v58 }
0x191a   : > { %v3403_v60 = vsub.f32 %v3394_v56, %v3402_v59 }
0x191c   : > { %v3404_v61 = vmul.f32 %v3403_v60, %v3403_v60 }
0x191e   : > { %v3405_v62 = vsel %vm1067_vm1, %v3404_v61, 0.0 }
0x191f   : > { %3406 = vadd.xlane.f32.xlu1 %v3405_v62 }
0x19ac   : > { %v3407_v17 = vpop.xlane.xlu1 %3406 }
0x19ad   : > { %v3408_v18 = vmul.f32 0.03125, %v3407_v17 }
0x19af   : > { %v3409_v19 = vadd.f32 1e-05, %v3408_v18  ;;  %v3719_v18 = vld [vmem:[%s11167_s16] sm:$0xff] }
0x19b1   : > { %9908 = vrsqrt.f32 %v3409_v19 }
0x19bb   : > { %v9909_v20 = vpop.eup %9908 }
0x19bc   : > { %v3411_v11 = vmul.f32 %v9909_v20, %v3403_v60 }
0x19be   : > { %v3418_v25 = vmul.f32 %v8717_v21, %v3411_v11 }
0x19c0   : > { %v10505_v27 = vadd.f32 %v8718_v24, %v3418_v25 }
0x19c2   : > { %9309 = vmatmul.mubr.msk.f32.vlgmr.msra.gmra.mrb[30].mxu0 %vm1067_vm1, %v10505_v27 }
0x19c3   : > { %9746 = vmatpush3.bf16.msra.mxu0 %v9745_v26  ;;  %9338 = vmatprep.mubr.msk.f32.mxu0 %vm10031_vm0, %v10032_v6 }
0x19c4   : > { %9747 = vmatprep.subr.bf16.mxu0 %v10030_v3 }
0x19c7   : > { %9749 = vmatpush3.bf16.msra.mxu0 %v9748_v30 }
0x19c8   : > { %9341 = vmatprep.subr.mxu0 %v10032_v6 }
0x19ca   : > { %9339 = vmatmul.mubr.msk.f32.vlgmr.msra.gmra.mrb[32].mxu0 %vm1067_vm1, %v10516_v31 }
0x19cb   : > { %9343 = vmatprep.mubr.msk.f32.mxu0 %vm10031_vm0, %v10032_v6 }
0x1a95   : > { %v3508_v38 = vpop.f32.mrb[30].mxu0 }
0x1a96   : > { %v3509_v39 = vadd.f32 %v8724_v37, %v3508_v38  ;;  %v9310_v40 = vpop.f32.mrb[31].mxu0 }
0x1a98   : > { %9328 = vmatmul.mubr.msk.f32.vlgmr.msra.gmra.mrb[26].mxu1 %vm2237_vm3, %v3509_v39 }
0x1a99   : > { %9348 = vmatprep.mubr.msk.f32.mxu1 %vm10031_vm0, %v10032_v6 }
0x1a9d   : > { %v3715_v8 = vpop.f32.mrb[32].mxu0 }
0x1a9e   : > { %v10531_v42 = vadd.f32 %v8741_v41, %v3715_v8  ;;  %v9340_v43 = vpop.f32.mrb[33].mxu0 }
0x1aa0   : > { %3896 = vrot.lane.b32.xlu0 %v10531_v42, %s11101_s26  ;;  %3730 = vrot.lane.b32.xlu1 %v10531_v42, %s11099_s23  ;;  %s11174_s23 = sld [smem:[#allocation25_spill]]  ;;  %s11175_s26 = sld [smem:[#allocation26_spill]] }
0x1aa4   : > { %3894 = vrot.lane.b32.xlu0 %v10531_v42, %s11103_s22  ;;  %s11176_s22 = sld [smem:[#allocation22_spill]] }
0x1b12   : > { %v3731_v44 = vpop.permute.xlu1 %3730  ;;  %v3897_v45 = vpop.permute.xlu0 %3896 }
0x1b13   : > { %9342 = vmatpush3.xpose.msk.msra.mxu0 %vm1149_vm2, %v3731_v44 }
0x1b14   : > { %9351 = vmatprep.subr.mxu0 %v10032_v6 }
0x1b16   : > { %9344 = vmatmul.mubr.msk.f32.vlgmr.msra.gmra.mrb[34].mxu0 %vm1149_vm2, %v10531_v42  ;;  %v3895_v46 = vpop.permute.xlu0 %3894 }
0x1b17   : > { %9352 = vmatpush3.xpose.msk.msra.mxu0 %vm1149_vm2, %v3897_v45  ;;  %9353 = vmatprep.mubr.msk.f32.mxu0 %vm10031_vm0, %v10032_v6 }
0x1b18   : > { %9361 = vmatprep.subr.mxu0 %v10032_v6 }
0x1b1a   : > { %9354 = vmatmul.mubr.msk.f32.vlgmr.msra.gmra.mrb[36].mxu0 %vm1149_vm2, %v3895_v46 }
0x1b1b   : > { %9363 = vmatprep.mubr.msk.f32.mxu0 %vm10031_vm0, %v10032_v6  ;;  %9362 = vmatpush3.msra.mxu0 %v3720_v7 }
0x1b1c   : > { %9371 = vmatprep.subr.mxu0 %v10032_v6 }
0x1b6b   : > { %v10550_v47 = vpop.f32.mrb[26].mxu1 }
0x1b6c   : > { %v9329_v48 = vpop.f32.mrb[27].mxu1 }
0x1be9   : > { %v3802_v52 = vpop.f32.mrb[34].mxu0 }
0x1bea   : > { %v3806_v53 = vsel %vm10552_vm4, -1e+09, %v3802_v52  ;;  %v9345_v54 = vpop.f32.mrb[35].mxu0 }
0x1beb   : > { %v3807_v55 = vsel %vm1149_vm2, %v3806_v53, -inf }
0x1bec   : > { %3808 = vmax.xlane.f32.xlu1 %v3807_v55 }
0x1bed   : > { %v3968_v56 = vpop.f32.mrb[36].mxu0 }
0x1bee   : > { %v3972_v57 = vsel %vm10552_vm4, -1e+09, %v3968_v56  ;;  %v9355_v58 = vpop.f32.mrb[37].mxu0 }
0x1bef   : > { %v3973_v59 = vsel %vm1149_vm2, %v3972_v57, -inf }
0x1bf0   : > { %3974 = vmax.xlane.f32.xlu0 %v3973_v59 }
0x1c79   : > { %v3809_v60 = vpop.xlane.xlu1 %3808 }
0x1c7a   : > { %v3810_v61 = vsub.f32 %v3806_v53, %v3809_v60  ;;  %v8735_v60 = vld [vmem:[%s11152_s24 + $0x1] ss:$0 sm:$0xff]  ;;  %s11186_s24 = sld [smem:[#allocation31_spill]] }
0x1c7c   : > { %v3811_v62 = vmul.f32 1.442695, %v3810_v61  ;;  %v3599_v61 = vadd.f32 %v8735_v60, %v10550_v47 }
0x1c7d   : > { %v3975_v63 = vpop.xlane.xlu0 %3974 }
0x1c7e   : > { %9910 = vpow2.f32 %v3811_v62  ;;  %v3976_v0 = vsub.f32 %v3972_v57, %v3975_v63 }
0x1c80   : > { %v3977_v1 = vmul.f32 1.442695, %v3976_v0  ;;  %v3602_v0 = vadd.f32 %v3599_v61, %v10505_v27  ;;  %v8764_v61 = vld [vmem:[%s11176_s22] ss:$0 sm:$0xff] }
0x1c82   : > { %9912 = vpow2.f32 %v3977_v1  ;;  %v3722_v1 = vld [vmem:[%s11167_s16 + $0x18] sm:$0xff] }
0x1c88   : > { %v9911_v33 = vpop.eup %9910 }
0x1c89   : > { %v3813_v2 = vsel %vm1149_vm2, %v9911_v33, 0.0 }
0x1c8a   : > { %3814 = vadd.xlane.f32.xlu0 %v3813_v2 }
0x1c8c   : > { %v9913_v4 = vpop.eup %9912 }
0x1c8d   : > { %v3979_v5 = vsel %vm1149_vm2, %v9913_v4, 0.0 }
0x1c8e   : > { %3980 = vadd.xlane.f32.xlu1 %v3979_v5 }
0x1c9f   : > { %3984 = vrot.lane.b32.xlu1 %v10531_v42, %s11092_s28  ;;  %s11170_s28 = smov 40  }
0x1ca0   : > { %3818 = vrot.lane.b32.xlu0 %v10531_v42, %s11091_s1  ;;  %s11169_s1 = smov 48  }
0x1ca3   : > { %4208 = vrot.lane.b32.xlu1 %v10531_v42, %s11095_s2  ;;  %s11172_s2 = sld [smem:[#allocation21_spill]] }
0x1ca4   : > { %4206 = vrot.lane.b32.xlu0 %v10531_v42, %s11097_s7  ;;  %s11173_s7 = sld [smem:[#allocation19_spill]] }
0x1d17   : > { %v3815_v9 = vpop.xlane.xlu0 %3814 }
0x1d18   : > { %9914 = vrcp.f32 %v3815_v9 }
0x1d1b   : > { %v3981_v10 = vpop.xlane.xlu1 %3980  ;;  %v3819_v12 = vpop.permute.xlu0 %3818 }
0x1d1c   : > { %9916 = vrcp.f32 %v3981_v10  ;;  %9347 = vmatpush3.msra.mxu1 %v3819_v12 }
0x1d1d   : > { %9356 = vmatprep.subr.mxu1 %v10032_v6 }
0x1d1f   : > { %v3985_v15 = vpop.permute.xlu1 %3984  ;;  %v4207_v23 = vpop.permute.xlu0 %4206 }
0x1d22   : > { %v9915_v13 = vpop.eup %9914 }
0x1d23   : > { %v3817_v14 = vmul.f32 %v9915_v13, %v9911_v33  ;;  %v4209_v11 = vpop.permute.xlu1 %4208 }
0x1d25   : > { %9349 = vmatmul.mubr.msk.f32.vlgmr.msra.gmra.mrb[28].mxu1 %vm1149_vm2, %v3817_v14 }
0x1d26   : > { %v9917_v16 = vpop.eup %9916  ;;  %9357 = vmatpush3.msra.mxu1 %v3985_v15  ;;  %9358 = vmatprep.mubr.msk.f32.mxu1 %vm10031_vm0, %v10032_v6 }
0x1d27   : > { %v3983_v17 = vmul.f32 %v9917_v16, %v9913_v4  ;;  %9366 = vmatprep.subr.mxu1 %v10032_v6 }
0x1d29   : > { %9359 = vmatmul.mubr.msk.f32.vlgmr.msra.gmra.mrb[30].mxu1 %vm1149_vm2, %v3983_v17 }
0x1d2a   : > { %9368 = vmatprep.mubr.msk.f32.mxu1 %vm10031_vm0, %v10032_v6  ;;  %9367 = vmatpush3.msra.mxu1 %v3719_v18 }
0x1d2b   : > { %9376 = vmatprep.subr.mxu1 %v10032_v6 }
0x1df8   : > { %v3890_v19 = vpop.f32.mrb[28].mxu1 }
0x1df9   : > { %v9350_v20 = vpop.f32.mrb[29].mxu1  ;;  %9369 = vmatmul.mubr.msk.f32.vlgmr.msra.gmra.mrb[32].mxu1 %vm1149_vm2, %v3890_v19 }
0x1dfa   : > { %9378 = vmatprep.mubr.msk.f32.mxu1 %vm10031_vm0, %v10032_v6 }
0x1dfc   : > { %v4056_v21 = vpop.f32.mrb[30].mxu1 }
0x1dfd   : > { %v9360_v22 = vpop.f32.mrb[31].mxu1  ;;  %9364 = vmatmul.mubr.msk.f32.vlgmr.msra.gmra.mrb[38].mxu0 %vm1149_vm2, %v4056_v21 }
0x1dfe   : > { %9372 = vmatpush3.xpose.msk.msra.mxu0 %vm1149_vm2, %v4209_v11  ;;  %9373 = vmatprep.mubr.msk.f32.mxu0 %vm10031_vm0, %v10032_v6  ;;  %v4807_v22 = vld [vmem:[%s11172_s2] sm:$0xff] }
0x1dff   : > { %9381 = vmatprep.subr.mxu0 %v10032_v6 }
0x1e01   : > { %9374 = vmatmul.mubr.msk.f32.vlgmr.msra.gmra.mrb[40].mxu0 %vm1149_vm2, %v4207_v23  ;;  %v4808_v23 = vld [vmem:[%s11172_s2 + $0x8] sm:$0xff] }
0x1e02   : > { %9383 = vmatprep.mubr.msk.f32.mxu0 %vm10031_vm0, %v10032_v6  ;;  %9382 = vmatpush3.msra.mxu0 %v3721_v49  ;;  %v4725_v49 = vld [vmem:[%s11173_s7 + $0x10] sm:$0xff] }
0x1e03   : > { %9391 = vmatprep.subr.mxu0 %v10032_v6 }
0x1ecc   : > { %v4202_v24 = vpop.f32.mrb[32].mxu1 }
0x1ecd   : > { %v9370_v25 = vpop.f32.mrb[33].mxu1 }
0x1ece   : > { %v4809_v25 = vld [vmem:[%s11172_s2 + $0x10] sm:$0xff] }
0x1ed0   : > { %v4129_v26 = vpop.f32.mrb[38].mxu0 }
0x1ed1   : > { %v10595_v28 = vadd.f32 %v4202_v24, %v4129_v26  ;;  %v9365_v29 = vpop.f32.mrb[39].mxu0  ;;  %v9757_v24 = vpack.c.bf16 %v4808_v23, %v4807_v22  ;;  %v4810_v26 = vld [vmem:[%s11172_s2 + $0x18] sm:$0xff] }
0x1ed4   : > { %v4280_v30 = vpop.f32.mrb[40].mxu0 }
0x1ed5   : > { %v4284_v32 = vsel %vm10552_vm4, -1e+09, %v4280_v30  ;;  %v9375_v34 = vpop.f32.mrb[41].mxu0 }
0x1ed6   : > { %v4285_v35 = vsel %vm1149_vm2, %v4284_v32, -inf }
0x1ed7   : > { %4286 = vmax.xlane.f32.xlu1 %v4285_v35 }
0x1ee8   : > { %4448 = vrot.lane.b32.xlu1 %v10531_v42, %s11093_s10  ;;  %s11171_s10 = sld [smem:[#allocation18_spill]] }
0x1eec   : > { %4446 = vrot.lane.b32.xlu1 %v10531_v42, %s11168_s18 }
0x1eee   : > { %v8759_v13 = vld [vmem:[%s11171_s10] ss:$0 sm:$0xff] }
0x1f64   : > { %v4287_v37 = vpop.xlane.xlu1 %4286 }
0x1f65   : > { %v4288_v38 = vsub.f32 %v4284_v32, %v4287_v37 }
0x1f67   : > { %v4289_v39 = vmul.f32 1.442695, %v4288_v38 }
0x1f68   : > { %v4449_v45 = vpop.permute.xlu1 %4448 }
0x1f69   : > { %9918 = vpow2.f32 %v4289_v39 }
0x1f6c   : > { %v4447_v48 = vpop.permute.xlu1 %4446 }
0x1f73   : > { %v9919_v40 = vpop.eup %9918 }
0x1f74   : > { %v4291_v41 = vsel %vm1149_vm2, %v9919_v40, 0.0 }
0x1f75   : > { %4292 = vadd.xlane.f32.xlu0 %v4291_v41 }
0x1f8b   : > { %4296 = vrot.lane.b32.xlu0 %v10531_v42, %s11169_s1 }
0x2002   : > { %v4293_v8 = vpop.xlane.xlu0 %4292 }
0x2003   : > { %9920 = vrcp.f32 %v4293_v8  ;;  %v8740_v8 = vld [vmem:[%s11159_s6 + $0x1] ss:$0 sm:$0xff]  ;;  %s11179_s6 = smov 88  }
0x2006   : > { %v4297_v43 = vpop.permute.xlu0 %4296 }
0x2007   : > { %9377 = vmatpush3.msra.mxu1 %v4297_v43 }
0x2008   : > { %9386 = vmatprep.subr.mxu1 %v10032_v6 }
0x200d   : > { %v9921_v44 = vpop.eup %9920 }
0x200e   : > { %v4295_v46 = vmul.f32 %v9921_v44, %v9919_v40  ;;  %v8739_v40 = vld [vmem:[%s11149_s30 + $0x1] ss:$0 sm:$0xff]  ;;  %s11189_s30 = sld [smem:[#allocation29_spill]] }
0x2010   : > { %9379 = vmatmul.mubr.msk.f32.vlgmr.msra.gmra.mrb[34].mxu1 %vm1149_vm2, %v4295_v46  ;;  %v4724_v46 = vld [vmem:[%s11173_s7 + $0x8] sm:$0xff] }
0x2011   : > { %9387 = vmatpush3.xpose.msk.msra.mxu1 %vm1149_vm2, %v4449_v45  ;;  %9388 = vmatprep.mubr.msk.f32.mxu1 %vm10031_vm0, %v10032_v6  ;;  %v4723_v45 = vld [vmem:[%s11173_s7] sm:$0xff] }
0x2012   : > { %9396 = vmatprep.subr.mxu1 %v10032_v6 }
0x2014   : > { %9389 = vmatmul.mubr.msk.f32.vlgmr.msra.gmra.mrb[36].mxu1 %vm1149_vm2, %v4447_v48  ;;  %v9751_v48 = vpack.c.bf16 %v4724_v46, %v4723_v45 }
0x2015   : > { %9398 = vmatprep.mubr.msk.f32.mxu1 %vm10031_vm0, %v10032_v6  ;;  %9397 = vmatpush3.msra.mxu1 %v3722_v1 }
0x2016   : > { %9756 = vmatprep.subr.bf16.mxu1 %v10030_v3 }
0x20e3   : > { %v4368_v36 = vpop.f32.mrb[34].mxu1 }
0x20e4   : > { %v9380_v50 = vpop.f32.mrb[35].mxu1  ;;  %9384 = vmatmul.mubr.msk.f32.vlgmr.msra.gmra.mrb[42].mxu0 %vm1149_vm2, %v4368_v36  ;;  %v4726_v36 = vld [vmem:[%s11173_s7 + $0x18] sm:$0xff] }
0x20e5   : > { %9393 = vmatprep.mubr.msk.f32.mxu0 %vm10031_vm0, %v10032_v6  ;;  %v9754_v50 = vpack.c.bf16 %v4726_v36, %v4725_v49 }
0x20e7   : > { %v4520_v52 = vpop.f32.mrb[36].mxu1 }
0x20e8   : > { %v4524_v53 = vsel %vm10552_vm4, -1e+09, %v4520_v52  ;;  %v9390_v54 = vpop.f32.mrb[37].mxu1 }
0x20e9   : > { %v4525_v55 = vsel %vm1149_vm2, %v4524_v53, -inf }
0x20ea   : > { %4526 = vmax.xlane.f32.xlu0 %v4525_v55 }
0x2100   : > { %4536 = vrot.lane.b32.xlu0 %v10531_v42, %s11170_s28  ;;  %v3607_v42 = vsel %vm1067_vm1, %v3602_v0, 0.0 }
0x2177   : > { %v4527_v56 = vpop.xlane.xlu0 %4526 }
0x2178   : > { %v4528_v57 = vsub.f32 %v4524_v53, %v4527_v56  ;;  %v8760_v56 = vld [vmem:[%s11174_s23] ss:$0 sm:$0xff] }
0x217a   : > { %v4529_v58 = vmul.f32 1.442695, %v4528_v57 }
0x217b   : > { %v4537_v59 = vpop.permute.xlu0 %4536 }
0x217c   : > { %9922 = vpow2.f32 %v4529_v58  ;;  %9392 = vmatpush3.msra.mxu0 %v4537_v59  ;;  %v8761_v58 = vld [vmem:[%s11175_s26] ss:$0 sm:$0xff] }
0x217d   : > { %9750 = vmatprep.subr.bf16.mxu0 %v10030_v3 }
0x2186   : > { %v9923_v62 = vpop.eup %9922 }
0x2187   : > { %v4531_v63 = vsel %vm1149_vm2, %v9923_v62, 0.0 }
0x2188   : > { %4532 = vadd.xlane.f32.xlu1 %v4531_v63 }
0x218c   : > { %3608 = vadd.xlane.f32.xlu1 %v3607_v42  ;;  %v8762_v42 = vld [vmem:[%s11177_s3] ss:$0 sm:$0xff] }
0x21b7   : > { %v4441_v33 = vpop.f32.mrb[42].mxu0 }
0x21b8   : > { %v4445_v2 = vadd.f32 %v4441_v33, %v10595_v28  ;;  %v9385_v4 = vpop.f32.mrb[43].mxu0  ;;  %v9760_v28 = vpack.c.bf16 %v4810_v26, %v4809_v25 }
0x2215   : > { %v4533_v5 = vpop.xlane.xlu1 %4532 }
0x2216   : > { %9924 = vrcp.f32 %v4533_v5 }
0x2219   : > { %v3609_v10 = vpop.xlane.xlu1 %3608 }
0x221a   : > { %v3610_v12 = vmul.f32 0.03125, %v3609_v10 }
0x221c   : > { %v3611_v17 = vsub.f32 %v3602_v0, %v3610_v12 }
0x221e   : > { %v3612_v21 = vmul.f32 %v3611_v17, %v3611_v17 }
0x2220   : > { %v9925_v47 = vpop.eup %9924  ;;  %v3613_v11 = vsel %vm1067_vm1, %v3612_v21, 0.0 }
0x2221   : > { %v4535_v7 = vmul.f32 %v9925_v47, %v9923_v62 }
0x2223   : > { %9394 = vmatmul.mubr.msk.f32.vlgmr.msra.gmra.mrb[44].mxu0 %vm1149_vm2, %v4535_v7 }
0x2224   : > { %9409 = vmatprep.mubr.msk.f32.mxu0 %vm10031_vm0, %v10032_v6  ;;  %9752 = vmatpush3.bf16.msra.mxu0 %v9751_v48 }
0x2225   : > { %9753 = vmatprep.subr.bf16.mxu0 %v10030_v3 }
0x2228   : > { %9755 = vmatpush3.bf16.msra.mxu0 %v9754_v50 }
0x2229   : > { %9423 = vmatprep.subr.mxu0 %v10032_v6 }
0x22f6   : > { %v4608_v27 = vpop.f32.mrb[44].mxu0 }
0x22f7   : > { %v9395_v9 = vpop.f32.mrb[45].mxu0  ;;  %9399 = vmatmul.mubr.msk.f32.vlgmr.msra.gmra.mrb[38].mxu1 %vm1149_vm2, %v4608_v27 }
0x22f8   : > { %9420 = vmatprep.mubr.msk.f32.mxu1 %vm10031_vm0, %v10032_v6  ;;  %9758 = vmatpush3.bf16.msra.mxu1 %v9757_v24 }
0x22f9   : > { %9759 = vmatprep.subr.bf16.mxu1 %v10030_v3 }
0x22fc   : > { %9761 = vmatpush3.bf16.msra.mxu1 %v9760_v28 }
0x22fd   : > { %9428 = vmatprep.subr.mxu1 %v10032_v6 }
0x23ca   : > { %v4681_v14 = vpop.f32.mrb[38].mxu1 }
0x23cb   : > { %v4685_v15 = vadd.f32 %v4681_v14, %v4445_v2  ;;  %v9400_v16 = vpop.f32.mrb[39].mxu1 }
0x23cd   : > { %v4692_v18 = vadd.f32 %v8759_v13, %v4685_v15 }
0x23cf   : > { %v4693_v19 = vadd.f32 %v4692_v18, %v10516_v31 }
0x23d1   : > { %v4696_v20 = vsel %vm1067_vm1, %v4693_v19, 0.0 }
0x23d2   : > { %4697 = vadd.xlane.f32.xlu1 %v4696_v20 }
0x23d6   : > { %3614 = vadd.xlane.f32.xlu1 %v3613_v11 }
0x245f   : > { %v4698_v31 = vpop.xlane.xlu1 %4697 }
0x2460   : > { %v4699_v29 = vmul.f32 0.03125, %v4698_v31 }
0x2462   : > { %v4700_v30 = vsub.f32 %v4693_v19, %v4699_v29 }
0x2463   : > { %v3615_v32 = vpop.xlane.xlu1 %3614 }
0x2464   : > { %v3616_v34 = vmul.f32 0.03125, %v3615_v32  ;;  %v4701_v35 = vmul.f32 %v4700_v30, %v4700_v30  ;;  %v4892_v32 = vld [vmem:[%s11182_s14 + $0x8] sm:$0xff] }
0x2466   : > { %v3617_v37 = vadd.f32 1e-05, %v3616_v34  ;;  %v4702_v38 = vsel %vm1067_vm1, %v4701_v35, 0.0 }
0x2467   : > { %4703 = vadd.xlane.f32.xlu1 %v4702_v38 }
0x2468   : > { %9926 = vrsqrt.f32 %v3617_v37 }
0x2472   : > { %v9927_v39 = vpop.eup %9926 }
0x2473   : > { %v3619_v41 = vmul.f32 %v9927_v39, %v3611_v17 }
0x2475   : > { %v3626_v43 = vmul.f32 %v8739_v40, %v3619_v41 }
0x2477   : > { %v10654_v44 = vadd.f32 %v8740_v8, %v3626_v43 }
0x2479   : > { %9421 = vmatmul.mubr.msk.f32.vlgmr.msra.gmra.mrb[40].mxu1 %vm1067_vm1, %v10654_v44 }
0x247a   : > { %9430 = vmatprep.mubr.msk.f32.mxu1 %vm10031_vm0, %v10032_v6 }
0x24f4   : > { %v4704_v52 = vpop.xlane.xlu1 %4703 }
0x24f5   : > { %v4705_v53 = vmul.f32 0.03125, %v4704_v52 }
0x24f7   : > { %v4706_v54 = vadd.f32 1e-05, %v4705_v53 }
0x24f9   : > { %9928 = vrsqrt.f32 %v4706_v54 }
0x2503   : > { %v9929_v55 = vpop.eup %9928 }
0x2504   : > { %v4708_v57 = vmul.f32 %v9929_v55, %v4700_v30  ;;  %v4891_v30 = vld [vmem:[%s11182_s14] sm:$0xff] }
0x2506   : > { %v4715_v59 = vmul.f32 %v8760_v56, %v4708_v57 }
0x2508   : > { %v10668_v60 = vadd.f32 %v8761_v58, %v4715_v59 }
0x250a   : > { %9410 = vmatmul.mubr.msk.f32.vlgmr.msra.gmra.mrb[46].mxu0 %vm1067_vm1, %v10668_v60 }
0x250b   : > { %9425 = vmatprep.mubr.msk.f32.mxu0 %vm10031_vm0, %v10032_v6 }
0x254c   : > { %v4887_v62 = vpop.f32.mrb[40].mxu1 }
0x254d   : > { %v10675_v63 = vadd.f32 %v8764_v61, %v4887_v62  ;;  %v9422_v0 = vpop.f32.mrb[41].mxu1 }
0x254e   : > { %v4893_v0 = vld [vmem:[%s11182_s14 + $0x10] sm:$0xff] }
0x254f   : > { %5061 = vrot.lane.b32.xlu1 %v10675_v63, %s11178_s5  ;;  %9424 = vmatpush3.xpose.msk.msra.mxu0 %vm1149_vm2, %v10675_v63 }
0x2550   : > { %9433 = vmatprep.subr.mxu0 %v10032_v6 }
0x25c1   : > { %v5062_v4 = vpop.permute.xlu1 %5061 }
0x25dd   : > { %v4803_v1 = vpop.f32.mrb[46].mxu0 }
0x25de   : > { %v10683_v33 = vadd.f32 %v8762_v42, %v4803_v1  ;;  %v9411_v2 = vpop.f32.mrb[47].mxu0 }
0x25e0   : > { %5059 = vrot.lane.b32.xlu0 %v10683_v33, %s11178_s5  ;;  %9426 = vmatmul.mubr.msk.f32.vlgmr.msra.gmra.mrb[48].mxu0 %vm1149_vm2, %v10683_v33 }
0x25e1   : > { %9434 = vmatpush3.xpose.msk.msra.mxu0 %vm1149_vm2, %v5062_v4  ;;  %9435 = vmatprep.mubr.msk.f32.mxu0 %vm10031_vm0, %v10032_v6 }
0x25e2   : > { %9443 = vmatprep.subr.mxu0 %v10032_v6 }
0x2652   : > { %v5060_v5 = vpop.permute.xlu0 %5059 }
0x2653   : > { %9436 = vmatmul.mubr.msk.f32.vlgmr.msra.gmra.mrb[50].mxu0 %vm1149_vm2, %v5060_v5 }
0x2654   : > { %9445 = vmatprep.mubr.msk.f32.mxu0 %vm10031_vm0, %v10032_v6  ;;  %9444 = vmatpush3.msra.mxu0 %v4892_v32  ;;  %v5885_v32 = vld [vmem:[%s11186_s24] sm:$0xff] }
0x2655   : > { %9453 = vmatprep.subr.mxu0 %v10032_v6 }
0x26b3   : > { %v4968_v47 = vpop.f32.mrb[48].mxu0 }
0x26b4   : > { %v9427_v7 = vpop.f32.mrb[49].mxu0  ;;  %v4972_v27 = vsel %vm1149_vm2, %v4968_v47, -inf }
0x26b5   : > { %4973 = vmax.xlane.f32.xlu0 %v4972_v27 }
0x2726   : > { %v5133_v9 = vpop.f32.mrb[50].mxu0 }
0x2727   : > { %v9437_v10 = vpop.f32.mrb[51].mxu0  ;;  %v5137_v12 = vsel %vm1149_vm2, %v5133_v9, -inf }
0x2728   : > { %5138 = vmax.xlane.f32.xlu1 %v5137_v12  ;;  %v4894_v12 = vld [vmem:[%s11182_s14 + $0x18] sm:$0xff] }
0x2739   : > { %5148 = vrot.lane.b32.xlu1 %v10675_v63, %s11179_s6 }
0x2742   : > { %v4974_v13 = vpop.xlane.xlu0 %4973 }
0x2743   : > { %v4975_v14 = vsub.f32 %v4968_v47, %v4974_v13 }
0x2745   : > { %v4976_v15 = vmul.f32 1.442695, %v4975_v14 }
0x2747   : > { %9930 = vpow2.f32 %v4976_v15 }
0x2751   : > { %v9931_v16 = vpop.eup %9930 }
0x2752   : > { %v4978_v17 = vsel %vm1149_vm2, %v9931_v16, 0.0 }
0x2753   : > { %4979 = vadd.xlane.f32.xlu0 %v4978_v17 }
0x27b5   : > { %v5139_v18 = vpop.xlane.xlu1 %5138 }
0x27b6   : > { %v5140_v19 = vsub.f32 %v5133_v9, %v5139_v18 }
0x27b8   : > { %v5141_v20 = vmul.f32 1.442695, %v5140_v19 }
0x27b9   : > { %v5149_v28 = vpop.permute.xlu1 %5148 }
0x27ba   : > { %9932 = vpow2.f32 %v5141_v20  ;;  %v8782_v20 = vld [vmem:[%s11185_s21] ss:$0 sm:$0xff] }
0x27c4   : > { %v9933_v21 = vpop.eup %9932 }
0x27c5   : > { %v5143_v11 = vsel %vm1149_vm2, %v9933_v21, 0.0 }
0x27c6   : > { %5144 = vadd.xlane.f32.xlu0 %v5143_v11 }
0x27dc   : > { %4983 = vrot.lane.b32.xlu0 %v10675_v63, %s11180_s8 }
0x27e0   : > { %5372 = vrot.lane.b32.xlu0 %v10675_v63, %s11181_s13  ;;  %v4980_v22 = vpop.xlane.xlu0 %4979 }
0x27e1   : > { %9934 = vrcp.f32 %v4980_v22 }
0x27e4   : > { %5370 = vrot.lane.b32.xlu0 %v10683_v33, %s11181_s13 }
0x27eb   : > { %v9935_v24 = vpop.eup %9934 }
0x27ec   : > { %v4982_v25 = vmul.f32 %v9935_v24, %v9931_v16 }
0x2853   : > { %v5145_v23 = vpop.xlane.xlu0 %5144 }
0x2854   : > { %9936 = vrcp.f32 %v5145_v23 }
0x2857   : > { %v4984_v26 = vpop.permute.xlu0 %4983 }
0x2858   : > { %9429 = vmatpush3.msra.mxu1 %v4984_v26 }
0x2859   : > { %9431 = vmatmul.mubr.msk.f32.vlgmr.msra.gmra.mrb[42].mxu1 %vm1149_vm2, %v4982_v25  ;;  %9438 = vmatprep.subr.mxu1 %v10032_v6 }
0x285a   : > { %9439 = vmatpush3.msra.mxu1 %v5149_v28  ;;  %9440 = vmatprep.mubr.msk.f32.mxu1 %vm10031_vm0, %v10032_v6 }
0x285b   : > { %9448 = vmatprep.subr.mxu1 %v10032_v6  ;;  %v5373_v37 = vpop.permute.xlu0 %5372 }
0x285e   : > { %v9937_v31 = vpop.eup %9936 }
0x285f   : > { %v5147_v29 = vmul.f32 %v9937_v31, %v9933_v21  ;;  %v5371_v40 = vpop.permute.xlu0 %5370 }
0x2861   : > { %9441 = vmatmul.mubr.msk.f32.vlgmr.msra.gmra.mrb[44].mxu1 %vm1149_vm2, %v5147_v29 }
0x2862   : > { %9450 = vmatprep.mubr.msk.f32.mxu1 %vm10031_vm0, %v10032_v6  ;;  %9449 = vmatpush3.msra.mxu1 %v4891_v30 }
0x2863   : > { %9458 = vmatprep.subr.mxu1 %v10032_v6 }
0x292c   : > { %v5055_v34 = vpop.f32.mrb[42].mxu1 }
0x292d   : > { %v9432_v35 = vpop.f32.mrb[43].mxu1  ;;  %9451 = vmatmul.mubr.msk.f32.vlgmr.msra.gmra.mrb[46].mxu1 %vm1149_vm2, %v5055_v34  ;;  %v5886_v34 = vld [vmem:[%s11186_s24 + $0x8] sm:$0xff] }
0x292e   : > { %9460 = vmatprep.mubr.msk.f32.mxu1 %vm10031_vm0, %v10032_v6  ;;  %v9763_v35 = vpack.c.bf16 %v5886_v34, %v5885_v32 }
0x2934   : > { %v5220_v38 = vpop.f32.mrb[44].mxu1 }
0x2935   : > { %v9442_v39 = vpop.f32.mrb[45].mxu1  ;;  %9446 = vmatmul.mubr.msk.f32.vlgmr.msra.gmra.mrb[52].mxu0 %vm1149_vm2, %v5220_v38 }
0x2936   : > { %9454 = vmatpush3.xpose.msk.msra.mxu0 %vm1149_vm2, %v5373_v37  ;;  %9455 = vmatprep.mubr.msk.f32.mxu0 %vm10031_vm0, %v10032_v6  ;;  %v5888_v37 = vld [vmem:[%s11186_s24 + $0x18] sm:$0xff]  ;;  %v5969_v39 = vld [vmem:[%s10212_s27] sm:$0xff] }
0x2937   : > { %9463 = vmatprep.subr.mxu0 %v10032_v6 }
0x2939   : > { %9456 = vmatmul.mubr.msk.f32.vlgmr.msra.gmra.mrb[54].mxu0 %vm1149_vm2, %v5371_v40  ;;  %v5970_v40 = vld [vmem:[%s10212_s27 + $0x8] sm:$0xff] }
0x293a   : > { %9465 = vmatprep.mubr.msk.f32.mxu0 %vm10031_vm0, %v10032_v6  ;;  %9464 = vmatpush3.msra.mxu0 %v4893_v0  ;;  %v8785_v0 = vld [vmem:[%s10207_s20] ss:$0 sm:$0xff] }
0x293b   : > { %9473 = vmatprep.subr.mxu0 %v10032_v6 }
0x2a00   : > { %v5366_v41 = vpop.f32.mrb[46].mxu1 }
0x2a01   : > { %v9452_v8 = vpop.f32.mrb[47].mxu1 }
0x2a02   : > { %v9769_v8 = vpack.c.bf16 %v5970_v40, %v5969_v39 }
0x2a08   : > { %v5293_v43 = vpop.f32.mrb[52].mxu0 }
0x2a09   : > { %v5367_v45 = vadd.f32 %v5366_v41, %v5293_v43  ;;  %v9447_v46 = vpop.f32.mrb[53].mxu0  ;;  %v5971_v41 = vld [vmem:[%s10212_s27 + $0x10] sm:$0xff]  ;;  %v5972_v43 = vld [vmem:[%s10212_s27 + $0x18] sm:$0xff] }
0x2a0a   : > { %v5973_v46 = vld [vmem:[%s10212_s27 + $0x20] sm:$0xff] }
0x2a0c   : > { %v5444_v48 = vpop.f32.mrb[54].mxu0 }
0x2a0d   : > { %v9457_v49 = vpop.f32.mrb[55].mxu0  ;;  %v5448_v36 = vsel %vm1149_vm2, %v5444_v48, -inf }
0x2a0e   : > { %5449 = vmax.xlane.f32.xlu1 %v5448_v36 }
0x2a1f   : > { %5611 = vrot.lane.b32.xlu1 %v10675_v63, %s11168_s18 }
0x2a23   : > { %5609 = vrot.lane.b32.xlu1 %v10683_v33, %s11168_s18 }
0x2a9b   : > { %v5450_v50 = vpop.xlane.xlu1 %5449 }
0x2a9c   : > { %v5451_v52 = vsub.f32 %v5444_v48, %v5450_v50  ;;  %v5974_v48 = vld [vmem:[%s10212_s27 + $0x28] sm:$0xff] }
0x2a9d   : > { %v9775_v49 = vpack.c.bf16 %v5974_v48, %v5973_v46 }
0x2a9e   : > { %v5452_v53 = vmul.f32 1.442695, %v5451_v52 }
0x2a9f   : > { %v5612_v59 = vpop.permute.xlu1 %5611 }
0x2aa0   : > { %9938 = vpow2.f32 %v5452_v53 }
0x2aa3   : > { %v5610_v62 = vpop.permute.xlu1 %5609 }
0x2aaa   : > { %v9939_v54 = vpop.eup %9938 }
0x2aab   : > { %v5454_v55 = vsel %vm1149_vm2, %v9939_v54, 0.0 }
0x2aac   : > { %5455 = vadd.xlane.f32.xlu0 %v5454_v55 }
0x2ac2   : > { %5459 = vrot.lane.b32.xlu0 %v10675_v63, %s11183_s17 }
0x2b39   : > { %v5456_v56 = vpop.xlane.xlu0 %5455 }
0x2b3a   : > { %9940 = vrcp.f32 %v5456_v56  ;;  %v8784_v56 = vld [vmem:[%s11188_s29] ss:$0 sm:$0xff] }
0x2b3d   : > { %v5460_v57 = vpop.permute.xlu0 %5459 }
0x2b3e   : > { %9459 = vmatpush3.msra.mxu1 %v5460_v57 }
0x2b3f   : > { %9468 = vmatprep.subr.mxu1 %v10032_v6 }
0x2b44   : > { %v9941_v58 = vpop.eup %9940 }
0x2b45   : > { %v5458_v61 = vmul.f32 %v9941_v58, %v9939_v54  ;;  %v8783_v54 = vld [vmem:[%s11187_s25] ss:$0 sm:$0xff] }
0x2b47   : > { %9461 = vmatmul.mubr.msk.f32.vlgmr.msra.gmra.mrb[48].mxu1 %vm1149_vm2, %v5458_v61  ;;  %v5976_v61 = vld [vmem:[%s10212_s27 + $0x38] sm:$0xff] }
0x2b48   : > { %9469 = vmatpush3.xpose.msk.msra.mxu1 %vm1149_vm2, %v5612_v59  ;;  %9470 = vmatprep.mubr.msk.f32.mxu1 %vm10031_vm0, %v10032_v6  ;;  %v5975_v59 = vld [vmem:[%s10212_s27 + $0x30] sm:$0xff] }
0x2b49   : > { %9478 = vmatprep.subr.mxu1 %v10032_v6 }
0x2b4b   : > { %9471 = vmatmul.mubr.msk.f32.vlgmr.msra.gmra.mrb[50].mxu1 %vm1149_vm2, %v5610_v62  ;;  %v9778_v62 = vpack.c.bf16 %v5976_v61, %v5975_v59 }
0x2b4c   : > { %9480 = vmatprep.mubr.msk.f32.mxu1 %vm10031_vm0, %v10032_v6  ;;  %9479 = vmatpush3.msra.mxu1 %v4894_v12 }
0x2b4d   : > { %9768 = vmatprep.subr.bf16.mxu1 %v10030_v3 }
0x2c1a   : > { %v5531_v42 = vpop.f32.mrb[48].mxu1 }
0x2c1b   : > { %v9462_v1 = vpop.f32.mrb[49].mxu1  ;;  %9466 = vmatmul.mubr.msk.f32.vlgmr.msra.gmra.mrb[56].mxu0 %vm1149_vm2, %v5531_v42 }
0x2c1c   : > { %9475 = vmatprep.mubr.msk.f32.mxu0 %vm10031_vm0, %v10032_v6 }
0x2c1e   : > { %v5683_v33 = vpop.f32.mrb[50].mxu1 }
0x2c1f   : > { %v9472_v2 = vpop.f32.mrb[51].mxu1  ;;  %v5687_v4 = vsel %vm1149_vm2, %v5683_v33, -inf }
0x2c20   : > { %5688 = vmax.xlane.f32.xlu0 %v5687_v4  ;;  %v8787_v2 = vld [vmem:[%s10217_s4] ss:$0 sm:$0xff] }
0x2c36   : > { %5698 = vrot.lane.b32.xlu0 %v10675_v63, %s11184_s19 }
0x2cad   : > { %v5689_v5 = vpop.xlane.xlu0 %5688 }
0x2cae   : > { %v5690_v47 = vsub.f32 %v5683_v33, %v5689_v5 }
0x2cb0   : > { %v5691_v7 = vmul.f32 1.442695, %v5690_v47 }
0x2cb1   : > { %v5699_v27 = vpop.permute.xlu0 %5698 }
0x2cb2   : > { %9942 = vpow2.f32 %v5691_v7  ;;  %9474 = vmatpush3.msra.mxu0 %v5699_v27 }
0x2cb3   : > { %9762 = vmatprep.subr.bf16.mxu0 %v10030_v3 }
0x2cbc   : > { %v9943_v9 = vpop.eup %9942 }
0x2cbd   : > { %v5693_v10 = vsel %vm1149_vm2, %v9943_v9, 0.0 }
0x2cbe   : > { %5694 = vadd.xlane.f32.xlu1 %v5693_v10 }
0x2cee   : > { %v5604_v13 = vpop.f32.mrb[56].mxu0 }
0x2cef   : > { %v5608_v14 = vadd.f32 %v5604_v13, %v5367_v45  ;;  %v9467_v63 = vpop.f32.mrb[57].mxu0  ;;  %v9772_v45 = vpack.c.bf16 %v5972_v43, %v5971_v41 }
0x2cf0   : > { %v8791_v63 = vld [vmem:[%s10122_s12 + $0x20] sm:$0xff] }
0x2d4b   : > { %v5695_v15 = vpop.xlane.xlu1 %5694 }
0x2d4c   : > { %9944 = vrcp.f32 %v5695_v15  ;;  %v8792_v15 = vld [vmem:[%s10122_s12 + $0x28] sm:$0xff] }
0x2d56   : > { %v9945_v16 = vpop.eup %9944 }
0x2d57   : > { %v5697_v17 = vmul.f32 %v9945_v16, %v9943_v9  ;;  %v9781_v16 = vpack.c.bf16 %v8792_v15, %v8791_v63 }
0x2d59   : > { %9476 = vmatmul.mubr.msk.f32.vlgmr.msra.gmra.mrb[58].mxu0 %vm1149_vm2, %v5697_v17  ;;  %v8793_v17 = vld [vmem:[%s10122_s12 + $0x30] sm:$0xff] }
0x2d5a   : > { %9491 = vmatprep.mubr.msk.f32.mxu0 %vm10031_vm0, %v10032_v6  ;;  %9764 = vmatpush3.bf16.msra.mxu0 %v9763_v35 }
0x2d5b   : > { %9765 = vmatprep.subr.bf16.mxu0 %v10030_v3 }
0x2e2c   : > { %v5770_v18 = vpop.f32.mrb[58].mxu0 }
0x2e2d   : > { %v9477_v19 = vpop.f32.mrb[59].mxu0  ;;  %9481 = vmatmul.mubr.msk.f32.vlgmr.msra.gmra.mrb[52].mxu1 %vm1149_vm2, %v5770_v18  ;;  %v8794_v18 = vld [vmem:[%s10122_s12 + $0x38] sm:$0xff] }
0x2e2e   : > { %9510 = vmatprep.mubr.msk.f32.mxu1 %vm10031_vm0, %v10032_v6  ;;  %9770 = vmatpush3.bf16.msra.mxu1 %v9769_v8  ;;  %v9784_v19 = vpack.c.bf16 %v8794_v18, %v8793_v17 }
0x2e2f   : > { %9771 = vmatprep.subr.bf16.mxu1 %v10030_v3 }
0x2e32   : > { %9773 = vmatpush3.bf16.msra.mxu1 %v9772_v45 }
0x2e33   : > { %9774 = vmatprep.subr.bf16.mxu1 %v10030_v3 }
0x2e36   : > { %9776 = vmatpush3.bf16.msra.mxu1 %v9775_v49 }
0x2e37   : > { %9777 = vmatprep.subr.bf16.mxu1 %v10030_v3 }
0x2e3a   : > { %9779 = vmatpush3.bf16.msra.mxu1 %v9778_v62 }
0x2e3b   : > { %9529 = vmatprep.subr.mxu1 %v10032_v6 }
0x2f00   : > { %v5843_v21 = vpop.f32.mrb[52].mxu1 }
0x2f01   : > { %v5847_v11 = vadd.f32 %v5843_v21, %v5608_v14  ;;  %v9482_v22 = vpop.f32.mrb[53].mxu1 }
0x2f03   : > { %v5854_v23 = vadd.f32 %v8782_v20, %v5847_v11 }
0x2f05   : > { %v5855_v24 = vadd.f32 %v5854_v23, %v10668_v60  ;;  %v5887_v60 = vld [vmem:[%s11186_s24 + $0x10] sm:$0xff]  ;;  %v8789_v23 = vld [vmem:[%s11189_s30] ss:$0 sm:$0xff] }
0x2f06   : > { %v9766_v38 = vpack.c.bf16 %v5888_v37, %v5887_v60 }
0x2f07   : > { %v5858_v25 = vsel %vm1067_vm1, %v5855_v24, 0.0 }
0x2f08   : > { %5859 = vadd.xlane.f32.xlu1 %v5858_v25  ;;  %9767 = vmatpush3.bf16.msra.mxu0 %v9766_v38  ;;  %v8790_v25 = vld [vmem:[%s11190_s15] ss:$0 sm:$0xff]  ;;  %s11192_s15 = smov 56  }
0x2f09   : > { %9780 = vmatprep.subr.bf16.mxu0 %v10030_v3 }
0x2f95   : > { %v5860_v26 = vpop.xlane.xlu1 %5859 }
0x2f96   : > { %v5861_v28 = vmul.f32 0.03125, %v5860_v26 }
0x2f98   : > { %v5862_v31 = vsub.f32 %v5855_v24, %v5861_v28 }
0x2f9a   : > { %v5863_v29 = vmul.f32 %v5862_v31, %v5862_v31 }
0x2f9c   : > { %v5864_v30 = vsel %vm1067_vm1, %v5863_v29, 0.0 }
0x2f9d   : > { %5865 = vadd.xlane.f32.xlu1 %v5864_v30 }
0x302a   : > { %v5866_v36 = vpop.xlane.xlu1 %5865 }
0x302b   : > { %v5867_v50 = vmul.f32 0.03125, %v5866_v36 }
0x302d   : > { %v5868_v52 = vadd.f32 1e-05, %v5867_v50 }
0x302f   : > { %9946 = vrsqrt.f32 %v5868_v52 }
0x3039   : > { %v9947_v53 = vpop.eup %9946 }
0x303a   : > { %v5870_v55 = vmul.f32 %v9947_v53, %v5862_v31  ;;  %v8796_v31 = vld [vmem:[%s11164_s11 + $0x1] ss:$0 sm:$0xff] }
0x303c   : > { %v5877_v57 = vmul.f32 %v8783_v54, %v5870_v55 }
0x303e   : > { %v5884_v58 = vadd.f32 %v8784_v56, %v5877_v57  ;;  %v8799_v57 = vld [vmem:[%s11167_s16 + $0x28] sm:$0xff] }
0x3040   : > { %9492 = vmatmul.mubr.msk.f32.vlgmr.msra.gmra.mrb[60].mxu0 %vm1067_vm1, %v5884_v58 }
0x3041   : > { %9521 = vmatprep.mubr.msk.f32.mxu0 %vm10031_vm0, %v10032_v6  ;;  %9782 = vmatpush3.bf16.msra.mxu0 %v9781_v16 }
0x3042   : > { %9783 = vmatprep.subr.bf16.mxu0 %v10030_v3 }
0x3045   : > { %9785 = vmatpush3.bf16.msra.mxu0 %v9784_v19 }
0x3046   : > { %9524 = vmatprep.subr.mxu0 %v10032_v6 }
0x3113   : > { %v5965_v42 = vpop.f32.mrb[60].mxu0 }
0x3114   : > { %v5966_v1 = vadd.f32 %v8785_v0, %v5965_v42  ;;  %v9493_v33 = vpop.f32.mrb[61].mxu0 }
0x3116   : > { %9511 = vmatmul.mubr.msk.f32.vlgmr.msra.gmra.mrb[54].mxu1 %vm2237_vm3, %v5966_v1 }
0x3117   : > { %9531 = vmatprep.mubr.msk.f32.mxu1 %vm10031_vm0, %v10032_v6 }
0x31e9   : > { %v6053_v4 = vpop.f32.mrb[54].mxu1 }
0x31ea   : > { %v6054_v5 = vadd.f32 %v8787_v2, %v6053_v4  ;;  %v9512_v47 = vpop.f32.mrb[55].mxu1  ;;  %v8798_v2 = vld [vmem:[%s11167_s16 + $0x20] sm:$0xff] }
0x31ec   : > { %v6057_v7 = vadd.f32 %v6054_v5, %v5884_v58 }
0x31ee   : > { %v6060_v27 = vsel %vm1067_vm1, %v6057_v7, 0.0 }
0x31ef   : > { %6061 = vadd.xlane.f32.xlu1 %v6060_v27 }
0x327c   : > { %v6062_v9 = vpop.xlane.xlu1 %6061 }
0x327d   : > { %v6063_v10 = vmul.f32 0.03125, %v6062_v9 }
0x327f   : > { %v6064_v12 = vsub.f32 %v6057_v7, %v6063_v10 }
0x3281   : > { %v6065_v13 = vmul.f32 %v6064_v12, %v6064_v12 }
0x3283   : > { %v6066_v14 = vsel %vm1067_vm1, %v6065_v13, 0.0 }
0x3284   : > { %6067 = vadd.xlane.f32.xlu1 %v6066_v14 }
0x3311   : > { %v6068_v20 = vpop.xlane.xlu1 %6067 }
0x3312   : > { %v6069_v21 = vmul.f32 0.03125, %v6068_v20 }
0x3314   : > { %v6070_v11 = vadd.f32 1e-05, %v6069_v21 }
0x3316   : > { %9948 = vrsqrt.f32 %v6070_v11 }
0x3320   : > { %v9949_v22 = vpop.eup %9948 }
0x3321   : > { %v6072_v24 = vmul.f32 %v9949_v22, %v6064_v12 }
0x3323   : > { %v6079_v26 = vmul.f32 %v8789_v23, %v6072_v24 }
0x3325   : > { %v10808_v28 = vadd.f32 %v8790_v25, %v6079_v26 }
0x3327   : > { %9522 = vmatmul.mubr.msk.f32.vlgmr.msra.gmra.mrb[62].mxu0 %vm1067_vm1, %v10808_v28 }
0x3328   : > { %9526 = vmatprep.mubr.msk.f32.mxu0 %vm10031_vm0, %v10032_v6 }
0x33fa   : > { %v6169_v29 = vpop.f32.mrb[62].mxu0 }
0x33fb   : > { %v10815_v30 = vadd.f32 %v8796_v31, %v6169_v29  ;;  %v9523_v32 = vpop.f32.mrb[63].mxu0 }
0x33fc   : > { %v8800_v32 = vld [vmem:[%s11167_s16 + $0x30] sm:$0xff] }
0x33fd   : > { %6347 = vrot.lane.b32.xlu0 %v10815_v30, %s11179_s6  ;;  %6181 = vrot.lane.b32.xlu1 %v10815_v30, %s11180_s8 }
0x3401   : > { %6345 = vrot.lane.b32.xlu0 %v10815_v30, %s11178_s5 }
0x346f   : > { %v6182_v34 = vpop.permute.xlu1 %6181  ;;  %v6348_v35 = vpop.permute.xlu0 %6347 }
0x3470   : > { %9525 = vmatpush3.xpose.msk.msra.mxu0 %vm1149_vm2, %v6182_v34 }
0x3471   : > { %9534 = vmatprep.subr.mxu0 %v10032_v6 }
0x3473   : > { %9527 = vmatmul.mubr.msk.f32.vlgmr.msra.gmra.mrb[64].mxu0 %vm1149_vm2, %v10815_v30  ;;  %v6346_v60 = vpop.permute.xlu0 %6345 }
0x3474   : > { %9535 = vmatpush3.xpose.msk.msra.mxu0 %vm1149_vm2, %v6348_v35  ;;  %9536 = vmatprep.mubr.msk.f32.mxu0 %vm10031_vm0, %v10032_v6 }
0x3475   : > { %9544 = vmatprep.subr.mxu0 %v10032_v6 }
0x3477   : > { %9537 = vmatmul.mubr.msk.f32.vlgmr.msra.gmra.mrb[66].mxu0 %vm1149_vm2, %v6346_v60 }
0x3478   : > { %9546 = vmatprep.mubr.msk.f32.mxu0 %vm10031_vm0, %v10032_v6  ;;  %9545 = vmatpush3.msra.mxu0 %v8799_v57  ;;  %v8834_v57 = vld [vmem:[%s11172_s2 + $0x38] sm:$0xff] }
0x3479   : > { %9554 = vmatprep.subr.mxu0 %v10032_v6 }
0x3546   : > { %v6253_v37 = vpop.f32.mrb[64].mxu0 }
0x3547   : > { %v6257_v38 = vsel %vm10552_vm4, -1e+09, %v6253_v37  ;;  %v9528_v39 = vpop.f32.mrb[65].mxu0 }
0x3548   : > { %v6258_v40 = vsel %vm1149_vm2, %v6257_v38, -inf }
0x3549   : > { %6259 = vmax.xlane.f32.xlu0 %v6258_v40 }
0x354a   : > { %v6419_v41 = vpop.f32.mrb[66].mxu0 }
0x354b   : > { %v6423_v8 = vsel %vm10552_vm4, -1e+09, %v6419_v41  ;;  %v9538_v43 = vpop.f32.mrb[67].mxu0 }
0x354c   : > { %v6424_v45 = vsel %vm1149_vm2, %v6423_v8, -inf }
0x354d   : > { %6425 = vmax.xlane.f32.xlu1 %v6424_v45 }
0x355e   : > { %6435 = vrot.lane.b32.xlu1 %v10815_v30, %s11192_s15  ;;  %s11193_s15 = smov 64  }
0x3562   : > { %6657 = vrot.lane.b32.xlu1 %v10815_v30, %s11181_s13 }
0x35d6   : > { %v6260_v46 = vpop.xlane.xlu0 %6259 }
0x35d7   : > { %v6261_v48 = vsub.f32 %v6257_v38, %v6260_v46  ;;  %v8801_v46 = vld [vmem:[%s11167_s16 + $0x38] sm:$0xff] }
0x35d9   : > { %v6262_v49 = vmul.f32 1.442695, %v6261_v48 }
0x35da   : > { %v6426_v36 = vpop.xlane.xlu1 %6425 }
0x35db   : > { %9950 = vpow2.f32 %v6262_v49  ;;  %v6427_v50 = vsub.f32 %v6423_v8, %v6426_v36 }
0x35dd   : > { %v6428_v52 = vmul.f32 1.442695, %v6427_v50 }
0x35de   : > { %v6436_v42 = vpop.permute.xlu1 %6435 }
0x35df   : > { %9952 = vpow2.f32 %v6428_v52 }
0x35e2   : > { %v6658_v9 = vpop.permute.xlu1 %6657 }
0x35e5   : > { %v9951_v53 = vpop.eup %9950 }
0x35e6   : > { %v6264_v54 = vsel %vm1149_vm2, %v9951_v53, 0.0 }
0x35e7   : > { %6265 = vadd.xlane.f32.xlu0 %v6264_v54  ;;  %v8832_v54 = vld [vmem:[%s11172_s2 + $0x28] sm:$0xff] }
0x35e9   : > { %v9953_v55 = vpop.eup %9952 }
0x35ea   : > { %v6430_v56 = vsel %vm1149_vm2, %v9953_v55, 0.0 }
0x35eb   : > { %6431 = vadd.xlane.f32.xlu0 %v6430_v56  ;;  %v8833_v56 = vld [vmem:[%s11172_s2 + $0x30] sm:$0xff] }
0x3601   : > { %6269 = vrot.lane.b32.xlu0 %v10815_v30, %s11193_s15 }
0x3605   : > { %6659 = vrot.lane.b32.xlu0 %v10815_v30, %s11183_s17 }
0x3674   : > { %v6266_v58 = vpop.xlane.xlu0 %6265 }
0x3675   : > { %9954 = vrcp.f32 %v6266_v58 }
0x3678   : > { %v6432_v59 = vpop.xlane.xlu0 %6431 }
0x3679   : > { %9956 = vrcp.f32 %v6432_v59 }
0x367c   : > { %v6270_v61 = vpop.permute.xlu0 %6269 }
0x367d   : > { %9530 = vmatpush3.msra.mxu1 %v6270_v61  ;;  %v9796_v61 = vpack.c.bf16 %v8834_v57, %v8833_v56  ;;  %v8839_v56 = vld [vmem:[%s11182_s14 + $0x28] sm:$0xff] }
0x367e   : > { %9539 = vmatprep.subr.mxu1 %v10032_v6 }
0x367f   : > { %v9955_v62 = vpop.eup %9954 }
0x3680   : > { %v6268_v0 = vmul.f32 %v9955_v62, %v9951_v53  ;;  %v6660_v7 = vpop.permute.xlu0 %6659  ;;  %v8819_v62 = vld [vmem:[%s11171_s10 + $0x1] ss:$0 sm:$0xff] }
0x3682   : > { %9532 = vmatmul.mubr.msk.f32.vlgmr.msra.gmra.mrb[56].mxu1 %vm1149_vm2, %v6268_v0 }
0x3683   : > { %v9957_v1 = vpop.eup %9956  ;;  %9540 = vmatpush3.msra.mxu1 %v6436_v42  ;;  %9541 = vmatprep.mubr.msk.f32.mxu1 %vm10031_vm0, %v10032_v6 }
0x3684   : > { %v6434_v33 = vmul.f32 %v9957_v1, %v9953_v55  ;;  %9549 = vmatprep.subr.mxu1 %v10032_v6 }
0x3686   : > { %9542 = vmatmul.mubr.msk.f32.vlgmr.msra.gmra.mrb[58].mxu1 %vm1149_vm2, %v6434_v33 }
0x3687   : > { %9551 = vmatprep.mubr.msk.f32.mxu1 %vm10031_vm0, %v10032_v6  ;;  %9550 = vmatpush3.msra.mxu1 %v8798_v2 }
0x3688   : > { %9559 = vmatprep.subr.mxu1 %v10032_v6 }
0x3755   : > { %v6341_v4 = vpop.f32.mrb[56].mxu1 }
0x3756   : > { %v9533_v5 = vpop.f32.mrb[57].mxu1  ;;  %9552 = vmatmul.mubr.msk.f32.vlgmr.msra.gmra.mrb[60].mxu1 %vm1149_vm2, %v6341_v4 }
0x3757   : > { %9561 = vmatprep.mubr.msk.f32.mxu1 %vm10031_vm0, %v10032_v6 }
0x3759   : > { %v6507_v47 = vpop.f32.mrb[58].mxu1 }
0x375a   : > { %v9543_v27 = vpop.f32.mrb[59].mxu1  ;;  %9547 = vmatmul.mubr.msk.f32.vlgmr.msra.gmra.mrb[68].mxu0 %vm1149_vm2, %v6507_v47 }
0x375b   : > { %9555 = vmatpush3.xpose.msk.msra.mxu0 %vm1149_vm2, %v6660_v7  ;;  %9556 = vmatprep.mubr.msk.f32.mxu0 %vm10031_vm0, %v10032_v6 }
0x375c   : > { %9564 = vmatprep.subr.mxu0 %v10032_v6 }
0x375e   : > { %9557 = vmatmul.mubr.msk.f32.vlgmr.msra.gmra.mrb[70].mxu0 %vm1149_vm2, %v6658_v9 }
0x375f   : > { %9566 = vmatprep.mubr.msk.f32.mxu0 %vm10031_vm0, %v10032_v6  ;;  %9565 = vmatpush3.msra.mxu0 %v8800_v32 }
0x3760   : > { %9574 = vmatprep.subr.mxu0 %v10032_v6 }
0x3829   : > { %v6653_v10 = vpop.f32.mrb[60].mxu1 }
0x382a   : > { %v9553_v12 = vpop.f32.mrb[61].mxu1 }
0x382b   : > { %v8836_v12 = vld [vmem:[%s11176_s22 + $0x1] ss:$0 sm:$0xff] }
0x382d   : > { %v6580_v13 = vpop.f32.mrb[68].mxu0 }
0x382e   : > { %v6654_v14 = vadd.f32 %v6653_v10, %v6580_v13  ;;  %v9548_v63 = vpop.f32.mrb[69].mxu0 }
0x3831   : > { %v6731_v15 = vpop.f32.mrb[70].mxu0 }
0x3832   : > { %v6735_v16 = vsel %vm10552_vm4, -1e+09, %v6731_v15  ;;  %v9558_v17 = vpop.f32.mrb[71].mxu0  ;;  %v8826_v15 = vld [vmem:[%s11173_s7 + $0x30] sm:$0xff] }
0x3833   : > { %v6736_v18 = vsel %vm1149_vm2, %v6735_v16, -inf }
0x3834   : > { %6737 = vmax.xlane.f32.xlu0 %v6736_v18 }
0x384a   : > { %6747 = vrot.lane.b32.xlu0 %v10815_v30, %s11169_s1 }
0x384e   : > { %6897 = vrot.lane.b32.xlu0 %v10815_v30, %s11168_s18 }
0x38c1   : > { %v6738_v19 = vpop.xlane.xlu0 %6737 }
0x38c2   : > { %v6739_v20 = vsub.f32 %v6735_v16, %v6738_v19  ;;  %v8827_v16 = vld [vmem:[%s11173_s7 + $0x38] sm:$0xff] }
0x38c3   : > { %v9790_v17 = vpack.c.bf16 %v8827_v16, %v8826_v15 }
0x38c4   : > { %v6740_v21 = vmul.f32 1.442695, %v6739_v20 }
0x38c5   : > { %v6748_v11 = vpop.permute.xlu0 %6747 }
0x38c6   : > { %9958 = vpow2.f32 %v6740_v21  ;;  %9560 = vmatpush3.msra.mxu1 %v6748_v11  ;;  %v8822_v11 = vld [vmem:[%s11174_s23 + $0x1] ss:$0 sm:$0xff] }
0x38c7   : > { %9569 = vmatprep.subr.mxu1 %v10032_v6 }
0x38c9   : > { %v6898_v29 = vpop.permute.xlu0 %6897 }
0x38d0   : > { %v9959_v22 = vpop.eup %9958 }
0x38d1   : > { %v6742_v23 = vsel %vm1149_vm2, %v9959_v22, 0.0 }
0x38d2   : > { %6743 = vadd.xlane.f32.xlu1 %v6742_v23  ;;  %v8823_v23 = vld [vmem:[%s11175_s26 + $0x1] ss:$0 sm:$0xff] }
0x38e3   : > { %6899 = vrot.lane.b32.xlu1 %v10815_v30, %s11184_s19 }
0x395f   : > { %v6744_v24 = vpop.xlane.xlu1 %6743 }
0x3960   : > { %9960 = vrcp.f32 %v6744_v24 }
0x3963   : > { %v6900_v31 = vpop.permute.xlu1 %6899 }
0x396a   : > { %v9961_v25 = vpop.eup %9960 }
0x396b   : > { %v6746_v26 = vmul.f32 %v9961_v25, %v9959_v22 }
0x396d   : > { %9562 = vmatmul.mubr.msk.f32.vlgmr.msra.gmra.mrb[62].mxu1 %vm1149_vm2, %v6746_v26  ;;  %v8829_v26 = vld [vmem:[%s11177_s3 + $0x1] ss:$0 sm:$0xff] }
0x396e   : > { %9570 = vmatpush3.xpose.msk.msra.mxu1 %vm1149_vm2, %v6900_v31  ;;  %9571 = vmatprep.mubr.msk.f32.mxu1 %vm10031_vm0, %v10032_v6 }
0x396f   : > { %9579 = vmatprep.subr.mxu1 %v10032_v6 }
0x3971   : > { %9572 = vmatmul.mubr.msk.f32.vlgmr.msra.gmra.mrb[64].mxu1 %vm1149_vm2, %v6898_v29 }
0x3972   : > { %9581 = vmatprep.mubr.msk.f32.mxu1 %vm10031_vm0, %v10032_v6  ;;  %9580 = vmatpush3.msra.mxu1 %v8801_v46 }
0x3973   : > { %9792 = vmatprep.subr.bf16.mxu1 %v10030_v3 }
0x3a40   : > { %v6819_v34 = vpop.f32.mrb[62].mxu1 }
0x3a41   : > { %v9563_v35 = vpop.f32.mrb[63].mxu1  ;;  %9567 = vmatmul.mubr.msk.f32.vlgmr.msra.gmra.mrb[72].mxu0 %vm1149_vm2, %v6819_v34 }
0x3a42   : > { %9576 = vmatprep.mubr.msk.f32.mxu0 %vm10031_vm0, %v10032_v6 }
0x3a44   : > { %v6971_v60 = vpop.f32.mrb[64].mxu1 }
0x3a45   : > { %v6975_v37 = vsel %vm10552_vm4, -1e+09, %v6971_v60  ;;  %v9573_v38 = vpop.f32.mrb[65].mxu1 }
0x3a46   : > { %v6976_v39 = vsel %vm1149_vm2, %v6975_v37, -inf }
0x3a47   : > { %6977 = vmax.xlane.f32.xlu1 %v6976_v39 }
0x3ad4   : > { %v6978_v40 = vpop.xlane.xlu1 %6977 }
0x3ad5   : > { %v6979_v41 = vsub.f32 %v6975_v37, %v6978_v40 }
0x3ad7   : > { %v6980_v8 = vmul.f32 1.442695, %v6979_v41 }
0x3ad9   : > { %9962 = vpow2.f32 %v6980_v8 }
0x3ae3   : > { %v9963_v43 = vpop.eup %9962 }
0x3ae4   : > { %v6982_v45 = vsel %vm1149_vm2, %v9963_v43, 0.0 }
0x3ae5   : > { %6983 = vadd.xlane.f32.xlu0 %v6982_v45 }
0x3afb   : > { %6987 = vrot.lane.b32.xlu0 %v10815_v30, %s11170_s28  ;;  %v8831_v30 = vld [vmem:[%s11172_s2 + $0x20] sm:$0xff] }
0x3afc   : > { %v9793_v55 = vpack.c.bf16 %v8832_v54, %v8831_v30 }
0x3b14   : > { %v6892_v51 = vpop.f32.mrb[72].mxu0 }
0x3b15   : > { %v6896_v48 = vadd.f32 %v6892_v51, %v6654_v14  ;;  %v9568_v49 = vpop.f32.mrb[73].mxu0  ;;  %v8825_v14 = vld [vmem:[%s11173_s7 + $0x28] sm:$0xff] }
0x3b72   : > { %v6984_v36 = vpop.xlane.xlu0 %6983 }
0x3b73   : > { %9964 = vrcp.f32 %v6984_v36 }
0x3b76   : > { %v6988_v50 = vpop.permute.xlu0 %6987 }
0x3b77   : > { %9575 = vmatpush3.msra.mxu0 %v6988_v50 }
0x3b78   : > { %9786 = vmatprep.subr.bf16.mxu0 %v10030_v3 }
0x3b7d   : > { %v9965_v52 = vpop.eup %9964 }
0x3b7e   : > { %v6986_v53 = vmul.f32 %v9965_v52, %v9963_v43 }
0x3b80   : > { %9577 = vmatmul.mubr.msk.f32.vlgmr.msra.gmra.mrb[74].mxu0 %vm1149_vm2, %v6986_v53 }
0x3b81   : > { %9592 = vmatprep.mubr.msk.f32.mxu0 %vm10031_vm0, %v10032_v6 }
0x3c53   : > { %v7059_v58 = vpop.f32.mrb[74].mxu0 }
0x3c54   : > { %v9578_v59 = vpop.f32.mrb[75].mxu0  ;;  %9582 = vmatmul.mubr.msk.f32.vlgmr.msra.gmra.mrb[66].mxu1 %vm1149_vm2, %v7059_v58 }
0x3c55   : > { %9794 = vmatpush3.bf16.msra.mxu1 %v9793_v55  ;;  %9603 = vmatprep.mubr.msk.f32.mxu1 %vm10031_vm0, %v10032_v6 }
0x3c56   : > { %9795 = vmatprep.subr.bf16.mxu1 %v10030_v3 }
0x3c59   : > { %9797 = vmatpush3.bf16.msra.mxu1 %v9796_v61 }
0x3c5a   : > { %9611 = vmatprep.subr.mxu1 %v10032_v6 }
0x3c5c   : > { %9604 = vmatmul.mubr.msk.f32.vlgmr.msra.gmra.mrb[68].mxu1 %vm1067_vm1, %v10654_v44 }
0x3c5d   : > { %9613 = vmatprep.mubr.msk.f32.mxu1 %vm10031_vm0, %v10032_v6 }
0x3d27   : > { %v7132_v0 = vpop.f32.mrb[66].mxu1 }
0x3d28   : > { %v7136_v42 = vadd.f32 %v7132_v0, %v6896_v48  ;;  %v9583_v1 = vpop.f32.mrb[67].mxu1 }
0x3d2a   : > { %v7143_v33 = vadd.f32 %v8819_v62, %v7136_v42  ;;  %v8838_v62 = vld [vmem:[%s11182_s14 + $0x20] sm:$0xff] }
0x3d2c   : > { %v7144_v2 = vadd.f32 %v7143_v33, %v10808_v28  ;;  %v8824_v28 = vld [vmem:[%s11173_s7 + $0x20] sm:$0xff] }
0x3d2d   : > { %v9787_v63 = vpack.c.bf16 %v8825_v14, %v8824_v28 }
0x3d2e   : > { %v7149_v4 = vsel %vm1067_vm1, %v7144_v2, 0.0 }
0x3d2f   : > { %v7341_v5 = vpop.f32.mrb[68].mxu1  ;;  %7150 = vadd.xlane.f32.xlu1 %v7149_v4  ;;  %9788 = vmatpush3.bf16.msra.mxu0 %v9787_v63 }
0x3d30   : > { %v9605_v47 = vpop.f32.mrb[69].mxu1  ;;  %v10927_v13 = vadd.f32 %v8836_v12, %v7341_v5  ;;  %9789 = vmatprep.subr.bf16.mxu0 %v10030_v3 }
0x3d33   : > { %9791 = vmatpush3.bf16.msra.mxu0 %v9790_v17 }
0x3d34   : > { %9606 = vmatprep.subr.mxu0 %v10032_v6 }
0x3dbc   : > { %v7151_v44 = vpop.xlane.xlu1 %7150 }
0x3dbd   : > { %v7152_v7 = vmul.f32 0.03125, %v7151_v44 }
0x3dbf   : > { %v7153_v27 = vsub.f32 %v7144_v2, %v7152_v7 }
0x3dc1   : > { %v7154_v9 = vmul.f32 %v7153_v27, %v7153_v27 }
0x3dc3   : > { %v7155_v10 = vsel %vm1067_vm1, %v7154_v9, 0.0 }
0x3dc4   : > { %7156 = vadd.xlane.f32.xlu1 %v7155_v10 }
0x3dd5   : > { %7517 = vrot.lane.b32.xlu1 %v10927_v13, %s11178_s5 }
0x3e51   : > { %v7157_v18 = vpop.xlane.xlu1 %7156 }
0x3e52   : > { %v7158_v19 = vmul.f32 0.03125, %v7157_v18 }
0x3e54   : > { %v7159_v20 = vadd.f32 1e-05, %v7158_v19 }
0x3e55   : > { %v7518_v34 = vpop.permute.xlu1 %7517 }
0x3e56   : > { %9966 = vrsqrt.f32 %v7159_v20 }
0x3e60   : > { %v9967_v21 = vpop.eup %9966 }
0x3e61   : > { %v7161_v22 = vmul.f32 %v9967_v21, %v7153_v27 }
0x3e63   : > { %v7168_v24 = vmul.f32 %v8822_v11, %v7161_v22  ;;  %v8840_v22 = vld [vmem:[%s11182_s14 + $0x30] sm:$0xff] }
0x3e65   : > { %v10939_v25 = vadd.f32 %v8823_v23, %v7168_v24 }
0x3e67   : > { %9593 = vmatmul.mubr.msk.f32.vlgmr.msra.gmra.mrb[76].mxu0 %vm1067_vm1, %v10939_v25 }
0x3e68   : > { %9607 = vmatpush3.xpose.msk.msra.mxu0 %vm1149_vm2, %v10927_v13  ;;  %9608 = vmatprep.mubr.msk.f32.mxu0 %vm10031_vm0, %v10032_v6 }
0x3e69   : > { %9616 = vmatprep.subr.mxu0 %v10032_v6 }
0x3f3a   : > { %v7258_v31 = vpop.f32.mrb[76].mxu0 }
0x3f3b   : > { %v10949_v29 = vadd.f32 %v8829_v26, %v7258_v31  ;;  %v9594_v32 = vpop.f32.mrb[77].mxu0 }
0x3f3d   : > { %7515 = vrot.lane.b32.xlu0 %v10949_v29, %s11178_s5  ;;  %9609 = vmatmul.mubr.msk.f32.vlgmr.msra.gmra.mrb[78].mxu0 %vm1149_vm2, %v10949_v29  ;;  %s11194_s5 = sld [smem:[#allocation32_spill]] }
0x3f3e   : > { %9617 = vmatpush3.xpose.msk.msra.mxu0 %vm1149_vm2, %v7518_v34  ;;  %9618 = vmatprep.mubr.msk.f32.mxu0 %vm10031_vm0, %v10032_v6 }
0x3f3f   : > { %9626 = vmatprep.subr.mxu0 %v10032_v6 }
0x3faf   : > { %v7516_v35 = vpop.permute.xlu0 %7515 }
0x3fb0   : > { %9619 = vmatmul.mubr.msk.f32.vlgmr.msra.gmra.mrb[80].mxu0 %vm1149_vm2, %v7516_v35 }
0x3fb1   : > { %9628 = vmatprep.mubr.msk.f32.mxu0 %vm10031_vm0, %v10032_v6  ;;  %9627 = vmatpush3.msra.mxu0 %v8839_v56 }
0x3fb2   : > { %9636 = vmatprep.subr.mxu0 %v10032_v6 }
0x4010   : > { %v7424_v60 = vpop.f32.mrb[78].mxu0 }
0x4011   : > { %v9610_v37 = vpop.f32.mrb[79].mxu0  ;;  %v7428_v38 = vsel %vm1149_vm2, %v7424_v60, -inf }
0x4012   : > { %7429 = vmax.xlane.f32.xlu0 %v7428_v38  ;;  %v8841_v38 = vld [vmem:[%s11182_s14 + $0x38] sm:$0xff] }
0x4083   : > { %v7589_v39 = vpop.f32.mrb[80].mxu0 }
0x4084   : > { %v9620_v40 = vpop.f32.mrb[81].mxu0  ;;  %v7593_v41 = vsel %vm1149_vm2, %v7589_v39, -inf }
0x4085   : > { %7594 = vmax.xlane.f32.xlu1 %v7593_v41 }
0x4096   : > { %7439 = vrot.lane.b32.xlu1 %v10927_v13, %s11180_s8 }
0x409a   : > { %7828 = vrot.lane.b32.xlu1 %v10927_v13, %s11181_s13 }
0x409e   : > { %7826 = vrot.lane.b32.xlu1 %v10949_v29, %s11181_s13  ;;  %s1054_s13 = scalar_lea.vmem %s11194_s5, %s10243_s0 }
0x409f   : > { %v7430_v8 = vpop.xlane.xlu0 %7429 }
0x40a0   : > { %v7431_v43 = vsub.f32 %v7424_v60, %v7430_v8 }
0x40a2   : > { %v7432_v45 = vmul.f32 1.442695, %v7431_v43 }
0x40a4   : > { %9968 = vpow2.f32 %v7432_v45 }
0x40ae   : > { %v9969_v46 = vpop.eup %9968 }
0x40af   : > { %v7434_v51 = vsel %vm1149_vm2, %v9969_v46, 0.0 }
0x40b0   : > { %7435 = vadd.xlane.f32.xlu0 %v7434_v51 }
0x4112   : > { %v7595_v48 = vpop.xlane.xlu1 %7594 }
0x4113   : > { %v7596_v49 = vsub.f32 %v7589_v39, %v7595_v48  ;;  %v8859_v48 = vld [vmem:[%s11185_s21 + $0x1] ss:$0 sm:$0xff] }
0x4115   : > { %v7597_v36 = vmul.f32 1.442695, %v7596_v49 }
0x4116   : > { %v7440_v50 = vpop.permute.xlu1 %7439 }
0x4117   : > { %9970 = vpow2.f32 %v7597_v36  ;;  %9612 = vmatpush3.msra.mxu1 %v7440_v50 }
0x4118   : > { %9621 = vmatprep.subr.mxu1 %v10032_v6 }
0x411a   : > { %v7829_v1 = vpop.permute.xlu1 %7828 }
0x411e   : > { %v7827_v4 = vpop.permute.xlu1 %7826 }
0x4121   : > { %v9971_v52 = vpop.eup %9970 }
0x4122   : > { %v7599_v53 = vsel %vm1149_vm2, %v9971_v52, 0.0 }
0x4123   : > { %7600 = vadd.xlane.f32.xlu0 %v7599_v53 }
0x4139   : > { %7604 = vrot.lane.b32.xlu0 %v10927_v13, %s11179_s6 }
0x413d   : > { %v7436_v30 = vpop.xlane.xlu0 %7435 }
0x413e   : > { %9972 = vrcp.f32 %v7436_v30 }
0x4148   : > { %v9973_v54 = vpop.eup %9972 }
0x4149   : > { %v7438_v55 = vmul.f32 %v9973_v54, %v9969_v46 }
0x414b   : > { %9614 = vmatmul.mubr.msk.f32.vlgmr.msra.gmra.mrb[70].mxu1 %vm1149_vm2, %v7438_v55 }
0x414c   : > { %9623 = vmatprep.mubr.msk.f32.mxu1 %vm10031_vm0, %v10032_v6 }
0x41b0   : > { %v7601_v57 = vpop.xlane.xlu0 %7600 }
0x41b1   : > { %9974 = vrcp.f32 %v7601_v57 }
0x41b4   : > { %v7605_v58 = vpop.permute.xlu0 %7604 }
0x41b5   : > { %9622 = vmatpush3.msra.mxu1 %v7605_v58  ;;  %v8864_v58 = vld [vmem:[%s11186_s24 + $0x20] sm:$0xff] }
0x41b6   : > { %9631 = vmatprep.subr.mxu1 %v10032_v6 }
0x41bb   : > { %v9975_v59 = vpop.eup %9974 }
0x41bc   : > { %v7603_v61 = vmul.f32 %v9975_v59, %v9971_v52  ;;  %v8865_v59 = vld [vmem:[%s11186_s24 + $0x28] sm:$0xff] }
0x41be   : > { %9624 = vmatmul.mubr.msk.f32.vlgmr.msra.gmra.mrb[72].mxu1 %vm1149_vm2, %v7603_v61  ;;  %v9799_v61 = vpack.c.bf16 %v8865_v59, %v8864_v58 }
0x41bf   : > { %9632 = vmatpush3.msra.mxu1 %v8838_v62  ;;  %9633 = vmatprep.mubr.msk.f32.mxu1 %vm10031_vm0, %v10032_v6  ;;  %v8867_v62 = vld [vmem:[%s11186_s24 + $0x38] sm:$0xff] }
0x41c0   : > { %9641 = vmatprep.subr.mxu1 %v10032_v6 }
0x421e   : > { %v7511_v0 = vpop.f32.mrb[70].mxu1 }
0x421f   : > { %v9615_v42 = vpop.f32.mrb[71].mxu1  ;;  %9634 = vmatmul.mubr.msk.f32.vlgmr.msra.gmra.mrb[74].mxu1 %vm1149_vm2, %v7511_v0 }
0x4220   : > { %9643 = vmatprep.mubr.msk.f32.mxu1 %vm10031_vm0, %v10032_v6  ;;  %v8871_v42 = vld [vmem:[%s10212_s27 + $0x40] sm:$0xff] }
0x4291   : > { %v7676_v33 = vpop.f32.mrb[72].mxu1 }
0x4292   : > { %v9625_v2 = vpop.f32.mrb[73].mxu1  ;;  %9629 = vmatmul.mubr.msk.f32.vlgmr.msra.gmra.mrb[82].mxu0 %vm1149_vm2, %v7676_v33  ;;  %v8873_v33 = vld [vmem:[%s10212_s27 + $0x50] sm:$0xff] }
0x4293   : > { %9637 = vmatpush3.xpose.msk.msra.mxu0 %vm1149_vm2, %v7829_v1  ;;  %9638 = vmatprep.mubr.msk.f32.mxu0 %vm10031_vm0, %v10032_v6  ;;  %v8872_v1 = vld [vmem:[%s10212_s27 + $0x48] sm:$0xff] }
0x4294   : > { %9646 = vmatprep.subr.mxu0 %v10032_v6  ;;  %v9805_v2 = vpack.c.bf16 %v8872_v1, %v8871_v42 }
0x4296   : > { %9639 = vmatmul.mubr.msk.f32.vlgmr.msra.gmra.mrb[84].mxu0 %vm1149_vm2, %v7827_v4  ;;  %v8874_v4 = vld [vmem:[%s10212_s27 + $0x58] sm:$0xff] }
0x4297   : > { %9648 = vmatprep.mubr.msk.f32.mxu0 %vm10031_vm0, %v10032_v6  ;;  %9647 = vmatpush3.msra.mxu0 %v8840_v22  ;;  %v8880_v22 = vld [vmem:[%s10217_s4 + $0x1] ss:$0 sm:$0xff] }
0x4298   : > { %9656 = vmatprep.subr.mxu0 %v10032_v6 }
0x42f2   : > { %v7822_v5 = vpop.f32.mrb[74].mxu1 }
0x42f3   : > { %v9635_v47 = vpop.f32.mrb[75].mxu1 }
0x42f4   : > { %v8875_v47 = vld [vmem:[%s10212_s27 + $0x60] sm:$0xff] }
0x4365   : > { %v7749_v44 = vpop.f32.mrb[82].mxu0 }
0x4366   : > { %v7823_v7 = vadd.f32 %v7822_v5, %v7749_v44  ;;  %v9630_v27 = vpop.f32.mrb[83].mxu0  ;;  %v9808_v5 = vpack.c.bf16 %v8874_v4, %v8873_v33  ;;  %v8876_v44 = vld [vmem:[%s10212_s27 + $0x68] sm:$0xff] }
0x4369   : > { %v7900_v9 = vpop.f32.mrb[84].mxu0 }
0x436a   : > { %v9640_v10 = vpop.f32.mrb[85].mxu0  ;;  %v7904_v12 = vsel %vm1149_vm2, %v7900_v9, -inf }
0x436b   : > { %7905 = vmax.xlane.f32.xlu0 %v7904_v12 }
0x4381   : > { %7915 = vrot.lane.b32.xlu0 %v10927_v13, %s11183_s17 }
0x4385   : > { %8065 = vrot.lane.b32.xlu0 %v10949_v29, %s11168_s18 }
0x43f8   : > { %v7906_v28 = vpop.xlane.xlu0 %7905 }
0x43f9   : > { %v7907_v14 = vsub.f32 %v7900_v9, %v7906_v28  ;;  %v8862_v28 = vld [vmem:[%s11187_s25 + $0x1] ss:$0 sm:$0xff] }
0x43fb   : > { %v7908_v63 = vmul.f32 1.442695, %v7907_v14 }
0x43fc   : > { %v7916_v15 = vpop.permute.xlu0 %7915 }
0x43fd   : > { %9976 = vpow2.f32 %v7908_v63  ;;  %9642 = vmatpush3.msra.mxu1 %v7916_v15  ;;  %v8863_v63 = vld [vmem:[%s11188_s29 + $0x1] ss:$0 sm:$0xff] }
0x43fe   : > { %9651 = vmatprep.subr.mxu1 %v10032_v6 }
0x4400   : > { %v8066_v11 = vpop.permute.xlu0 %8065 }
0x4407   : > { %v9977_v16 = vpop.eup %9976 }
0x4408   : > { %v7910_v17 = vsel %vm1149_vm2, %v9977_v16, 0.0 }
0x4409   : > { %7911 = vadd.xlane.f32.xlu1 %v7910_v17  ;;  %v8877_v17 = vld [vmem:[%s10212_s27 + $0x70] sm:$0xff] }
0x441a   : > { %8067 = vrot.lane.b32.xlu1 %v10927_v13, %s11168_s18 }
0x4496   : > { %v7912_v18 = vpop.xlane.xlu1 %7911 }
0x4497   : > { %9978 = vrcp.f32 %v7912_v18  ;;  %v8878_v18 = vld [vmem:[%s10212_s27 + $0x78] sm:$0xff] }
0x449a   : > { %v8068_v21 = vpop.permute.xlu1 %8067 }
0x44a1   : > { %v9979_v19 = vpop.eup %9978 }
0x44a2   : > { %v7914_v20 = vmul.f32 %v9979_v19, %v9977_v16  ;;  %v9814_v19 = vpack.c.bf16 %v8878_v18, %v8877_v17 }
0x44a4   : > { %9644 = vmatmul.mubr.msk.f32.vlgmr.msra.gmra.mrb[76].mxu1 %vm1149_vm2, %v7914_v20  ;;  %v8869_v20 = vld [vmem:[%s10207_s20 + $0x1] ss:$0 sm:$0xff] }
0x44a5   : > { %9652 = vmatpush3.xpose.msk.msra.mxu1 %vm1149_vm2, %v8068_v21  ;;  %9653 = vmatprep.mubr.msk.f32.mxu1 %vm10031_vm0, %v10032_v6 }
0x44a6   : > { %9661 = vmatprep.subr.mxu1 %v10032_v6 }
0x44a8   : > { %9654 = vmatmul.mubr.msk.f32.vlgmr.msra.gmra.mrb[78].mxu1 %vm1149_vm2, %v8066_v11 }
0x44a9   : > { %9663 = vmatprep.mubr.msk.f32.mxu1 %vm10031_vm0, %v10032_v6  ;;  %9662 = vmatpush3.msra.mxu1 %v8841_v38 }
0x44aa   : > { %9804 = vmatprep.subr.bf16.mxu1 %v10030_v3 }
0x4577   : > { %v7987_v23 = vpop.f32.mrb[76].mxu1 }
0x4578   : > { %v9645_v24 = vpop.f32.mrb[77].mxu1  ;;  %9649 = vmatmul.mubr.msk.f32.vlgmr.msra.gmra.mrb[86].mxu0 %vm1149_vm2, %v7987_v23 }
0x4579   : > { %9658 = vmatprep.mubr.msk.f32.mxu0 %vm10031_vm0, %v10032_v6 }
0x457b   : > { %v8139_v26 = vpop.f32.mrb[78].mxu1 }
0x457c   : > { %v9655_v31 = vpop.f32.mrb[79].mxu1  ;;  %v8143_v29 = vsel %vm1149_vm2, %v8139_v26, -inf }
0x457d   : > { %8144 = vmax.xlane.f32.xlu1 %v8143_v29 }
0x460a   : > { %v8145_v32 = vpop.xlane.xlu1 %8144 }
0x460b   : > { %v8146_v34 = vsub.f32 %v8139_v26, %v8145_v32 }
0x460d   : > { %v8147_v35 = vmul.f32 1.442695, %v8146_v34 }
0x460f   : > { %9980 = vpow2.f32 %v8147_v35 }
0x4619   : > { %v9981_v60 = vpop.eup %9980 }
0x461a   : > { %v8149_v37 = vsel %vm1149_vm2, %v9981_v60, 0.0 }
0x461b   : > { %8150 = vadd.xlane.f32.xlu0 %v8149_v37 }
0x4631   : > { %8154 = vrot.lane.b32.xlu0 %v10927_v13, %s11184_s19 }
0x464b   : > { %v8060_v39 = vpop.f32.mrb[86].mxu0 }
0x464c   : > { %v8064_v40 = vadd.f32 %v8060_v39, %v7823_v7  ;;  %v9650_v41 = vpop.f32.mrb[87].mxu0  ;;  %v9811_v7 = vpack.c.bf16 %v8876_v44, %v8875_v47 }
0x46a8   : > { %v8151_v8 = vpop.xlane.xlu0 %8150 }
0x46a9   : > { %9982 = vrcp.f32 %v8151_v8  ;;  %v8884_v8 = vld [vmem:[%s11189_s30 + $0x1] ss:$0 sm:$0xff] }
0x46ac   : > { %v8155_v43 = vpop.permute.xlu0 %8154 }
0x46ad   : > { %9657 = vmatpush3.msra.mxu0 %v8155_v43 }
0x46ae   : > { %9798 = vmatprep.subr.bf16.mxu0 %v10030_v3 }
0x46b3   : > { %v9983_v45 = vpop.eup %9982 }
0x46b4   : > { %v8153_v46 = vmul.f32 %v9983_v45, %v9981_v60  ;;  %v8885_v45 = vld [vmem:[%s11191_s9 + $0x1] ss:$0 sm:$0xff] }
0x46b6   : > { %9659 = vmatmul.mubr.msk.f32.vlgmr.msra.gmra.mrb[88].mxu0 %vm1149_vm2, %v8153_v46 }
0x46b7   : > { %9674 = vmatprep.mubr.msk.f32.mxu0 %vm10031_vm0, %v10032_v6  ;;  %9800 = vmatpush3.bf16.msra.mxu0 %v9799_v61 }
0x46b8   : > { %9801 = vmatprep.subr.bf16.mxu0 %v10030_v3 }
0x4789   : > { %v8226_v13 = vpop.f32.mrb[88].mxu0 }
0x478a   : > { %v9660_v51 = vpop.f32.mrb[89].mxu0  ;;  %9664 = vmatmul.mubr.msk.f32.vlgmr.msra.gmra.mrb[80].mxu1 %vm1149_vm2, %v8226_v13 }
0x478b   : > { %9693 = vmatprep.mubr.msk.f32.mxu1 %vm10031_vm0, %v10032_v6  ;;  %9806 = vmatpush3.bf16.msra.mxu1 %v9805_v2 }
0x478c   : > { %9807 = vmatprep.subr.bf16.mxu1 %v10030_v3 }
0x478f   : > { %9809 = vmatpush3.bf16.msra.mxu1 %v9808_v5 }
0x4790   : > { %9810 = vmatprep.subr.bf16.mxu1 %v10030_v3 }
0x4793   : > { %9812 = vmatpush3.bf16.msra.mxu1 %v9811_v7 }
0x4794   : > { %9813 = vmatprep.subr.bf16.mxu1 %v10030_v3 }
0x4797   : > { %9815 = vmatpush3.bf16.msra.mxu1 %v9814_v19 }
0x485d   : > { %v8299_v49 = vpop.f32.mrb[80].mxu1 }
0x485e   : > { %v8303_v36 = vadd.f32 %v8299_v49, %v8064_v40  ;;  %v9665_v50 = vpop.f32.mrb[81].mxu1 }
0x4860   : > { %v8310_v52 = vadd.f32 %v8859_v48, %v8303_v36 }
0x4862   : > { %v8311_v53 = vadd.f32 %v8310_v52, %v10939_v25  ;;  %v8866_v25 = vld [vmem:[%s11186_s24 + $0x30] sm:$0xff] }
0x4863   : > { %v9802_v0 = vpack.c.bf16 %v8867_v62, %v8866_v25 }
0x4864   : > { %v8316_v30 = vsel %vm1067_vm1, %v8311_v53, 0.0 }
0x4865   : > { %8317 = vadd.xlane.f32.xlu1 %v8316_v30  ;;  %9803 = vmatpush3.bf16.msra.mxu0 %v9802_v0 }
0x48f2   : > { %v8318_v54 = vpop.xlane.xlu1 %8317 }
0x48f3   : > { %v8319_v55 = vmul.f32 0.03125, %v8318_v54 }
0x48f5   : > { %v8320_v56 = vsub.f32 %v8311_v53, %v8319_v55 }
0x48f7   : > { %v8321_v6 = vmul.f32 %v8320_v56, %v8320_v56 }
0x48f9   : > { %v8322_v57 = vsel %vm1067_vm1, %v8321_v6, 0.0 }
0x48fa   : > { %8323 = vadd.xlane.f32.xlu1 %v8322_v57 }
0x4987   : > { %v8324_v27 = vpop.xlane.xlu1 %8323 }
0x4988   : > { %v8325_v9 = vmul.f32 0.03125, %v8324_v27 }
0x498a   : > { %v8326_v10 = vadd.f32 1e-05, %v8325_v9 }
0x498c   : > { %9984 = vrsqrt.f32 %v8326_v10 }
0x4996   : > { %v9985_v12 = vpop.eup %9984 }
0x4997   : > { %v8328_v14 = vmul.f32 %v9985_v12, %v8320_v56 }
0x4999   : > { %v8335_v15 = vmul.f32 %v8862_v28, %v8328_v14 }
0x499b   : > { %v8342_v16 = vadd.f32 %v8863_v63, %v8335_v15 }
0x499d   : > { %9675 = vmatmul.mubr.msk.f32.vlgmr.msra.gmra.mrb[90].mxu0 %vm1067_vm1, %v8342_v16 }
0x4a70   : > { %v8425_v3 = vpop.f32.mrb[90].mxu0 }
0x4a71   : > { %v8426_v21 = vadd.f32 %v8869_v20, %v8425_v3  ;;  %v9676_v11 = vpop.f32.mrb[91].mxu0 }
0x4a73   : > { %9694 = vmatmul.mubr.msk.f32.vlgmr.msra.gmra.mrb[82].mxu1 %vm2237_vm3, %v8426_v21 }
0x4b46   : > { %v8515_v23 = vpop.f32.mrb[82].mxu1 }
0x4b47   : > { %v8516_v24 = vadd.f32 %v8880_v22, %v8515_v23  ;;  %v9695_v26 = vpop.f32.mrb[83].mxu1 }
0x4b49   : > { %v8519_v31 = vadd.f32 %v8516_v24, %v8342_v16 }
0x4b4b   : > { %v8524_v29 = vsel %vm1067_vm1, %v8519_v31, 0.0 }
0x4b4c   : > { %8525 = vadd.xlane.f32.xlu1 %v8524_v29 }
0x4bd9   : > { %v8526_v32 = vpop.xlane.xlu1 %8525 }
0x4bda   : > { %v8527_v34 = vmul.f32 0.03125, %v8526_v32 }
0x4bdc   : > { %v8528_v35 = vsub.f32 %v8519_v31, %v8527_v34 }
0x4bde   : > { %v8529_v60 = vmul.f32 %v8528_v35, %v8528_v35 }
0x4be0   : > { %v8530_v37 = vsel %vm1067_vm1, %v8529_v60, 0.0 }
0x4be1   : > { %8531 = vadd.xlane.f32.xlu1 %v8530_v37 }
0x4c6e   : > { %v8532_v38 = vpop.xlane.xlu1 %8531 }
0x4c6f   : > { %v8533_v39 = vmul.f32 0.03125, %v8532_v38 }
0x4c71   : > { %v8534_v40 = vadd.f32 1e-05, %v8533_v39 }
0x4c73   : > { %9986 = vrsqrt.f32 %v8534_v40 }
0x4c7d   : > { %v9987_v41 = vpop.eup %9986 }
0x4c7e   : > { %v8536_v43 = vmul.f32 %v9987_v41, %v8528_v35 }
0x4c80   : > { %v8543_v46 = vmul.f32 %v8884_v8, %v8536_v43 }
0x4c82   : > { %v8550_v13 = vadd.f32 %v8885_v45, %v8543_v46 }
0x4c84   : > { %8551 = vst.msk [vmem:[%s1054_s13] sm:$0xff] %vm1067_vm1, %v8550_v13 }
0x4c85 PF: > { %s11195_s17 = sld [smem:[#allocation33_spill]] }
0x4c8b   : > { %s79_s15 = sadd.s32 1, %s11195_s17  }
0x4c8c   : > { %p76_p4 = scmp.ge.s32.totalorder %s79_s15, 4  }
0x4c8e   :  { %78 = sbr.rel (!%p76_p4) target bundleno = 75 (0x4b), region = 255 }

</bundles_post_ra>
